<compile_context>
chip_gen: v7x
topology: tpu7x:2x2x1
jax: 0.10.0
libtpu: 0.0.40
codegen_flags: <defaults>
</compile_context>

<pallas_src>
import jax
import jax.numpy as jnp
from jax.experimental import pallas as pl
from jax.experimental.pallas import tpu as pltpu


FEAT_DIM = 1432           # torch heads expect 1432-dim encoder features
FEAT_PAD = 1536           # 12 * 128, lane-aligned
HEAD_PAD = 128            # 2 + 7 + 90 = 99 real head outputs, padded lane-dense
TK = 512                  # K-tile over in_dim (512x1536 bf16 = 1.5 MiB / buffer)
_GENDER = (0, 2)          # column ranges inside the fused head output slab
_EMO = (2, 9)
_AGE = (9, 99)


def _round_up(n, m):
    return ((n + m - 1) // m) * m


def _mtl_kernel(x_ref, we_ref, be_ref, wh_ref, bh_ref, out_ref, acc_ref):
    """Grid = (batch tiles ["parallel"], K tiles over in_dim ["arbitrary"])."""
    k = pl.program_id(1)

    @pl.when(k == 0)
    def _():
        acc_ref[...] = jnp.zeros_like(acc_ref)

    # Encoder projection partial product: bf16 operands, f32 MXU accumulation.
    acc_ref[...] += jnp.dot(x_ref[...], we_ref[...],
                            preferred_element_type=jnp.float32)

    @pl.when(k == pl.num_programs(1) - 1)
    def _():
        feat = acc_ref[...] + be_ref[...]                         # [TB, FEAT_PAD] f32
        # Fused heads: one K=2*FEAT_PAD dot replaces two K=FEAT_PAD dots + add.
        lhs = jnp.concatenate(
            [feat.astype(jnp.bfloat16),                           # gender / emotions LHS
             jnp.maximum(feat, 0.0).astype(jnp.bfloat16)],        # age LHS (ReLU'd)
            axis=-1)                                              # [TB, 2*FEAT_PAD] bf16
        out_ref[...] = (
            jnp.dot(lhs, wh_ref[...], preferred_element_type=jnp.float32)
            + bh_ref[...])


def init_params(key, in_dim, feat_dim=FEAT_DIM):
    """Deterministic synthetic f32 weights in torch-like shapes."""
    ks = jax.random.split(key, 8)

    def lin(kw, kb, n_in, n_out):
        bound = 1.0 / jnp.sqrt(jnp.float32(n_in))
        w = jax.random.uniform(kw, (n_in, n_out), jnp.float32, -bound, bound)
        b = jax.random.uniform(kb, (1, n_out), jnp.float32, -bound, bound)
        return w, b

    we, be = lin(ks[0], ks[1], in_dim, feat_dim)     # synthetic encoder projection
    w1, b1 = lin(ks[2], ks[3], feat_dim, 2)          # fc1 -> gender
    w2, b2 = lin(ks[4], ks[5], feat_dim, 90)         # fc2 -> age
    w3, b3 = lin(ks[6], ks[7], feat_dim, 7)          # fc3 -> emotions
    return (we, be, w1, b1, w2, b2, w3, b3)


def pack_params(params):
    """Pad to lane/tile-aligned shapes, fuse the three heads, cast weights to bf16."""
    (we, be, w1, b1, w2, b2, w3, b3) = params
    in_dim = we.shape[0]
    in_pad = _round_up(max(in_dim, TK), TK)          # K-tileable encoder input dim

    we_p = jnp.zeros((in_pad, FEAT_PAD), jnp.float32)
    we_p = we_p.at[:in_dim, :FEAT_DIM].set(we)
    be_p = jnp.zeros((1, FEAT_PAD), jnp.float32).at[:, :FEAT_DIM].set(be)

    # Fused head weight: rows [0, FEAT_PAD) multiply raw features (gender,
    # emotions); rows [FEAT_PAD, 2*FEAT_PAD) multiply ReLU'd features (age).
    wh = jnp.zeros((2 * FEAT_PAD, HEAD_PAD), jnp.float32)
    wh = wh.at[:FEAT_DIM, _GENDER[0]:_GENDER[1]].set(w1)
    wh = wh.at[:FEAT_DIM, _EMO[0]:_EMO[1]].set(w3)
    wh = wh.at[FEAT_PAD:FEAT_PAD + FEAT_DIM, _AGE[0]:_AGE[1]].set(w2)

    bh = jnp.zeros((1, HEAD_PAD), jnp.float32)
    bh = bh.at[:, _GENDER[0]:_GENDER[1]].set(b1)
    bh = bh.at[:, _EMO[0]:_EMO[1]].set(b3)
    bh = bh.at[:, _AGE[0]:_AGE[1]].set(b2)

    # TODO(synk): next lever is halving the streamed encoder-weight bytes:
    # int8 (per-channel scale) on v5e/v6e, fp8-e4m3 on v7x (its MXU has no int
    # path).  Kept bf16 here for cross-chip portability / exact torch parity.
    return (we_p.astype(jnp.bfloat16), be_p, wh.astype(jnp.bfloat16), bh)


def multitask_forward(x_nchw, packed):
    """Returns [age, gender, emotions], mirroring MultiTaskModel.forward."""
    (we_bf, be, wh_bf, bh) = packed
    B = x_nchw.shape[0]
    in_pad = we_bf.shape[0]

    # Batch tiling: pad to a sublane multiple; once batch is large, tile at 128
    # (weight BlockSpecs are constant in the batch axis -> weight is amortized
    # across batch tiles and the axis shards across TensorCores on v7x).
    if B <= 128:
        TB = max(8, _round_up(B, 8))
        Bp = TB
    else:
        TB = 128
        Bp = _round_up(B, TB)

    x_flat = x_nchw.reshape(B, -1)
    in_dim = x_flat.shape[1]
    x_pad = jnp.pad(x_flat.astype(jnp.bfloat16),
                    ((0, Bp - B), (0, in_pad - in_dim)))

    grid = (Bp // TB, in_pad // TK)

    flops = 2 * Bp * in_pad * FEAT_PAD + 2 * Bp * (2 * FEAT_PAD) * HEAD_PAD
    bytes_accessed = (x_pad.size * 2 + we_bf.size * 2 + be.size * 4
                      + wh_bf.size * 2 + bh.size * 4 + Bp * HEAD_PAD * 4)

    out = pl.pallas_call(
        _mtl_kernel,
        out_shape=jax.ShapeDtypeStruct((Bp, HEAD_PAD), jnp.float32),
        grid=grid,
        in_specs=[
            pl.BlockSpec((TB, TK), lambda b, k: (b, k)),                   # x
            pl.BlockSpec((TK, FEAT_PAD), lambda b, k: (k, 0)),             # enc weight
            pl.BlockSpec((1, FEAT_PAD), lambda b, k: (0, 0)),              # enc bias
            pl.BlockSpec((2 * FEAT_PAD, HEAD_PAD), lambda b, k: (0, 0)),   # fused head W
            pl.BlockSpec((1, HEAD_PAD), lambda b, k: (0, 0)),              # fused head b
        ],
        out_specs=pl.BlockSpec((TB, HEAD_PAD), lambda b, k: (b, 0)),
        scratch_shapes=[pltpu.VMEM((TB, FEAT_PAD), jnp.float32)],
        compiler_params=pltpu.CompilerParams(
            dimension_semantics=("parallel", "arbitrary")),
        cost_estimate=pl.CostEstimate(flops=flops, transcendentals=0,
                                      bytes_accessed=bytes_accessed),
    )(x_pad, we_bf, be, wh_bf, bh)

    age = out[:B, _AGE[0]:_AGE[1]]
    gender = out[:B, _GENDER[0]:_GENDER[1]]
    emotions = out[:B, _EMO[0]:_EMO[1]]
    return [age, gender, emotions]


def _reference(x_nchw, params):
    """Pure-JAX reference mirroring the kernel's bf16 quantization points."""
    (we, be, w1, b1, w2, b2, w3, b3) = params
    q = lambda a: a.astype(jnp.bfloat16).astype(jnp.float32)
    x = q(x_nchw.reshape(x_nchw.shape[0], -1).astype(jnp.float32))
    feat = x @ q(we) + be
    gender = q(feat) @ q(w1) + b1
    age = q(jnp.maximum(feat, 0.0)) @ q(w2) + b2
    emotions = q(feat) @ q(w3) + b3
    return [age, gender, emotions]


if __name__ == "__main__":
    key = jax.random.PRNGKey(0)
    k_x, k_p = jax.random.split(key)

    B, C, H, W = 2, 4, 16, 16                       # NCHW, small synthetic shape
    x = jax.random.normal(k_x, (B, C, H, W), jnp.float32)

    params = init_params(k_p, in_dim=C * H * W, feat_dim=FEAT_DIM)
    packed = pack_params(params)

    outs = multitask_forward(x, packed)
    outs = [jax.block_until_ready(o) for o in outs]

    refs = _reference(x, params)
    for o, r in zip(outs, refs):
        assert o.shape == r.shape
        assert jnp.max(jnp.abs(o - r)) < 2e-2, float(jnp.max(jnp.abs(o - r)))

    assert outs[0].shape == (B, 90)   # age
    assert outs[1].shape == (B, 2)    # gender
    assert outs[2].shape == (B, 7)    # emotions

    print("KERNEL_OK")
</pallas_src>

<mosaic_0001>
module attributes {stable_mosaic.version = 11 : i64} {
  func.func @_mtl_kernel(%arg0: i32, %arg1: i32, %arg2: memref<8x512xbf16, #tpu.memory_space<vmem>>, %arg3: memref<512x1536xbf16, #tpu.memory_space<vmem>>, %arg4: memref<1x1536xf32, #tpu.memory_space<vmem>>, %arg5: memref<3072x128xbf16, #tpu.memory_space<vmem>>, %arg6: memref<1x128xf32, #tpu.memory_space<vmem>>, %arg7: memref<8x128xf32, #tpu.memory_space<vmem>>, %arg8: memref<8x1536xf32, #tpu.memory_space<vmem>>) attributes {dimension_semantics = [#tpu.dimension_semantics<parallel>, #tpu.dimension_semantics<arbitrary>], iteration_bounds = array<i64: 1, 2>, scalar_prefetch = 0 : i64, scratch_operands = 1 : i64, tpu.core_type = #tpu.core_type<tc>, window_params = [{transform_indices = @transform_0, window_bounds = array<i64: 8, 512>}, {transform_indices = @transform_1, window_bounds = array<i64: 512, 1536>}, {pipeline_mode = #tpu.pipeline_mode<synchronous>, transform_indices = @transform_2, window_bounds = array<i64: 1, 1536>}, {pipeline_mode = #tpu.pipeline_mode<synchronous>, transform_indices = @transform_3, window_bounds = array<i64: 3072, 128>}, {pipeline_mode = #tpu.pipeline_mode<synchronous>, transform_indices = @transform_4, window_bounds = array<i64: 1, 128>}, {transform_indices = @transform_5, window_bounds = array<i64: 8, 128>}]} {
    %c0_i32 = arith.constant 0 : i32
    %0 = arith.cmpi eq, %arg1, %c0_i32 : i32
    %1 = arith.extui %0 : i1 to i32
    %c0_i32_0 = arith.constant 0 : i32
    %2 = arith.cmpi ne, %1, %c0_i32_0 : i32
    scf.if %2 {
      %cst_9 = arith.constant 0.000000e+00 : f32
      %12 = vector.broadcast %cst_9 : f32 to vector<8x1536xf32>
      %c0_10 = arith.constant 0 : index
      %c0_11 = arith.constant 0 : index
      %13 = vector.load %arg8[%c0_10, %c0_11] : memref<8x1536xf32, #tpu.memory_space<vmem>>, vector<8x1536xf32>
      tpu.vector_store %arg8[%c0_10, %c0_11], %12 {strides = array<i32>} : memref<8x1536xf32, #tpu.memory_space<vmem>>, vector<8x1536xf32>,
    } else {
    }
    %c0 = arith.constant 0 : index
    %c0_1 = arith.constant 0 : index
    %3 = vector.load %arg8[%c0, %c0_1] : memref<8x1536xf32, #tpu.memory_space<vmem>>, vector<8x1536xf32>
    %c0_2 = arith.constant 0 : index
    %c0_3 = arith.constant 0 : index
    %4 = vector.load %arg2[%c0_2, %c0_3] : memref<8x512xbf16, #tpu.memory_space<vmem>>, vector<8x512xbf16>
    %c0_4 = arith.constant 0 : index
    %c0_5 = arith.constant 0 : index
    %5 = vector.load %arg3[%c0_4, %c0_5] : memref<512x1536xbf16, #tpu.memory_space<vmem>>, vector<512x1536xbf16>
    %cst = arith.constant dense<0.000000e+00> : vector<8x1536xf32>
    %6 = tpu.matmul %4, %5, %cst {dimension_numbers = #tpu.dot_dimension_numbers<[1], [0], [0], [1], [0, 0, 1, 1], [], []>} : vector<8x512xbf16>, vector<512x1536xbf16>, vector<8x1536xf32> -> vector<8x1536xf32>
    %7 = arith.addf %3, %6 : vector<8x1536xf32>
    %c0_6 = arith.constant 0 : index
    %c0_7 = arith.constant 0 : index
    %8 = vector.load %arg8[%c0_6, %c0_7] : memref<8x1536xf32, #tpu.memory_space<vmem>>, vector<8x1536xf32>
    tpu.vector_store %arg8[%c0_6, %c0_7], %7 {strides = array<i32>} : memref<8x1536xf32, #tpu.memory_space<vmem>>, vector<8x1536xf32>,
    %c1_i32 = arith.constant 1 : i32
    %9 = arith.cmpi eq, %arg1, %c1_i32 : i32
    %10 = arith.extui %9 : i1 to i32
    %c0_i32_8 = arith.constant 0 : i32
    %11 = arith.cmpi ne, %10, %c0_i32_8 : i32
    scf.if %11 {
      %c0_9 = arith.constant 0 : index
      %c0_10 = arith.constant 0 : index
      %12 = vector.load %arg8[%c0_9, %c0_10] : memref<8x1536xf32, #tpu.memory_space<vmem>>, vector<8x1536xf32>
      %c0_11 = arith.constant 0 : index
      %c0_12 = arith.constant 0 : index
      %13 = vector.load %arg4[%c0_11, %c0_12] : memref<1x1536xf32, #tpu.memory_space<vmem>>, vector<1x1536xf32>
      %14 = vector.broadcast %13 : vector<1x1536xf32> to vector<8x1536xf32>
      %15 = arith.addf %12, %14 : vector<8x1536xf32>
      %16 = arith.truncf %15 : vector<8x1536xf32> to vector<8x1536xbf16>
      %cst_13 = arith.constant 0.000000e+00 : f32
      %17 = vector.broadcast %cst_13 : f32 to vector<8x1536xf32>
      %18 = arith.maximumf %15, %17 : vector<8x1536xf32>
      %19 = arith.truncf %18 : vector<8x1536xf32> to vector<8x1536xbf16>
      %20 = tpu.concatenate %16, %19 in 1 : vector<8x1536xbf16>, vector<8x1536xbf16> -> vector<8x3072xbf16>
      %c0_14 = arith.constant 0 : index
      %c0_15 = arith.constant 0 : index
      %21 = vector.load %arg5[%c0_14, %c0_15] : memref<3072x128xbf16, #tpu.memory_space<vmem>>, vector<3072x128xbf16>
      %cst_16 = arith.constant dense<0.000000e+00> : vector<8x128xf32>
      %22 = tpu.matmul %20, %21, %cst_16 {dimension_numbers = #tpu.dot_dimension_numbers<[1], [0], [0], [1], [0, 0, 1, 1], [], []>} : vector<8x3072xbf16>, vector<3072x128xbf16>, vector<8x128xf32> -> vector<8x128xf32>
      %c0_17 = arith.constant 0 : index
      %c0_18 = arith.constant 0 : index
      %23 = vector.load %arg6[%c0_17, %c0_18] : memref<1x128xf32, #tpu.memory_space<vmem>>, vector<1x128xf32>
      %24 = vector.broadcast %23 : vector<1x128xf32> to vector<8x128xf32>
      %25 = arith.addf %22, %24 : vector<8x128xf32>
      %c0_19 = arith.constant 0 : index
      %c0_20 = arith.constant 0 : index
      %26 = vector.load %arg7[%c0_19, %c0_20] : memref<8x128xf32, #tpu.memory_space<vmem>>, vector<8x128xf32>
      tpu.vector_store %arg7[%c0_19, %c0_20], %25 {strides = array<i32>} : memref<8x128xf32, #tpu.memory_space<vmem>>, vector<8x128xf32>,
    } else {
    }
    return
  }
  func.func @transform_0(%arg0: i32, %arg1: i32) -> (i32, i32) {
    %c0_i32 = arith.constant 0 : i32
    return %arg0, %arg1 : i32, i32
  }
  func.func @transform_1(%arg0: i32, %arg1: i32) -> (i32, i32) {
    %c0_i32 = arith.constant 0 : i32
    %c0_i32_0 = arith.constant 0 : i32
    return %arg1, %c0_i32 : i32, i32
  }
  func.func @transform_2(%arg0: i32, %arg1: i32) -> (i32, i32) {
    %c0_i32 = arith.constant 0 : i32
    %c0_i32_0 = arith.constant 0 : i32
    %c0_i32_1 = arith.constant 0 : i32
    return %c0_i32, %c0_i32_0 : i32, i32
  }
  func.func @transform_3(%arg0: i32, %arg1: i32) -> (i32, i32) {
    %c0_i32 = arith.constant 0 : i32
    %c0_i32_0 = arith.constant 0 : i32
    %c0_i32_1 = arith.constant 0 : i32
    return %c0_i32, %c0_i32_0 : i32, i32
  }
  func.func @transform_4(%arg0: i32, %arg1: i32) -> (i32, i32) {
    %c0_i32 = arith.constant 0 : i32
    %c0_i32_0 = arith.constant 0 : i32
    %c0_i32_1 = arith.constant 0 : i32
    return %c0_i32, %c0_i32_0 : i32, i32
  }
  func.func @transform_5(%arg0: i32, %arg1: i32) -> (i32, i32) {
    %c0_i32 = arith.constant 0 : i32
    %c0_i32_0 = arith.constant 0 : i32
    return %arg0, %c0_i32 : i32, i32
  }
}

</mosaic_0001>

<bundles_post_ra>
// kernel: tpu_custom_call.1
= control target key start
LH: loop header
LB: loop body
LE: loop exit
PB: predicated region body
PF: predicated region fallthrough
CT: control target
= control target key end

     0   :  { %10 = vsyncpa [#allocation4], 0  ;;  %s8302_s0 = inlined_call_operand.hbm [shape: bf16[8,1024], index: 0, kind: input, shape index: {}]   ;;  %s8303_s1 = inlined_call_operand.hbm [shape: bf16[1024,1536], index: 1, kind: input, shape index: {}]   ;;  %s8304_s2 = inlined_call_operand.hbm [shape: f32[1,1536], index: 2, kind: input, shape index: {}]   ;;  %s8305_s3 = inlined_call_operand.hbm [shape: bf16[3072,128], index: 3, kind: input, shape index: {}]   ;;  %s8306_s4 = inlined_call_operand.hbm [shape: f32[1,128], index: 4, kind: input, shape index: {}]   ;;  %s8307_s5 = inlined_call_operand.hbm [shape: f32[8,128], index: 5, kind: output, shape index: {}]  }
   0x1   :  { %12 = vsyncpa [#allocation4 + $0x1], 0 }
   0x2   :  { %13 = vsyncpa [#allocation7], 0 }
   0x3   :  { %15 = vsyncpa [#allocation7 + $0x1], 0 }
   0x4   :  { %16 = vsyncpa [#allocation10], 0 }
   0x5   :  { %17 = vsyncpa [#allocation5], 0  ;;  %s7499_s18 = smov 0   ;;  %s7501_s19 = smov 0  }
   0x6   :  { %s7503_s20 = smov 0   ;;  %s7505_s21 = smov 0  }
   0x7   :  { %s7507_s22 = smov 0   ;;  %s7509_s23 = smov 0  }
   0x8 LB: > { %s7528_s24 = sadd.s32 4294967295, %s7456_s23   ;;  %p57_p0 = scmp.ne.s32.totalorder %s7440_s19, %s7436_s18  ;;  %s7456_s23 = sphi %s7509_s23, %s23_s23   ;;  %s7452_s22 = sphi %s7507_s22, %s8326_s22   ;;  %s7448_s21 = sphi %s7505_s21, %s8325_s21   ;;  %s7444_s20 = sphi %s7503_s20, %s8324_s20   ;;  %s7440_s19 = sphi %s7501_s19, %s8323_s19   ;;  %s7436_s18 = sphi %s7499_s18, %s8322_s18  }
   0x9   : > { %p8308_p1 = scmp.eq.s32.totalorder %s7528_s24, 0  ;;  %p5474_p2 = scmp.ge.s32.totalorder %s7456_s23, 1 }
   0xa   : > { %p183_p3 = scmp.lt.s32.totalorder %s7456_s23, 3  ;;  %s7458_s27 = smov [#allocation8]  }
   0xb   : > { %p7536_p4 = por %p8308_p1, %p57_p0  ;;  %s196_s28 = sshll.u32 %s7458_s27, 4  ;;  %s197_s28 = int_to_ptr.vmem [resolvable:$true] %s196_s28 }
   0xc   : > { %p7540_p5 = pnand %p5474_p2, %p183_p3  ;;  %s7459_s29 = smov [#allocation9]  }
   0xd   : > { %s8311_s25 = scalar_select %p7536_p4, 1, 0 }
   0xe   : > { %s8312_s26 = scalar_select %p7540_p5, 1, 0 }
   0xf   : > { %p6365_p6 = pneg %p7540_p5  ;;  %s206_s30 = sshll.u32 %s7459_s29, 4  ;;  %s7552_s30 = int_to_ptr.vmem [resolvable:$true] %s206_s30 }
  0x10   : > { %s7460_s7 = smov [#allocation11]   ;;  %s7220_s11 = scalar_lea.hbm %s8304_s2, 192 }
  0x11   : > { %p7548_p7 = pnand %p6365_p6, %p8308_p1  ;;  %s7554_s8 = sshll.u32 %s7460_s7, 4  ;;  %s221_s8 = int_to_ptr.vmem [resolvable:$true] %s7554_s8 }
  0x12   : > { %p7221_p8 = scmp.ne.s32.totalorder %s8304_s2, %s7220_s11  ;;  %p7227_p12 = scmp.lt.u32.totalorder %s7220_s11, %s8304_s2 }
  0x13   : > { %p7564_p9 = pneg %p7548_p7 }
  0x15   : > { %p7223_p10 = pnand %p7564_p9, %p7221_p8 }
  0x17   : > { %p7224_p11 = pneg %p7223_p10 }
  0x19   : > { %p7229_p13 = pnand %p7227_p12, %p7224_p11 }
  0x1b   : > { %7232 = shalt.err (!%p7229_p13)
}
  0x1c   : > { %s7233_s17 = scalar_lea.vmem %s197_s28, 192  ;;  %p7241_p6 = scmp.lt.s32.totalorder %s197_s28, %s197_s28 }
  0x1d   : > { %p7234_p0 = scmp.ne.s32.totalorder %s197_s28, %s7233_s17  ;;  %p7242_p1 = scmp.lt.s32.totalorder %s7233_s17, %s7233_s17 }
  0x1f   : > { %p7236_p2 = pnand %p7234_p0, %p7564_p9  ;;  %p7243_p4 = por %p7242_p1, %p7241_p6 }
  0x21   : > { %p7237_p3 = pneg %p7236_p2 }
  0x23   : > { %p7244_p5 = pnand %p7243_p4, %p7237_p3 }
  0x25   : > { %7247 = shalt.err (!%p7244_p5)
}
  0x26   : > { %6368 = dma.hbm_to_vmem [thread:$0]  (!%p7548_p7), %s8304_s2, 192, %s197_s28, [#allocation7]  }
  0x27   : > { %s7248_s9 = scalar_lea.hbm %s8305_s3, 24576 }
  0x28   : > { %p7249_p8 = scmp.ne.s32.totalorder %s8305_s3, %s7248_s9  ;;  %p7255_p4 = scmp.lt.u32.totalorder %s7248_s9, %s8305_s3 }
  0x2a   : > { %p7251_p10 = pnand %p7249_p8, %p7564_p9 }
  0x2c   : > { %p7252_p1 = pneg %p7251_p10 }
  0x2e   : > { %p7257_p5 = pnand %p7255_p4, %p7252_p1 }
  0x30   : > { %7260 = shalt.err (!%p7257_p5)
}
  0x31   : > { %s7261_s28 = scalar_lea.vmem %s7552_s30, 24576  ;;  %p7269_p0 = scmp.lt.s32.totalorder %s7552_s30, %s7552_s30 }
  0x32   : > { %p7262_p11 = scmp.ne.s32.totalorder %s7552_s30, %s7261_s28  ;;  %p7270_p2 = scmp.lt.s32.totalorder %s7261_s28, %s7261_s28 }
  0x34   : > { %p7264_p12 = pnand %p7262_p11, %p7564_p9  ;;  %p7271_p3 = por %p7270_p2, %p7269_p0 }
  0x36   : > { %p7265_p13 = pneg %p7264_p12 }
  0x38   : > { %p7272_p6 = pnand %p7271_p3, %p7265_p13 }
  0x3a   : > { %7275 = shalt.err (!%p7272_p6)
}
  0x3b   : > { %s7461_s15 = smov 64   ;;  %s7462_s16 = smov 4  }
  0x3c   : > { %6371 = dma.hbm_to_vmem [thread:$0]  (!%p7548_p7), %s8305_s3, 24576, %s7552_s30, [#allocation10], %s7461_s15, %s7461_s15, %s7462_s16  }
  0x3d   : > { %s7276_s7 = scalar_lea.hbm %s8306_s4, 16 }
  0x3e   : > { %p7277_p8 = scmp.ne.s32.totalorder %s8306_s4, %s7276_s7  ;;  %p7283_p4 = scmp.lt.u32.totalorder %s7276_s7, %s8306_s4 }
  0x40   : > { %p7279_p10 = pnand %p7277_p8, %p7564_p9 }
  0x42   : > { %p7280_p1 = pneg %p7279_p10 }
  0x44   : > { %p7285_p5 = pnand %p7283_p4, %p7280_p1 }
  0x46   : > { %7288 = shalt.err (!%p7285_p5)
}
  0x47   : > { %s7289_s13 = scalar_lea.vmem %s221_s8, 16  ;;  %s7296_s30 = scalar_lea.vmem %s221_s8, 32 }
  0x48   : > { %p7290_p11 = scmp.ne.s32.totalorder %s221_s8, %s7289_s13  ;;  %p7297_p0 = scmp.lt.s32.totalorder %s221_s8, %s221_s8 }
  0x49   : > { %p7298_p2 = scmp.lt.s32.totalorder %s7296_s30, %s7289_s13 }
  0x4a   : > { %p7292_p12 = pnand %p7290_p11, %p7564_p9 }
  0x4b   : > { %p7299_p3 = por %p7298_p2, %p7297_p0 }
  0x4c   : > { %p7293_p13 = pneg %p7292_p12 }
  0x4e   : > { %p7300_p6 = pnand %p7299_p3, %p7293_p13 }
  0x50   : > { %7303 = shalt.err (!%p7300_p6)
}
  0x51   : > { %6374 = dma.hbm_to_vmem [thread:$0]  (!%p7548_p7), %s8306_s4, 16, %s221_s8, [#allocation10]  }
  0x52   : > { %s44_s14 = sadd.s32 1, %s7444_s20  ;;  %s32_s16 = sadd.s32 1, %s7452_s22 }
  0x53   : > { %p51_p9 = scmp.ne.s32.totalorder %s7444_s20, %s7440_s19  ;;  %p33_p8 = scmp.ge.s32.totalorder %s32_s16, 2 }
  0x54   : > { %p52_p10 = scmp.eq.s32.totalorder %s7456_s23, 0  ;;  %p6385_p1 = scmp.lt.s32.totalorder %s7456_s23, 2 }
  0x55   : > { %s7629_s6 = sand.u32 1, %s7444_s20   ;;  %s8328_s16 = smov (%p33_p8, %s32_s16), 0 }
  0x56   : > { %p53_p4 = por %p52_p10, %p51_p9  ;;  %s40_s8 = ssub.s32 %s7452_s22, %s8328_s16 }
  0x57   : > { %s5479_s17 = sshll.u32 %s7629_s6, 4  ;;  %p42_p7 = scmp.eq.s32.totalorder %s40_s8, 0 }
  0x58   : > { %s6077_s18 = sshll.u32 %s7452_s22, 8  ;;  %s235_s27 = scalar_lea.vmem [#allocation3], %s5479_s17 }
  0x59   : > { %s245_s29 = sshll.u32 %s235_s27, 4  ;;  %s7643_s11 = scalar_lea.hbm %s8302_s0, %s6077_s18  ;;  %s7645_s29 = int_to_ptr.vmem [resolvable:$true] %s245_s29 }
  0x5a   : > { %s7638_s7 = scalar_select %p42_p7, %s7444_s20, %s44_s14  }
  0x5b   : > { %p7649_p5 = pnand %p6385_p1, %p53_p4  ;;  %s6342_s13 = smul.u32 3072, %s7629_s6 }
  0x5c   : > { %s6343_s30 = smul.u32 49152, %s7452_s22  ;;  %s252_s28 = sand.u32 1, %s7456_s23  }
  0x5d   : > { %s232_s15 = scalar_lea.sflag [#allocation4], %s7629_s6  ;;  %s7304_s14 = scalar_lea.hbm %s7643_s11, 256 }
  0x5e   : > { %p7305_p11 = scmp.ne.s32.totalorder %s7643_s11, %s7304_s14  ;;  %p7306_p12 = pneg %p7649_p5 }
  0x5f   : > { %s7309_s18 = scalar_lea.hbm %s8302_s0, 512  ;;  %p7310_p2 = scmp.lt.u32.totalorder %s7643_s11, %s8302_s0 }
  0x60   : > { %p7307_p13 = pnand %p7306_p12, %p7305_p11  ;;  %p7311_p3 = scmp.lt.u32.totalorder %s7309_s18, %s7304_s14 }
  0x61   : > { %p7313_p9 = scmp.lt.u32.totalorder %s7304_s14, %s7643_s11 }
  0x62   : > { %p7308_p0 = pneg %p7307_p13  ;;  %p7312_p6 = por %p7311_p3, %p7310_p2 }
  0x64   : > { %p7314_p8 = por %p7313_p9, %p7312_p6 }
  0x66   : > { %p7315_p10 = pnand %p7314_p8, %p7308_p0 }
  0x68   : > { %7318 = shalt.err (!%p7315_p10)
}
  0x69   : > { %s7319_s10 = scalar_lea.vmem %s7645_s29, 256  ;;  %s7463_s8 = smov [#allocation3]  }
  0x6a   : > { %p7320_p1 = scmp.ne.s32.totalorder %s7645_s29, %s7319_s10  ;;  %s7324_s17 = sshll.u32 %s7463_s8, 4  ;;  %s7325_s17 = int_to_ptr.vmem [resolvable:$false] %s7324_s17 }
  0x6b   : > { %s7326_s27 = scalar_lea.vmem %s7325_s17, 512  ;;  %p7327_p11 = scmp.lt.s32.totalorder %s7645_s29, %s7325_s17 }
  0x6c   : > { %p7322_p4 = pnand %p7320_p1, %p7306_p12  ;;  %p7328_p13 = scmp.lt.s32.totalorder %s7326_s27, %s7319_s10 }
  0x6e   : > { %p7323_p7 = pneg %p7322_p4  ;;  %p7329_p2 = por %p7328_p13, %p7327_p11 }
  0x70   : > { %p7330_p3 = pnand %p7329_p2, %p7323_p7 }
  0x72   : > { %7333 = shalt.err (!%p7330_p3)
}
  0x73   : > { %6378 = dma.hbm_to_vmem [thread:$0]  (!%p7649_p5), %s7643_s11, 256, %s7645_s29, %s232_s15  }
  0x74   : > { %s256_s14 = scalar_lea.vmem [#allocation6], %s6342_s13  ;;  %s7691_s8 = scalar_lea.hbm %s8303_s1, %s6343_s30 }
  0x75   : > { %s264_s18 = sshll.u32 %s256_s14, 4  ;;  %s7695_s17 = scalar_lea.sflag [#allocation7], %s252_s28  ;;  %s7684_s18 = int_to_ptr.vmem [resolvable:$true] %s264_s18 }
  0x76   : > { %s7334_s27 = scalar_lea.hbm %s7691_s8, 49152  ;;  %s7339_s11 = scalar_lea.hbm %s8303_s1, 98304 }
  0x77   : > { %p7335_p0 = scmp.ne.s32.totalorder %s7691_s8, %s7334_s27  ;;  %p7340_p8 = scmp.lt.u32.totalorder %s7691_s8, %s8303_s1 }
  0x78   : > { %p7341_p10 = scmp.lt.u32.totalorder %s7339_s11, %s7334_s27  ;;  %p7343_p4 = scmp.lt.u32.totalorder %s7334_s27, %s7691_s8 }
  0x79   : > { %p7337_p6 = pnand %p7335_p0, %p7306_p12 }
  0x7a   : > { %p7342_p1 = por %p7341_p10, %p7340_p8 }
  0x7b   : > { %p7338_p9 = pneg %p7337_p6 }
  0x7c   : > { %p7344_p7 = por %p7343_p4, %p7342_p1 }
  0x7e   : > { %p7345_p11 = pnand %p7344_p7, %p7338_p9 }
  0x80   : > { %7348 = shalt.err (!%p7345_p11)
}
  0x81   : > { %s7349_s28 = scalar_lea.vmem %s7684_s18, 49152  ;;  %s7464_s15 = smov [#allocation6]  }
  0x82   : > { %p7350_p13 = scmp.ne.s32.totalorder %s7684_s18, %s7349_s28  ;;  %s7354_s14 = sshll.u32 %s7464_s15, 4  ;;  %s7355_s14 = int_to_ptr.vmem [resolvable:$false] %s7354_s14 }
  0x83   : > { %s7356_s9 = scalar_lea.vmem %s7355_s14, 98304  ;;  %p7357_p0 = scmp.lt.s32.totalorder %s7684_s18, %s7355_s14 }
  0x84   : > { %p7352_p2 = pnand %p7350_p13, %p7306_p12  ;;  %p7358_p6 = scmp.lt.s32.totalorder %s7356_s9, %s7349_s28 }
  0x86   : > { %p7353_p3 = pneg %p7352_p2  ;;  %p7359_p8 = por %p7358_p6, %p7357_p0 }
  0x88   : > { %p7360_p10 = pnand %p7359_p8, %p7353_p3 }
  0x8a   : > { %7363 = shalt.err (!%p7360_p10)
}
  0x8b   : > { %s7465_s10 = smov 768   ;;  %s7466_s27 = smov 48  }
  0x8c   : > { %6381 = dma.hbm_to_vmem [thread:$0]  (!%p7649_p5), %s7691_s8, 49152, %s7684_s18, %s7695_s17, %s7465_s10, %s7465_s10, %s7466_s27  }
  0x8d   : > { %p8316_p12 = scmp.ne.s32.totalorder %s8312_s26, 0 }
  0x8e   : > { %s278_s6 = sand.u32 (!%p8316_p12), 1, %s7440_s19   ;;  %p8317_p9 = scmp.ne.s32.totalorder (!%p8316_p12), %s8311_s25, 0 }
  0x8f   : > { %276 = sbr.rel (%p8316_p12) target bundleno = 1178 (0x49a), region = 40  ;;  %s5486_s29 = sshll.u32 (!%p8316_p12), %s278_s6, 4 }
  0x90   : > { %s279_s11 = scalar_lea.sflag (!%p8316_p12), [#allocation4], %s278_s6  ;;  %s7724_s13 = scalar_lea.vmem (!%p8316_p12), [#allocation3], %s5486_s29 }
  0x96   : > { %7415 = dma.done.wait (%p8317_p9), %s279_s11, 256  }
  0x97   : > { %7417 = vsyncadd (%p8317_p9), %s279_s11, 4294967040  ;;  %s287_s30 = sand.u32 1, %s7528_s24   ;;  %s6344_s12 = smul.u32 3072, %s278_s6 }
  0x98   : > { %s288_s18 = scalar_lea.sflag [#allocation7], %s287_s30 }
  0x99   : > { %s7731_s8 = scalar_lea.vmem [#allocation6], %s6344_s12 }
  0x9a   : > { %7419 = dma.done.wait (%p8317_p9), %s288_s18, 49152  }
  0x9b   : > { %7421 = vsyncadd (%p8317_p9), %s288_s18, 4294918144  ;;  %p8318_p5 = scmp.eq.s32.totalorder %s7528_s24, 0 }
  0x9d   : > { %7423 = dma.done.wait (%p8318_p5), [#allocation7], 192   ;;  %p8319_p1 = pmov %p8318_p5 }
  0x9f   : > { %7425 = vsyncadd (%p8319_p1), [#allocation7], 4294967104  ;;  %p8320_p4 = pmov %p8319_p1 }
  0xa0   : > { %p8321_p7 = pmov %p8319_p1 }
  0xa1   : > { %7427 = dma.done.wait (%p8320_p4), [#allocation10], 24592  }
  0xa2   : > { %7429 = vsyncadd (%p8321_p7), [#allocation10], 4294942704  ;;  %p5490_p11 = scmp.ne.s32.totalorder %s7448_s21, 0 }
  0xa3   : > { %v7467_v0 = vmov (!%p5490_p11), 0.0  }
  0xa4   : > { %336 = sbr.rel (%p5490_p11) target bundleno = 171 (0xab), region = 64  ;;  %337 = vst [vmem:[#allocation2] sm:$0xff] (!%p5490_p11), %v7467_v0  ;;  %338 = vst [vmem:[#allocation2 + $0x8] sm:$0xff] (!%p5490_p11), %v7467_v0 }
  0xa5   : > { %339 = vst [vmem:[#allocation2 + $0x10] sm:$0xff] (!%p5490_p11), %v7467_v0  ;;  %340 = vst [vmem:[#allocation2 + $0x18] sm:$0xff] (!%p5490_p11), %v7467_v0 }
  0xa6   : > { %341 = vst [vmem:[#allocation2 + $0x20] sm:$0xff] (!%p5490_p11), %v7467_v0  ;;  %342 = vst [vmem:[#allocation2 + $0x28] sm:$0xff] (!%p5490_p11), %v7467_v0 }
  0xa7   : > { %343 = vst [vmem:[#allocation2 + $0x30] sm:$0xff] (!%p5490_p11), %v7467_v0  ;;  %344 = vst [vmem:[#allocation2 + $0x38] sm:$0xff] (!%p5490_p11), %v7467_v0 }
  0xa8   : > { %345 = vst [vmem:[#allocation2 + $0x40] sm:$0xff] (!%p5490_p11), %v7467_v0  ;;  %346 = vst [vmem:[#allocation2 + $0x48] sm:$0xff] (!%p5490_p11), %v7467_v0 }
  0xa9   : > { %347 = vst [vmem:[#allocation2 + $0x50] sm:$0xff] (!%p5490_p11), %v7467_v0  ;;  %348 = vst [vmem:[#allocation2 + $0x58] sm:$0xff] (!%p5490_p11), %v7467_v0 }
  0xab PF: > { %v6448_v1 = vld [vmem:[%s7731_s8 + $0x4] ss:$48 sps:$4 sm:$0xff]   ;;  %v6452_v3 = vld [vmem:[%s7731_s8] ss:$48 sps:$4 sm:$0xff]   ;;  %v362_v49 = vld [vmem:[%s7724_s13 + $0x8] sm:$0xff]  ;;  %p5879_p13 = scmp.ne.s32.totalorder %s7448_s21, 1 }
  0xac   : > { %v6450_v2 = vld [vmem:[%s7731_s8 + $0x604] ss:$48 sps:$4 sm:$0xff]   ;;  %2681 = vmatprep.subr.bf16.mxu0 %v6448_v1  ;;  %v6453_v4 = vld [vmem:[%s7731_s8 + $0x600] ss:$48 sps:$4 sm:$0xff]   ;;  %v7798_v52 = vcombine.high %v362_v49, %v362_v49 }
  0xad   : > { %2722 = vmatprep.subr.bf16.mxu1 %v6450_v2  ;;  %v6454_v5 = vld [vmem:[%s7731_s8 + $0x64] ss:$48 sps:$4 sm:$0xff]   ;;  %2682 = vmatpush1.bf16.msra.mxu0 %v6452_v3  ;;  %v6458_v7 = vld [vmem:[%s7731_s8 + $0x60] ss:$48 sps:$4 sm:$0xff]  }
  0xae   : > { %2723 = vmatpush1.bf16.msra.mxu1 %v6453_v4  ;;  %v6456_v6 = vld [vmem:[%s7731_s8 + $0x664] ss:$48 sps:$4 sm:$0xff]   ;;  %2683 = vmatprep.subr.bf16.mxu0 %v6454_v5  ;;  %v6459_v8 = vld [vmem:[%s7731_s8 + $0x660] ss:$48 sps:$4 sm:$0xff]   ;;  %v6550_v5 = vld [vmem:[%s7731_s8 + $0xc] ss:$48 sps:$4 sm:$0xff]  }
  0xaf   : > { %2724 = vmatprep.subr.bf16.mxu1 %v6456_v6  ;;  %v6460_v9 = vld [vmem:[%s7731_s8 + $0xc4] ss:$48 sps:$4 sm:$0xff]   ;;  %v6464_v11 = vld [vmem:[%s7731_s8 + $0xc0] ss:$48 sps:$4 sm:$0xff]   ;;  %2754 = vmatprep.mubr.bf16.mxu1 %v7798_v52  ;;  %v6553_v6 = vld [vmem:[%s7731_s8 + $0x60c] ss:$48 sps:$4 sm:$0xff]  }
  0xb0   : > { %v6462_v10 = vld [vmem:[%s7731_s8 + $0x6c4] ss:$48 sps:$4 sm:$0xff]   ;;  %v6465_v12 = vld [vmem:[%s7731_s8 + $0x6c0] ss:$48 sps:$4 sm:$0xff]  }
  0xb1   : > { %2684 = vmatpush1.bf16.msra.mxu0 %v6458_v7  ;;  %v6466_v13 = vld [vmem:[%s7731_s8 + $0x124] ss:$48 sps:$4 sm:$0xff]   ;;  %v6470_v15 = vld [vmem:[%s7731_s8 + $0x120] ss:$48 sps:$4 sm:$0xff]  }
  0xb2   : > { %2725 = vmatpush1.bf16.msra.mxu1 %v6459_v8  ;;  %2685 = vmatprep.subr.bf16.mxu0 %v6460_v9  ;;  %v6468_v14 = vld [vmem:[%s7731_s8 + $0x724] ss:$48 sps:$4 sm:$0xff]   ;;  %v6471_v16 = vld [vmem:[%s7731_s8 + $0x720] ss:$48 sps:$4 sm:$0xff]   ;;  %v7822_v8 = vcombine.low %v362_v49, %v362_v49  ;;  %v6548_v9 = vld [vmem:[%s7731_s8 + $0x8] ss:$48 sps:$4 sm:$0xff]  }
  0xb3   : > { %2726 = vmatprep.subr.bf16.mxu1 %v6462_v10  ;;  %v6472_v17 = vld [vmem:[%s7731_s8 + $0x184] ss:$48 sps:$4 sm:$0xff]   ;;  %v6476_v19 = vld [vmem:[%s7731_s8 + $0x180] ss:$48 sps:$4 sm:$0xff]   ;;  %v6551_v10 = vld [vmem:[%s7731_s8 + $0x608] ss:$48 sps:$4 sm:$0xff]  }
  0xb4   : > { %v6474_v18 = vld [vmem:[%s7731_s8 + $0x784] ss:$48 sps:$4 sm:$0xff]   ;;  %v6477_v20 = vld [vmem:[%s7731_s8 + $0x780] ss:$48 sps:$4 sm:$0xff]   ;;  %v6613_v49 = vld [vmem:[%s7731_s8 + $0x9cc] ss:$48 sps:$4 sm:$0xff]  }
  0xb5   : > { %2686 = vmatpush1.bf16.msra.mxu0 %v6464_v11  ;;  %v6478_v21 = vld [vmem:[%s7731_s8 + $0x1e4] ss:$48 sps:$4 sm:$0xff]   ;;  %v6482_v23 = vld [vmem:[%s7731_s8 + $0x1e0] ss:$48 sps:$4 sm:$0xff]   ;;  %v6556_v11 = vld [vmem:[%s7731_s8 + $0x6c] ss:$48 sps:$4 sm:$0xff]  }
  0xb6   : > { %2727 = vmatpush1.bf16.msra.mxu1 %v6465_v12  ;;  %2687 = vmatprep.subr.bf16.mxu0 %v6466_v13  ;;  %v6480_v22 = vld [vmem:[%s7731_s8 + $0x7e4] ss:$48 sps:$4 sm:$0xff]   ;;  %v6483_v24 = vld [vmem:[%s7731_s8 + $0x7e0] ss:$48 sps:$4 sm:$0xff]   ;;  %v6559_v12 = vld [vmem:[%s7731_s8 + $0x66c] ss:$48 sps:$4 sm:$0xff]  }
  0xb7   : > { %2728 = vmatprep.subr.bf16.mxu1 %v6468_v14  ;;  %v6484_v25 = vld [vmem:[%s7731_s8 + $0x244] ss:$48 sps:$4 sm:$0xff]   ;;  %v6488_v27 = vld [vmem:[%s7731_s8 + $0x240] ss:$48 sps:$4 sm:$0xff]   ;;  %v6554_v13 = vld [vmem:[%s7731_s8 + $0x68] ss:$48 sps:$4 sm:$0xff]  }
  0xb8   : > { %v6486_v26 = vld [vmem:[%s7731_s8 + $0x844] ss:$48 sps:$4 sm:$0xff]   ;;  %v6489_v28 = vld [vmem:[%s7731_s8 + $0x840] ss:$48 sps:$4 sm:$0xff]   ;;  %v6557_v14 = vld [vmem:[%s7731_s8 + $0x668] ss:$48 sps:$4 sm:$0xff]  }
  0xb9   : > { %2688 = vmatpush1.bf16.msra.mxu0 %v6470_v15  ;;  %v6490_v29 = vld [vmem:[%s7731_s8 + $0x2a4] ss:$48 sps:$4 sm:$0xff]   ;;  %v6494_v31 = vld [vmem:[%s7731_s8 + $0x2a0] ss:$48 sps:$4 sm:$0xff]   ;;  %v6562_v15 = vld [vmem:[%s7731_s8 + $0xcc] ss:$48 sps:$4 sm:$0xff]  }
  0xba   : > { %2729 = vmatpush1.bf16.msra.mxu1 %v6471_v16  ;;  %2689 = vmatprep.subr.bf16.mxu0 %v6472_v17  ;;  %v6492_v30 = vld [vmem:[%s7731_s8 + $0x8a4] ss:$48 sps:$4 sm:$0xff]   ;;  %v6495_v32 = vld [vmem:[%s7731_s8 + $0x8a0] ss:$48 sps:$4 sm:$0xff]   ;;  %v6565_v16 = vld [vmem:[%s7731_s8 + $0x6cc] ss:$48 sps:$4 sm:$0xff]  }
  0xbb   : > { %2730 = vmatprep.subr.bf16.mxu1 %v6474_v18  ;;  %v6496_v33 = vld [vmem:[%s7731_s8 + $0x304] ss:$48 sps:$4 sm:$0xff]   ;;  %v6500_v35 = vld [vmem:[%s7731_s8 + $0x300] ss:$48 sps:$4 sm:$0xff]   ;;  %v6560_v17 = vld [vmem:[%s7731_s8 + $0xc8] ss:$48 sps:$4 sm:$0xff]  }
  0xbc   : > { %v6498_v34 = vld [vmem:[%s7731_s8 + $0x904] ss:$48 sps:$4 sm:$0xff]   ;;  %v6501_v36 = vld [vmem:[%s7731_s8 + $0x900] ss:$48 sps:$4 sm:$0xff]   ;;  %v6563_v18 = vld [vmem:[%s7731_s8 + $0x6c8] ss:$48 sps:$4 sm:$0xff]  }
  0xbd   : > { %2690 = vmatpush1.bf16.msra.mxu0 %v6476_v19  ;;  %v6502_v37 = vld [vmem:[%s7731_s8 + $0x364] ss:$48 sps:$4 sm:$0xff]   ;;  %v6506_v39 = vld [vmem:[%s7731_s8 + $0x360] ss:$48 sps:$4 sm:$0xff]   ;;  %v6568_v19 = vld [vmem:[%s7731_s8 + $0x12c] ss:$48 sps:$4 sm:$0xff]  }
  0xbe   : > { %2731 = vmatpush1.bf16.msra.mxu1 %v6477_v20  ;;  %2691 = vmatprep.subr.bf16.mxu0 %v6478_v21  ;;  %v6504_v38 = vld [vmem:[%s7731_s8 + $0x964] ss:$48 sps:$4 sm:$0xff]   ;;  %v6507_v40 = vld [vmem:[%s7731_s8 + $0x960] ss:$48 sps:$4 sm:$0xff]   ;;  %v6571_v20 = vld [vmem:[%s7731_s8 + $0x72c] ss:$48 sps:$4 sm:$0xff]  }
  0xbf   : > { %2732 = vmatprep.subr.bf16.mxu1 %v6480_v22  ;;  %v6508_v41 = vld [vmem:[%s7731_s8 + $0x3c4] ss:$48 sps:$4 sm:$0xff]   ;;  %v6512_v43 = vld [vmem:[%s7731_s8 + $0x3c0] ss:$48 sps:$4 sm:$0xff]   ;;  %v6566_v21 = vld [vmem:[%s7731_s8 + $0x128] ss:$48 sps:$4 sm:$0xff]  }
  0xc0   : > { %v6510_v42 = vld [vmem:[%s7731_s8 + $0x9c4] ss:$48 sps:$4 sm:$0xff]   ;;  %v6513_v44 = vld [vmem:[%s7731_s8 + $0x9c0] ss:$48 sps:$4 sm:$0xff]   ;;  %v6569_v22 = vld [vmem:[%s7731_s8 + $0x728] ss:$48 sps:$4 sm:$0xff]  }
  0xc1   : > { %2692 = vmatpush1.bf16.msra.mxu0 %v6482_v23  ;;  %v6514_v45 = vld [vmem:[%s7731_s8 + $0x424] ss:$48 sps:$4 sm:$0xff]   ;;  %v6518_v50 = vld [vmem:[%s7731_s8 + $0x420] ss:$48 sps:$4 sm:$0xff]   ;;  %v6574_v23 = vld [vmem:[%s7731_s8 + $0x18c] ss:$48 sps:$4 sm:$0xff]  }
  0xc2   : > { %2733 = vmatpush1.bf16.msra.mxu1 %v6483_v24  ;;  %2693 = vmatprep.subr.bf16.mxu0 %v6484_v25  ;;  %v6516_v46 = vld [vmem:[%s7731_s8 + $0xa24] ss:$48 sps:$4 sm:$0xff]   ;;  %v6519_v51 = vld [vmem:[%s7731_s8 + $0xa20] ss:$48 sps:$4 sm:$0xff]   ;;  %v6577_v24 = vld [vmem:[%s7731_s8 + $0x78c] ss:$48 sps:$4 sm:$0xff]  }
  0xc3   : > { %2734 = vmatprep.subr.bf16.mxu1 %v6486_v26  ;;  %v361_v47 = vld [vmem:[%s7724_s13] sm:$0xff]  ;;  %v6572_v25 = vld [vmem:[%s7731_s8 + $0x188] ss:$48 sps:$4 sm:$0xff]  }
  0xc4   : > { %v7793_v48 = vcombine.high %v361_v47, %v361_v47  ;;  %v6520_v53 = vld [vmem:[%s7731_s8 + $0x484] ss:$48 sps:$4 sm:$0xff]   ;;  %v6524_v55 = vld [vmem:[%s7731_s8 + $0x480] ss:$48 sps:$4 sm:$0xff]   ;;  %v7820_v7 = vcombine.low %v361_v47, %v361_v47  ;;  %v6575_v26 = vld [vmem:[%s7731_s8 + $0x788] ss:$48 sps:$4 sm:$0xff]  }
  0xc5   : > { %2694 = vmatpush1.bf16.msra.mxu0 %v6488_v27  ;;  %v6522_v54 = vld [vmem:[%s7731_s8 + $0xa84] ss:$48 sps:$4 sm:$0xff]   ;;  %v6525_v56 = vld [vmem:[%s7731_s8 + $0xa80] ss:$48 sps:$4 sm:$0xff]   ;;  %v6580_v27 = vld [vmem:[%s7731_s8 + $0x1ec] ss:$48 sps:$4 sm:$0xff]  }
  0xc6   : > { %2735 = vmatpush1.bf16.msra.mxu1 %v6489_v28  ;;  %2695 = vmatprep.subr.bf16.mxu0 %v6490_v29  ;;  %v6526_v57 = vld [vmem:[%s7731_s8 + $0x4e4] ss:$48 sps:$4 sm:$0xff]   ;;  %v6530_v59 = vld [vmem:[%s7731_s8 + $0x4e0] ss:$48 sps:$4 sm:$0xff]   ;;  %v6583_v28 = vld [vmem:[%s7731_s8 + $0x7ec] ss:$48 sps:$4 sm:$0xff]  }
  0xc7   : > { %2736 = vmatprep.subr.bf16.mxu1 %v6492_v30  ;;  %2713 = vmatprep.mubr.bf16.mxu0 %v7793_v48  ;;  %v6528_v58 = vld [vmem:[%s7731_s8 + $0xae4] ss:$48 sps:$4 sm:$0xff]   ;;  %v6531_v60 = vld [vmem:[%s7731_s8 + $0xae0] ss:$48 sps:$4 sm:$0xff]   ;;  %v6578_v29 = vld [vmem:[%s7731_s8 + $0x1e8] ss:$48 sps:$4 sm:$0xff]  }
  0xc8   : > { %v6532_v61 = vld [vmem:[%s7731_s8 + $0x544] ss:$48 sps:$4 sm:$0xff]   ;;  %v6536_v63 = vld [vmem:[%s7731_s8 + $0x540] ss:$48 sps:$4 sm:$0xff]   ;;  %v6581_v30 = vld [vmem:[%s7731_s8 + $0x7e8] ss:$48 sps:$4 sm:$0xff]  }
  0xc9   : > { %2696 = vmatpush1.bf16.msra.mxu0 %v6494_v31  ;;  %v6534_v62 = vld [vmem:[%s7731_s8 + $0xb44] ss:$48 sps:$4 sm:$0xff]   ;;  %v6537_v0 = vld [vmem:[%s7731_s8 + $0xb40] ss:$48 sps:$4 sm:$0xff]   ;;  %v6586_v31 = vld [vmem:[%s7731_s8 + $0x24c] ss:$48 sps:$4 sm:$0xff]  }
  0xca   : > { %2737 = vmatpush1.bf16.msra.mxu1 %v6495_v32  ;;  %2697 = vmatprep.subr.bf16.mxu0 %v6496_v33  ;;  %v6538_v1 = vld [vmem:[%s7731_s8 + $0x5a4] ss:$48 sps:$4 sm:$0xff]   ;;  %v6542_v3 = vld [vmem:[%s7731_s8 + $0x5a0] ss:$48 sps:$4 sm:$0xff]   ;;  %v6589_v32 = vld [vmem:[%s7731_s8 + $0x84c] ss:$48 sps:$4 sm:$0xff]  }
  0xcb   : > { %2738 = vmatprep.subr.bf16.mxu1 %v6498_v34  ;;  %v6540_v2 = vld [vmem:[%s7731_s8 + $0xba4] ss:$48 sps:$4 sm:$0xff]   ;;  %v6543_v4 = vld [vmem:[%s7731_s8 + $0xba0] ss:$48 sps:$4 sm:$0xff]   ;;  %v6584_v33 = vld [vmem:[%s7731_s8 + $0x248] ss:$48 sps:$4 sm:$0xff]  }
  0xcc   : > { %v6587_v34 = vld [vmem:[%s7731_s8 + $0x848] ss:$48 sps:$4 sm:$0xff]   ;;  %v6610_v47 = vld [vmem:[%s7731_s8 + $0x3cc] ss:$48 sps:$4 sm:$0xff]  }
  0xcd   : > { %2698 = vmatpush1.bf16.msra.mxu0 %v6500_v35  ;;  %v6592_v35 = vld [vmem:[%s7731_s8 + $0x2ac] ss:$48 sps:$4 sm:$0xff]  }
  0xce   : > { %2739 = vmatpush1.bf16.msra.mxu1 %v6501_v36  ;;  %2699 = vmatprep.subr.bf16.mxu0 %v6502_v37  ;;  %v6595_v36 = vld [vmem:[%s7731_s8 + $0x8ac] ss:$48 sps:$4 sm:$0xff]   ;;  %v6590_v37 = vld [vmem:[%s7731_s8 + $0x2a8] ss:$48 sps:$4 sm:$0xff]  }
  0xcf   : > { %2740 = vmatprep.subr.bf16.mxu1 %v6504_v38  ;;  %v6593_v38 = vld [vmem:[%s7731_s8 + $0x8a8] ss:$48 sps:$4 sm:$0xff]  }
  0xd1   : > { %2700 = vmatpush1.bf16.msra.mxu0 %v6506_v39  ;;  %v6598_v39 = vld [vmem:[%s7731_s8 + $0x30c] ss:$48 sps:$4 sm:$0xff]  }
  0xd2   : > { %2741 = vmatpush1.bf16.msra.mxu1 %v6507_v40  ;;  %2701 = vmatprep.subr.bf16.mxu0 %v6508_v41  ;;  %v6601_v40 = vld [vmem:[%s7731_s8 + $0x90c] ss:$48 sps:$4 sm:$0xff]   ;;  %v6596_v41 = vld [vmem:[%s7731_s8 + $0x308] ss:$48 sps:$4 sm:$0xff]  }
  0xd3   : > { %2742 = vmatprep.subr.bf16.mxu1 %v6510_v42  ;;  %v6599_v42 = vld [vmem:[%s7731_s8 + $0x908] ss:$48 sps:$4 sm:$0xff]  }
  0xd5   : > { %2702 = vmatpush1.bf16.msra.mxu0 %v6512_v43  ;;  %v6604_v43 = vld [vmem:[%s7731_s8 + $0x36c] ss:$48 sps:$4 sm:$0xff]  }
  0xd6   : > { %2743 = vmatpush1.bf16.msra.mxu1 %v6513_v44  ;;  %2703 = vmatprep.subr.bf16.mxu0 %v6514_v45  ;;  %v6607_v44 = vld [vmem:[%s7731_s8 + $0x96c] ss:$48 sps:$4 sm:$0xff]   ;;  %v6602_v45 = vld [vmem:[%s7731_s8 + $0x368] ss:$48 sps:$4 sm:$0xff]  }
  0xd7   : > { %2744 = vmatprep.subr.bf16.mxu1 %v6516_v46  ;;  %v6605_v46 = vld [vmem:[%s7731_s8 + $0x968] ss:$48 sps:$4 sm:$0xff]  }
  0xd9   : > { %2704 = vmatpush1.bf16.msra.mxu0 %v6518_v50  ;;  %v6608_v50 = vld [vmem:[%s7731_s8 + $0x3c8] ss:$48 sps:$4 sm:$0xff]  }
  0xda   : > { %2745 = vmatpush1.bf16.msra.mxu1 %v6519_v51  ;;  %2705 = vmatprep.subr.bf16.mxu0 %v6520_v53  ;;  %v6611_v51 = vld [vmem:[%s7731_s8 + $0x9c8] ss:$48 sps:$4 sm:$0xff]   ;;  %v6616_v53 = vld [vmem:[%s7731_s8 + $0x42c] ss:$48 sps:$4 sm:$0xff]  }
  0xdb   : > { %2746 = vmatprep.subr.bf16.mxu1 %v6522_v54  ;;  %v6619_v54 = vld [vmem:[%s7731_s8 + $0xa2c] ss:$48 sps:$4 sm:$0xff]  }
  0xdd   : > { %2706 = vmatpush1.bf16.msra.mxu0 %v6524_v55  ;;  %v6614_v55 = vld [vmem:[%s7731_s8 + $0x428] ss:$48 sps:$4 sm:$0xff]  }
  0xde   : > { %2747 = vmatpush1.bf16.msra.mxu1 %v6525_v56  ;;  %2707 = vmatprep.subr.bf16.mxu0 %v6526_v57  ;;  %v6617_v56 = vld [vmem:[%s7731_s8 + $0xa28] ss:$48 sps:$4 sm:$0xff]   ;;  %v6622_v57 = vld [vmem:[%s7731_s8 + $0x48c] ss:$48 sps:$4 sm:$0xff]  }
  0xdf   : > { %2748 = vmatprep.subr.bf16.mxu1 %v6528_v58  ;;  %v6625_v58 = vld [vmem:[%s7731_s8 + $0xa8c] ss:$48 sps:$4 sm:$0xff]  }
  0xe1   : > { %2708 = vmatpush1.bf16.msra.mxu0 %v6530_v59  ;;  %v6620_v59 = vld [vmem:[%s7731_s8 + $0x488] ss:$48 sps:$4 sm:$0xff]  }
  0xe2   : > { %2749 = vmatpush1.bf16.msra.mxu1 %v6531_v60  ;;  %2709 = vmatprep.subr.bf16.mxu0 %v6532_v61  ;;  %v6623_v60 = vld [vmem:[%s7731_s8 + $0xa88] ss:$48 sps:$4 sm:$0xff]   ;;  %v6628_v61 = vld [vmem:[%s7731_s8 + $0x4ec] ss:$48 sps:$4 sm:$0xff]  }
  0xe3   : > { %2750 = vmatprep.subr.bf16.mxu1 %v6534_v62  ;;  %v6631_v62 = vld [vmem:[%s7731_s8 + $0xaec] ss:$48 sps:$4 sm:$0xff]  }
  0xe5   : > { %2710 = vmatpush1.bf16.msra.mxu0 %v6536_v63  ;;  %v6626_v63 = vld [vmem:[%s7731_s8 + $0x4e8] ss:$48 sps:$4 sm:$0xff]  }
  0xe6   : > { %2751 = vmatpush1.bf16.msra.mxu1 %v6537_v0  ;;  %2711 = vmatprep.subr.bf16.mxu0 %v6538_v1  ;;  %v6629_v0 = vld [vmem:[%s7731_s8 + $0xae8] ss:$48 sps:$4 sm:$0xff]   ;;  %v6634_v1 = vld [vmem:[%s7731_s8 + $0x54c] ss:$48 sps:$4 sm:$0xff]  }
  0xe7   : > { %2752 = vmatprep.subr.bf16.mxu1 %v6540_v2  ;;  %v6637_v2 = vld [vmem:[%s7731_s8 + $0xb4c] ss:$48 sps:$4 sm:$0xff]  }
  0xe9   : > { %2712 = vmatpush1.bf16.msra.mxu0 %v6542_v3  ;;  %v6632_v3 = vld [vmem:[%s7731_s8 + $0x548] ss:$48 sps:$4 sm:$0xff]  }
  0xea   : > { %2753 = vmatpush1.bf16.msra.mxu1 %v6543_v4  ;;  %2763 = vmatprep.subr.bf16.mxu0 %v6550_v5  ;;  %v6635_v4 = vld [vmem:[%s7731_s8 + $0xb48] ss:$48 sps:$4 sm:$0xff]   ;;  %v6640_v5 = vld [vmem:[%s7731_s8 + $0x5ac] ss:$48 sps:$4 sm:$0xff]  }
  0xeb   : > { %2804 = vmatprep.subr.bf16.mxu1 %v6553_v6  ;;  %v6643_v6 = vld [vmem:[%s7731_s8 + $0xbac] ss:$48 sps:$4 sm:$0xff]  }
  0xec   : > { %2714 = vmatmul.mubr.bf16.vlgmr.msra.gmra.mrb[0].mxu0 %v7820_v7 }
  0xed   : > { %2755 = vmatmul.mubr.bf16.vlgmr.msra.gmra.mrb[0].mxu1 %v7822_v8  ;;  %2764 = vmatpush1.bf16.msra.mxu0 %v6548_v9  ;;  %v6638_v9 = vld [vmem:[%s7731_s8 + $0x5a8] ss:$48 sps:$4 sm:$0xff]  }
  0xee   : > { %2805 = vmatpush1.bf16.msra.mxu1 %v6551_v10  ;;  %2765 = vmatprep.subr.bf16.mxu0 %v6556_v11  ;;  %v6641_v10 = vld [vmem:[%s7731_s8 + $0xba8] ss:$48 sps:$4 sm:$0xff]   ;;  %v6646_v11 = vld [vmem:[%s7731_s8 + $0x14] ss:$48 sps:$4 sm:$0xff]  }
  0xef   : > { %2806 = vmatprep.subr.bf16.mxu1 %v6559_v12  ;;  %2795 = vmatprep.mubr.bf16.mxu0 %v7793_v48  ;;  %v6649_v12 = vld [vmem:[%s7731_s8 + $0x614] ss:$48 sps:$4 sm:$0xff]  }
  0xf0   : > { %2836 = vmatprep.mubr.bf16.mxu1 %v7798_v52 }
  0xf1   : > { %2766 = vmatpush1.bf16.msra.mxu0 %v6554_v13  ;;  %v6644_v13 = vld [vmem:[%s7731_s8 + $0x10] ss:$48 sps:$4 sm:$0xff]  }
  0xf2   : > { %2807 = vmatpush1.bf16.msra.mxu1 %v6557_v14  ;;  %2767 = vmatprep.subr.bf16.mxu0 %v6562_v15  ;;  %v6647_v14 = vld [vmem:[%s7731_s8 + $0x610] ss:$48 sps:$4 sm:$0xff]   ;;  %v6652_v15 = vld [vmem:[%s7731_s8 + $0x74] ss:$48 sps:$4 sm:$0xff]  }
  0xf3   : > { %2808 = vmatprep.subr.bf16.mxu1 %v6565_v16  ;;  %v6655_v16 = vld [vmem:[%s7731_s8 + $0x674] ss:$48 sps:$4 sm:$0xff]  }
  0xf5   : > { %2768 = vmatpush1.bf16.msra.mxu0 %v6560_v17  ;;  %v6650_v17 = vld [vmem:[%s7731_s8 + $0x70] ss:$48 sps:$4 sm:$0xff]  }
  0xf6   : > { %2809 = vmatpush1.bf16.msra.mxu1 %v6563_v18  ;;  %2769 = vmatprep.subr.bf16.mxu0 %v6568_v19  ;;  %v6653_v18 = vld [vmem:[%s7731_s8 + $0x670] ss:$48 sps:$4 sm:$0xff]   ;;  %v6658_v19 = vld [vmem:[%s7731_s8 + $0xd4] ss:$48 sps:$4 sm:$0xff]  }
  0xf7   : > { %2810 = vmatprep.subr.bf16.mxu1 %v6571_v20  ;;  %v6661_v20 = vld [vmem:[%s7731_s8 + $0x6d4] ss:$48 sps:$4 sm:$0xff]  }
  0xf9   : > { %2770 = vmatpush1.bf16.msra.mxu0 %v6566_v21  ;;  %v6656_v21 = vld [vmem:[%s7731_s8 + $0xd0] ss:$48 sps:$4 sm:$0xff]  }
  0xfa   : > { %2811 = vmatpush1.bf16.msra.mxu1 %v6569_v22  ;;  %2771 = vmatprep.subr.bf16.mxu0 %v6574_v23  ;;  %v6659_v22 = vld [vmem:[%s7731_s8 + $0x6d0] ss:$48 sps:$4 sm:$0xff]   ;;  %v6664_v23 = vld [vmem:[%s7731_s8 + $0x134] ss:$48 sps:$4 sm:$0xff]  }
  0xfb   : > { %2812 = vmatprep.subr.bf16.mxu1 %v6577_v24  ;;  %v6667_v24 = vld [vmem:[%s7731_s8 + $0x734] ss:$48 sps:$4 sm:$0xff]  }
  0xfd   : > { %2772 = vmatpush1.bf16.msra.mxu0 %v6572_v25  ;;  %v6662_v25 = vld [vmem:[%s7731_s8 + $0x130] ss:$48 sps:$4 sm:$0xff]  }
  0xfe   : > { %2813 = vmatpush1.bf16.msra.mxu1 %v6575_v26  ;;  %2773 = vmatprep.subr.bf16.mxu0 %v6580_v27  ;;  %v6665_v26 = vld [vmem:[%s7731_s8 + $0x730] ss:$48 sps:$4 sm:$0xff]   ;;  %v6670_v27 = vld [vmem:[%s7731_s8 + $0x194] ss:$48 sps:$4 sm:$0xff]  }
  0xff   : > { %2814 = vmatprep.subr.bf16.mxu1 %v6583_v28  ;;  %v6673_v28 = vld [vmem:[%s7731_s8 + $0x794] ss:$48 sps:$4 sm:$0xff]  }
 0x101   : > { %2774 = vmatpush1.bf16.msra.mxu0 %v6578_v29  ;;  %v6668_v29 = vld [vmem:[%s7731_s8 + $0x190] ss:$48 sps:$4 sm:$0xff]  }
 0x102   : > { %2815 = vmatpush1.bf16.msra.mxu1 %v6581_v30  ;;  %2775 = vmatprep.subr.bf16.mxu0 %v6586_v31  ;;  %v6671_v30 = vld [vmem:[%s7731_s8 + $0x790] ss:$48 sps:$4 sm:$0xff]   ;;  %v6676_v31 = vld [vmem:[%s7731_s8 + $0x1f4] ss:$48 sps:$4 sm:$0xff]  }
 0x103   : > { %2816 = vmatprep.subr.bf16.mxu1 %v6589_v32  ;;  %v6679_v32 = vld [vmem:[%s7731_s8 + $0x7f4] ss:$48 sps:$4 sm:$0xff]  }
 0x105   : > { %2776 = vmatpush1.bf16.msra.mxu0 %v6584_v33  ;;  %v6674_v33 = vld [vmem:[%s7731_s8 + $0x1f0] ss:$48 sps:$4 sm:$0xff]  }
 0x106   : > { %2817 = vmatpush1.bf16.msra.mxu1 %v6587_v34  ;;  %2777 = vmatprep.subr.bf16.mxu0 %v6592_v35  ;;  %v6677_v34 = vld [vmem:[%s7731_s8 + $0x7f0] ss:$48 sps:$4 sm:$0xff]   ;;  %v6682_v35 = vld [vmem:[%s7731_s8 + $0x254] ss:$48 sps:$4 sm:$0xff]  }
 0x107   : > { %2818 = vmatprep.subr.bf16.mxu1 %v6595_v36  ;;  %v6685_v36 = vld [vmem:[%s7731_s8 + $0x854] ss:$48 sps:$4 sm:$0xff]  }
 0x109   : > { %2778 = vmatpush1.bf16.msra.mxu0 %v6590_v37  ;;  %v6680_v37 = vld [vmem:[%s7731_s8 + $0x250] ss:$48 sps:$4 sm:$0xff]  }
 0x10a   : > { %2819 = vmatpush1.bf16.msra.mxu1 %v6593_v38  ;;  %2779 = vmatprep.subr.bf16.mxu0 %v6598_v39  ;;  %v6683_v38 = vld [vmem:[%s7731_s8 + $0x850] ss:$48 sps:$4 sm:$0xff]   ;;  %v6688_v39 = vld [vmem:[%s7731_s8 + $0x2b4] ss:$48 sps:$4 sm:$0xff]  }
 0x10b   : > { %2820 = vmatprep.subr.bf16.mxu1 %v6601_v40  ;;  %v6691_v40 = vld [vmem:[%s7731_s8 + $0x8b4] ss:$48 sps:$4 sm:$0xff]  }
 0x10d   : > { %2780 = vmatpush1.bf16.msra.mxu0 %v6596_v41  ;;  %v6686_v41 = vld [vmem:[%s7731_s8 + $0x2b0] ss:$48 sps:$4 sm:$0xff]  }
 0x10e   : > { %2821 = vmatpush1.bf16.msra.mxu1 %v6599_v42  ;;  %2781 = vmatprep.subr.bf16.mxu0 %v6604_v43  ;;  %v6689_v42 = vld [vmem:[%s7731_s8 + $0x8b0] ss:$48 sps:$4 sm:$0xff]   ;;  %v6694_v43 = vld [vmem:[%s7731_s8 + $0x314] ss:$48 sps:$4 sm:$0xff]  }
 0x10f   : > { %2822 = vmatprep.subr.bf16.mxu1 %v6607_v44  ;;  %v6697_v44 = vld [vmem:[%s7731_s8 + $0x914] ss:$48 sps:$4 sm:$0xff]  }
 0x111   : > { %2782 = vmatpush1.bf16.msra.mxu0 %v6602_v45  ;;  %v6692_v45 = vld [vmem:[%s7731_s8 + $0x310] ss:$48 sps:$4 sm:$0xff]  }
 0x112   : > { %2823 = vmatpush1.bf16.msra.mxu1 %v6605_v46  ;;  %2783 = vmatprep.subr.bf16.mxu0 %v6610_v47  ;;  %v6695_v46 = vld [vmem:[%s7731_s8 + $0x910] ss:$48 sps:$4 sm:$0xff]   ;;  %v6700_v47 = vld [vmem:[%s7731_s8 + $0x374] ss:$48 sps:$4 sm:$0xff]  }
 0x113   : > { %2824 = vmatprep.subr.bf16.mxu1 %v6613_v49  ;;  %v6703_v49 = vld [vmem:[%s7731_s8 + $0x974] ss:$48 sps:$4 sm:$0xff]  }
 0x115   : > { %2784 = vmatpush1.bf16.msra.mxu0 %v6608_v50  ;;  %v6698_v50 = vld [vmem:[%s7731_s8 + $0x370] ss:$48 sps:$4 sm:$0xff]  }
 0x116   : > { %2825 = vmatpush1.bf16.msra.mxu1 %v6611_v51  ;;  %2785 = vmatprep.subr.bf16.mxu0 %v6616_v53  ;;  %v6701_v51 = vld [vmem:[%s7731_s8 + $0x970] ss:$48 sps:$4 sm:$0xff]   ;;  %v6706_v53 = vld [vmem:[%s7731_s8 + $0x3d4] ss:$48 sps:$4 sm:$0xff]  }
 0x117   : > { %2826 = vmatprep.subr.bf16.mxu1 %v6619_v54  ;;  %v6709_v54 = vld [vmem:[%s7731_s8 + $0x9d4] ss:$48 sps:$4 sm:$0xff]  }
 0x119   : > { %2786 = vmatpush1.bf16.msra.mxu0 %v6614_v55  ;;  %v6704_v55 = vld [vmem:[%s7731_s8 + $0x3d0] ss:$48 sps:$4 sm:$0xff]  }
 0x11a   : > { %2827 = vmatpush1.bf16.msra.mxu1 %v6617_v56  ;;  %2787 = vmatprep.subr.bf16.mxu0 %v6622_v57  ;;  %v6707_v56 = vld [vmem:[%s7731_s8 + $0x9d0] ss:$48 sps:$4 sm:$0xff]   ;;  %v6712_v57 = vld [vmem:[%s7731_s8 + $0x434] ss:$48 sps:$4 sm:$0xff]  }
 0x11b   : > { %2828 = vmatprep.subr.bf16.mxu1 %v6625_v58  ;;  %v6715_v58 = vld [vmem:[%s7731_s8 + $0xa34] ss:$48 sps:$4 sm:$0xff]  }
 0x11d   : > { %2788 = vmatpush1.bf16.msra.mxu0 %v6620_v59  ;;  %v6710_v59 = vld [vmem:[%s7731_s8 + $0x430] ss:$48 sps:$4 sm:$0xff]  }
 0x11e   : > { %2829 = vmatpush1.bf16.msra.mxu1 %v6623_v60  ;;  %2789 = vmatprep.subr.bf16.mxu0 %v6628_v61  ;;  %v6713_v60 = vld [vmem:[%s7731_s8 + $0xa30] ss:$48 sps:$4 sm:$0xff]   ;;  %v6718_v61 = vld [vmem:[%s7731_s8 + $0x494] ss:$48 sps:$4 sm:$0xff]  }
 0x11f   : > { %2830 = vmatprep.subr.bf16.mxu1 %v6631_v62  ;;  %v6721_v62 = vld [vmem:[%s7731_s8 + $0xa94] ss:$48 sps:$4 sm:$0xff]  }
 0x121   : > { %2790 = vmatpush1.bf16.msra.mxu0 %v6626_v63  ;;  %v6716_v63 = vld [vmem:[%s7731_s8 + $0x490] ss:$48 sps:$4 sm:$0xff]  }
 0x122   : > { %2831 = vmatpush1.bf16.msra.mxu1 %v6629_v0  ;;  %2791 = vmatprep.subr.bf16.mxu0 %v6634_v1  ;;  %v6719_v0 = vld [vmem:[%s7731_s8 + $0xa90] ss:$48 sps:$4 sm:$0xff]   ;;  %v6724_v1 = vld [vmem:[%s7731_s8 + $0x4f4] ss:$48 sps:$4 sm:$0xff]  }
 0x123   : > { %2832 = vmatprep.subr.bf16.mxu1 %v6637_v2  ;;  %v6727_v2 = vld [vmem:[%s7731_s8 + $0xaf4] ss:$48 sps:$4 sm:$0xff]  }
 0x125   : > { %2792 = vmatpush1.bf16.msra.mxu0 %v6632_v3  ;;  %v6722_v3 = vld [vmem:[%s7731_s8 + $0x4f0] ss:$48 sps:$4 sm:$0xff]  }
 0x126   : > { %2833 = vmatpush1.bf16.msra.mxu1 %v6635_v4  ;;  %2793 = vmatprep.subr.bf16.mxu0 %v6640_v5  ;;  %v6725_v4 = vld [vmem:[%s7731_s8 + $0xaf0] ss:$48 sps:$4 sm:$0xff]   ;;  %v6730_v5 = vld [vmem:[%s7731_s8 + $0x554] ss:$48 sps:$4 sm:$0xff]  }
 0x127   : > { %2834 = vmatprep.subr.bf16.mxu1 %v6643_v6  ;;  %v6733_v6 = vld [vmem:[%s7731_s8 + $0xb54] ss:$48 sps:$4 sm:$0xff]  }
 0x129   : > { %2794 = vmatpush1.bf16.msra.mxu0 %v6638_v9  ;;  %v6728_v9 = vld [vmem:[%s7731_s8 + $0x550] ss:$48 sps:$4 sm:$0xff]  }
 0x12a   : > { %2835 = vmatpush1.bf16.msra.mxu1 %v6641_v10  ;;  %2845 = vmatprep.subr.bf16.mxu0 %v6646_v11  ;;  %v6731_v10 = vld [vmem:[%s7731_s8 + $0xb50] ss:$48 sps:$4 sm:$0xff]   ;;  %v6736_v11 = vld [vmem:[%s7731_s8 + $0x5b4] ss:$48 sps:$4 sm:$0xff]  }
 0x12b   : > { %2886 = vmatprep.subr.bf16.mxu1 %v6649_v12  ;;  %v6739_v12 = vld [vmem:[%s7731_s8 + $0xbb4] ss:$48 sps:$4 sm:$0xff]  }
 0x12c   : > { %2796 = vmatmul.mubr.bf16.vlgmr.msra.gmra.mrb[4].mxu0 %v7820_v7 }
 0x12d   : > { %2837 = vmatmul.mubr.bf16.vlgmr.msra.gmra.mrb[4].mxu1 %v7822_v8  ;;  %2846 = vmatpush1.bf16.msra.mxu0 %v6644_v13  ;;  %v6734_v13 = vld [vmem:[%s7731_s8 + $0x5b0] ss:$48 sps:$4 sm:$0xff]  }
 0x12e   : > { %2887 = vmatpush1.bf16.msra.mxu1 %v6647_v14  ;;  %2847 = vmatprep.subr.bf16.mxu0 %v6652_v15  ;;  %v6737_v14 = vld [vmem:[%s7731_s8 + $0xbb0] ss:$48 sps:$4 sm:$0xff]   ;;  %v6742_v15 = vld [vmem:[%s7731_s8 + $0x1c] ss:$48 sps:$4 sm:$0xff]  }
 0x12f   : > { %2888 = vmatprep.subr.bf16.mxu1 %v6655_v16  ;;  %2877 = vmatprep.mubr.bf16.mxu0 %v7793_v48  ;;  %v6745_v16 = vld [vmem:[%s7731_s8 + $0x61c] ss:$48 sps:$4 sm:$0xff]  }
 0x130   : > { %2918 = vmatprep.mubr.bf16.mxu1 %v7798_v52 }
 0x131   : > { %2848 = vmatpush1.bf16.msra.mxu0 %v6650_v17  ;;  %v6740_v17 = vld [vmem:[%s7731_s8 + $0x18] ss:$48 sps:$4 sm:$0xff]  }
 0x132   : > { %2889 = vmatpush1.bf16.msra.mxu1 %v6653_v18  ;;  %2849 = vmatprep.subr.bf16.mxu0 %v6658_v19  ;;  %v6743_v18 = vld [vmem:[%s7731_s8 + $0x618] ss:$48 sps:$4 sm:$0xff]   ;;  %v6748_v19 = vld [vmem:[%s7731_s8 + $0x7c] ss:$48 sps:$4 sm:$0xff]  }
 0x133   : > { %2890 = vmatprep.subr.bf16.mxu1 %v6661_v20  ;;  %v6751_v20 = vld [vmem:[%s7731_s8 + $0x67c] ss:$48 sps:$4 sm:$0xff]  }
 0x135   : > { %2850 = vmatpush1.bf16.msra.mxu0 %v6656_v21  ;;  %v6746_v21 = vld [vmem:[%s7731_s8 + $0x78] ss:$48 sps:$4 sm:$0xff]  }
 0x136   : > { %2891 = vmatpush1.bf16.msra.mxu1 %v6659_v22  ;;  %2851 = vmatprep.subr.bf16.mxu0 %v6664_v23  ;;  %v6749_v22 = vld [vmem:[%s7731_s8 + $0x678] ss:$48 sps:$4 sm:$0xff]   ;;  %v6754_v23 = vld [vmem:[%s7731_s8 + $0xdc] ss:$48 sps:$4 sm:$0xff]  }
 0x137   : > { %2892 = vmatprep.subr.bf16.mxu1 %v6667_v24  ;;  %v6757_v24 = vld [vmem:[%s7731_s8 + $0x6dc] ss:$48 sps:$4 sm:$0xff]  }
 0x139   : > { %2852 = vmatpush1.bf16.msra.mxu0 %v6662_v25  ;;  %v6752_v25 = vld [vmem:[%s7731_s8 + $0xd8] ss:$48 sps:$4 sm:$0xff]  }
 0x13a   : > { %2893 = vmatpush1.bf16.msra.mxu1 %v6665_v26  ;;  %2853 = vmatprep.subr.bf16.mxu0 %v6670_v27  ;;  %v6755_v26 = vld [vmem:[%s7731_s8 + $0x6d8] ss:$48 sps:$4 sm:$0xff]   ;;  %v6760_v27 = vld [vmem:[%s7731_s8 + $0x13c] ss:$48 sps:$4 sm:$0xff]  }
 0x13b   : > { %2894 = vmatprep.subr.bf16.mxu1 %v6673_v28  ;;  %v6763_v28 = vld [vmem:[%s7731_s8 + $0x73c] ss:$48 sps:$4 sm:$0xff]  }
 0x13d   : > { %2854 = vmatpush1.bf16.msra.mxu0 %v6668_v29  ;;  %v6758_v29 = vld [vmem:[%s7731_s8 + $0x138] ss:$48 sps:$4 sm:$0xff]  }
 0x13e   : > { %2895 = vmatpush1.bf16.msra.mxu1 %v6671_v30  ;;  %2855 = vmatprep.subr.bf16.mxu0 %v6676_v31  ;;  %v6761_v30 = vld [vmem:[%s7731_s8 + $0x738] ss:$48 sps:$4 sm:$0xff]   ;;  %v6766_v31 = vld [vmem:[%s7731_s8 + $0x19c] ss:$48 sps:$4 sm:$0xff]  }
 0x13f   : > { %2896 = vmatprep.subr.bf16.mxu1 %v6679_v32  ;;  %v6769_v32 = vld [vmem:[%s7731_s8 + $0x79c] ss:$48 sps:$4 sm:$0xff]  }
 0x141   : > { %2856 = vmatpush1.bf16.msra.mxu0 %v6674_v33  ;;  %v6764_v33 = vld [vmem:[%s7731_s8 + $0x198] ss:$48 sps:$4 sm:$0xff]  }
 0x142   : > { %2897 = vmatpush1.bf16.msra.mxu1 %v6677_v34  ;;  %2857 = vmatprep.subr.bf16.mxu0 %v6682_v35  ;;  %v6767_v34 = vld [vmem:[%s7731_s8 + $0x798] ss:$48 sps:$4 sm:$0xff]   ;;  %v6772_v35 = vld [vmem:[%s7731_s8 + $0x1fc] ss:$48 sps:$4 sm:$0xff]  }
 0x143   : > { %2898 = vmatprep.subr.bf16.mxu1 %v6685_v36  ;;  %v6775_v36 = vld [vmem:[%s7731_s8 + $0x7fc] ss:$48 sps:$4 sm:$0xff]  }
 0x145   : > { %2858 = vmatpush1.bf16.msra.mxu0 %v6680_v37  ;;  %v6770_v37 = vld [vmem:[%s7731_s8 + $0x1f8] ss:$48 sps:$4 sm:$0xff]  }
 0x146   : > { %2899 = vmatpush1.bf16.msra.mxu1 %v6683_v38  ;;  %2859 = vmatprep.subr.bf16.mxu0 %v6688_v39  ;;  %v6773_v38 = vld [vmem:[%s7731_s8 + $0x7f8] ss:$48 sps:$4 sm:$0xff]   ;;  %v6778_v39 = vld [vmem:[%s7731_s8 + $0x25c] ss:$48 sps:$4 sm:$0xff]  }
 0x147   : > { %2900 = vmatprep.subr.bf16.mxu1 %v6691_v40  ;;  %v6781_v40 = vld [vmem:[%s7731_s8 + $0x85c] ss:$48 sps:$4 sm:$0xff]  }
 0x149   : > { %2860 = vmatpush1.bf16.msra.mxu0 %v6686_v41  ;;  %v6776_v41 = vld [vmem:[%s7731_s8 + $0x258] ss:$48 sps:$4 sm:$0xff]  }
 0x14a   : > { %2901 = vmatpush1.bf16.msra.mxu1 %v6689_v42  ;;  %2861 = vmatprep.subr.bf16.mxu0 %v6694_v43  ;;  %v6779_v42 = vld [vmem:[%s7731_s8 + $0x858] ss:$48 sps:$4 sm:$0xff]   ;;  %v6784_v43 = vld [vmem:[%s7731_s8 + $0x2bc] ss:$48 sps:$4 sm:$0xff]  }
 0x14b   : > { %2902 = vmatprep.subr.bf16.mxu1 %v6697_v44  ;;  %v6787_v44 = vld [vmem:[%s7731_s8 + $0x8bc] ss:$48 sps:$4 sm:$0xff]  }
 0x14d   : > { %2862 = vmatpush1.bf16.msra.mxu0 %v6692_v45  ;;  %v6782_v45 = vld [vmem:[%s7731_s8 + $0x2b8] ss:$48 sps:$4 sm:$0xff]  }
 0x14e   : > { %2903 = vmatpush1.bf16.msra.mxu1 %v6695_v46  ;;  %2863 = vmatprep.subr.bf16.mxu0 %v6700_v47  ;;  %v6785_v46 = vld [vmem:[%s7731_s8 + $0x8b8] ss:$48 sps:$4 sm:$0xff]   ;;  %v6790_v47 = vld [vmem:[%s7731_s8 + $0x31c] ss:$48 sps:$4 sm:$0xff]  }
 0x14f   : > { %2904 = vmatprep.subr.bf16.mxu1 %v6703_v49  ;;  %v6793_v49 = vld [vmem:[%s7731_s8 + $0x91c] ss:$48 sps:$4 sm:$0xff]  }
 0x151   : > { %2864 = vmatpush1.bf16.msra.mxu0 %v6698_v50  ;;  %v6788_v50 = vld [vmem:[%s7731_s8 + $0x318] ss:$48 sps:$4 sm:$0xff]  }
 0x152   : > { %2905 = vmatpush1.bf16.msra.mxu1 %v6701_v51  ;;  %2865 = vmatprep.subr.bf16.mxu0 %v6706_v53  ;;  %v6791_v51 = vld [vmem:[%s7731_s8 + $0x918] ss:$48 sps:$4 sm:$0xff]   ;;  %v6796_v53 = vld [vmem:[%s7731_s8 + $0x37c] ss:$48 sps:$4 sm:$0xff]  }
 0x153   : > { %2906 = vmatprep.subr.bf16.mxu1 %v6709_v54  ;;  %v6799_v54 = vld [vmem:[%s7731_s8 + $0x97c] ss:$48 sps:$4 sm:$0xff]  }
 0x155   : > { %2866 = vmatpush1.bf16.msra.mxu0 %v6704_v55  ;;  %v6794_v55 = vld [vmem:[%s7731_s8 + $0x378] ss:$48 sps:$4 sm:$0xff]  }
 0x156   : > { %2907 = vmatpush1.bf16.msra.mxu1 %v6707_v56  ;;  %2867 = vmatprep.subr.bf16.mxu0 %v6712_v57  ;;  %v6797_v56 = vld [vmem:[%s7731_s8 + $0x978] ss:$48 sps:$4 sm:$0xff]   ;;  %v6802_v57 = vld [vmem:[%s7731_s8 + $0x3dc] ss:$48 sps:$4 sm:$0xff]  }
 0x157   : > { %2908 = vmatprep.subr.bf16.mxu1 %v6715_v58  ;;  %v6805_v58 = vld [vmem:[%s7731_s8 + $0x9dc] ss:$48 sps:$4 sm:$0xff]  }
 0x159   : > { %2868 = vmatpush1.bf16.msra.mxu0 %v6710_v59  ;;  %v6800_v59 = vld [vmem:[%s7731_s8 + $0x3d8] ss:$48 sps:$4 sm:$0xff]  }
 0x15a   : > { %2909 = vmatpush1.bf16.msra.mxu1 %v6713_v60  ;;  %2869 = vmatprep.subr.bf16.mxu0 %v6718_v61  ;;  %v6803_v60 = vld [vmem:[%s7731_s8 + $0x9d8] ss:$48 sps:$4 sm:$0xff]   ;;  %v6808_v61 = vld [vmem:[%s7731_s8 + $0x43c] ss:$48 sps:$4 sm:$0xff]  }
 0x15b   : > { %2910 = vmatprep.subr.bf16.mxu1 %v6721_v62  ;;  %v6811_v62 = vld [vmem:[%s7731_s8 + $0xa3c] ss:$48 sps:$4 sm:$0xff]  }
 0x15d   : > { %2870 = vmatpush1.bf16.msra.mxu0 %v6716_v63  ;;  %v6806_v63 = vld [vmem:[%s7731_s8 + $0x438] ss:$48 sps:$4 sm:$0xff]  }
 0x15e   : > { %2911 = vmatpush1.bf16.msra.mxu1 %v6719_v0  ;;  %2871 = vmatprep.subr.bf16.mxu0 %v6724_v1  ;;  %v6809_v0 = vld [vmem:[%s7731_s8 + $0xa38] ss:$48 sps:$4 sm:$0xff]   ;;  %v6814_v1 = vld [vmem:[%s7731_s8 + $0x49c] ss:$48 sps:$4 sm:$0xff]  }
 0x15f   : > { %2912 = vmatprep.subr.bf16.mxu1 %v6727_v2  ;;  %v6817_v2 = vld [vmem:[%s7731_s8 + $0xa9c] ss:$48 sps:$4 sm:$0xff]  }
 0x161   : > { %2872 = vmatpush1.bf16.msra.mxu0 %v6722_v3  ;;  %v6812_v3 = vld [vmem:[%s7731_s8 + $0x498] ss:$48 sps:$4 sm:$0xff]  }
 0x162   : > { %2913 = vmatpush1.bf16.msra.mxu1 %v6725_v4  ;;  %2873 = vmatprep.subr.bf16.mxu0 %v6730_v5  ;;  %v6815_v4 = vld [vmem:[%s7731_s8 + $0xa98] ss:$48 sps:$4 sm:$0xff]   ;;  %v6820_v5 = vld [vmem:[%s7731_s8 + $0x4fc] ss:$48 sps:$4 sm:$0xff]  }
 0x163   : > { %2914 = vmatprep.subr.bf16.mxu1 %v6733_v6  ;;  %v6823_v6 = vld [vmem:[%s7731_s8 + $0xafc] ss:$48 sps:$4 sm:$0xff]  }
 0x165   : > { %2874 = vmatpush1.bf16.msra.mxu0 %v6728_v9  ;;  %v6818_v9 = vld [vmem:[%s7731_s8 + $0x4f8] ss:$48 sps:$4 sm:$0xff]  }
 0x166   : > { %2915 = vmatpush1.bf16.msra.mxu1 %v6731_v10  ;;  %2875 = vmatprep.subr.bf16.mxu0 %v6736_v11  ;;  %v6821_v10 = vld [vmem:[%s7731_s8 + $0xaf8] ss:$48 sps:$4 sm:$0xff]   ;;  %v6826_v11 = vld [vmem:[%s7731_s8 + $0x55c] ss:$48 sps:$4 sm:$0xff]  }
 0x167   : > { %2916 = vmatprep.subr.bf16.mxu1 %v6739_v12  ;;  %v6829_v12 = vld [vmem:[%s7731_s8 + $0xb5c] ss:$48 sps:$4 sm:$0xff]  }
 0x169   : > { %2876 = vmatpush1.bf16.msra.mxu0 %v6734_v13  ;;  %v6824_v13 = vld [vmem:[%s7731_s8 + $0x558] ss:$48 sps:$4 sm:$0xff]  }
 0x16a   : > { %2917 = vmatpush1.bf16.msra.mxu1 %v6737_v14  ;;  %2927 = vmatprep.subr.bf16.mxu0 %v6742_v15  ;;  %v6827_v14 = vld [vmem:[%s7731_s8 + $0xb58] ss:$48 sps:$4 sm:$0xff]   ;;  %v6832_v15 = vld [vmem:[%s7731_s8 + $0x5bc] ss:$48 sps:$4 sm:$0xff]  }
 0x16b   : > { %2968 = vmatprep.subr.bf16.mxu1 %v6745_v16  ;;  %v6835_v16 = vld [vmem:[%s7731_s8 + $0xbbc] ss:$48 sps:$4 sm:$0xff]  }
 0x16c   : > { %2878 = vmatmul.mubr.bf16.vlgmr.msra.gmra.mrb[8].mxu0 %v7820_v7 }
 0x16d   : > { %2919 = vmatmul.mubr.bf16.vlgmr.msra.gmra.mrb[8].mxu1 %v7822_v8  ;;  %2928 = vmatpush1.bf16.msra.mxu0 %v6740_v17  ;;  %v6830_v17 = vld [vmem:[%s7731_s8 + $0x5b8] ss:$48 sps:$4 sm:$0xff]  }
 0x16e   : > { %2969 = vmatpush1.bf16.msra.mxu1 %v6743_v18  ;;  %2929 = vmatprep.subr.bf16.mxu0 %v6748_v19  ;;  %v6833_v18 = vld [vmem:[%s7731_s8 + $0xbb8] ss:$48 sps:$4 sm:$0xff]   ;;  %v6838_v19 = vld [vmem:[%s7731_s8 + $0x24] ss:$48 sps:$4 sm:$0xff]  }
 0x16f   : > { %2970 = vmatprep.subr.bf16.mxu1 %v6751_v20  ;;  %2959 = vmatprep.mubr.bf16.mxu0 %v7793_v48  ;;  %v6841_v20 = vld [vmem:[%s7731_s8 + $0x624] ss:$48 sps:$4 sm:$0xff]  }
 0x170   : > { %3000 = vmatprep.mubr.bf16.mxu1 %v7798_v52 }
 0x171   : > { %2930 = vmatpush1.bf16.msra.mxu0 %v6746_v21  ;;  %v6836_v21 = vld [vmem:[%s7731_s8 + $0x20] ss:$48 sps:$4 sm:$0xff]  }
 0x172   : > { %2971 = vmatpush1.bf16.msra.mxu1 %v6749_v22  ;;  %2931 = vmatprep.subr.bf16.mxu0 %v6754_v23  ;;  %v6839_v22 = vld [vmem:[%s7731_s8 + $0x620] ss:$48 sps:$4 sm:$0xff]   ;;  %v6844_v23 = vld [vmem:[%s7731_s8 + $0x84] ss:$48 sps:$4 sm:$0xff]  }
 0x173   : > { %2972 = vmatprep.subr.bf16.mxu1 %v6757_v24  ;;  %v6847_v24 = vld [vmem:[%s7731_s8 + $0x684] ss:$48 sps:$4 sm:$0xff]  }
 0x175   : > { %2932 = vmatpush1.bf16.msra.mxu0 %v6752_v25  ;;  %v6842_v25 = vld [vmem:[%s7731_s8 + $0x80] ss:$48 sps:$4 sm:$0xff]  }
 0x176   : > { %2973 = vmatpush1.bf16.msra.mxu1 %v6755_v26  ;;  %2933 = vmatprep.subr.bf16.mxu0 %v6760_v27  ;;  %v6845_v26 = vld [vmem:[%s7731_s8 + $0x680] ss:$48 sps:$4 sm:$0xff]   ;;  %v6850_v27 = vld [vmem:[%s7731_s8 + $0xe4] ss:$48 sps:$4 sm:$0xff]  }
 0x177   : > { %2974 = vmatprep.subr.bf16.mxu1 %v6763_v28  ;;  %v6853_v28 = vld [vmem:[%s7731_s8 + $0x6e4] ss:$48 sps:$4 sm:$0xff]  }
 0x179   : > { %2934 = vmatpush1.bf16.msra.mxu0 %v6758_v29  ;;  %v6848_v29 = vld [vmem:[%s7731_s8 + $0xe0] ss:$48 sps:$4 sm:$0xff]  }
 0x17a   : > { %2975 = vmatpush1.bf16.msra.mxu1 %v6761_v30  ;;  %2935 = vmatprep.subr.bf16.mxu0 %v6766_v31  ;;  %v6851_v30 = vld [vmem:[%s7731_s8 + $0x6e0] ss:$48 sps:$4 sm:$0xff]   ;;  %v6856_v31 = vld [vmem:[%s7731_s8 + $0x144] ss:$48 sps:$4 sm:$0xff]  }
 0x17b   : > { %2976 = vmatprep.subr.bf16.mxu1 %v6769_v32  ;;  %v6859_v32 = vld [vmem:[%s7731_s8 + $0x744] ss:$48 sps:$4 sm:$0xff]  }
 0x17d   : > { %2936 = vmatpush1.bf16.msra.mxu0 %v6764_v33  ;;  %v6854_v33 = vld [vmem:[%s7731_s8 + $0x140] ss:$48 sps:$4 sm:$0xff]  }
 0x17e   : > { %2977 = vmatpush1.bf16.msra.mxu1 %v6767_v34  ;;  %2937 = vmatprep.subr.bf16.mxu0 %v6772_v35  ;;  %v6857_v34 = vld [vmem:[%s7731_s8 + $0x740] ss:$48 sps:$4 sm:$0xff]   ;;  %v6862_v35 = vld [vmem:[%s7731_s8 + $0x1a4] ss:$48 sps:$4 sm:$0xff]  }
 0x17f   : > { %2978 = vmatprep.subr.bf16.mxu1 %v6775_v36  ;;  %v6865_v36 = vld [vmem:[%s7731_s8 + $0x7a4] ss:$48 sps:$4 sm:$0xff]  }
 0x181   : > { %2938 = vmatpush1.bf16.msra.mxu0 %v6770_v37  ;;  %v6860_v37 = vld [vmem:[%s7731_s8 + $0x1a0] ss:$48 sps:$4 sm:$0xff]  }
 0x182   : > { %2979 = vmatpush1.bf16.msra.mxu1 %v6773_v38  ;;  %2939 = vmatprep.subr.bf16.mxu0 %v6778_v39  ;;  %v6863_v38 = vld [vmem:[%s7731_s8 + $0x7a0] ss:$48 sps:$4 sm:$0xff]   ;;  %v6868_v39 = vld [vmem:[%s7731_s8 + $0x204] ss:$48 sps:$4 sm:$0xff]  }
 0x183   : > { %2980 = vmatprep.subr.bf16.mxu1 %v6781_v40  ;;  %v6871_v40 = vld [vmem:[%s7731_s8 + $0x804] ss:$48 sps:$4 sm:$0xff]  }
 0x185   : > { %2940 = vmatpush1.bf16.msra.mxu0 %v6776_v41  ;;  %v6866_v41 = vld [vmem:[%s7731_s8 + $0x200] ss:$48 sps:$4 sm:$0xff]  }
 0x186   : > { %2981 = vmatpush1.bf16.msra.mxu1 %v6779_v42  ;;  %2941 = vmatprep.subr.bf16.mxu0 %v6784_v43  ;;  %v6869_v42 = vld [vmem:[%s7731_s8 + $0x800] ss:$48 sps:$4 sm:$0xff]   ;;  %v6874_v43 = vld [vmem:[%s7731_s8 + $0x264] ss:$48 sps:$4 sm:$0xff]  }
 0x187   : > { %2982 = vmatprep.subr.bf16.mxu1 %v6787_v44  ;;  %v6877_v44 = vld [vmem:[%s7731_s8 + $0x864] ss:$48 sps:$4 sm:$0xff]  }
 0x189   : > { %2942 = vmatpush1.bf16.msra.mxu0 %v6782_v45 }
 0x18a   : > { %2983 = vmatpush1.bf16.msra.mxu1 %v6785_v46  ;;  %2943 = vmatprep.subr.bf16.mxu0 %v6790_v47  ;;  %v349_v46 = vld [vmem:[#allocation2] sm:$0xff] }
 0x18b   : > { %2984 = vmatprep.subr.bf16.mxu1 %v6793_v49 }
 0x18d   : > { %2944 = vmatpush1.bf16.msra.mxu0 %v6788_v50 }
 0x18e   : > { %2985 = vmatpush1.bf16.msra.mxu1 %v6791_v51  ;;  %2945 = vmatprep.subr.bf16.mxu0 %v6796_v53  ;;  %v350_v51 = vld [vmem:[#allocation2 + $0x8] sm:$0xff] }
 0x18f   : > { %2986 = vmatprep.subr.bf16.mxu1 %v6799_v54 }
 0x191   : > { %2946 = vmatpush1.bf16.msra.mxu0 %v6794_v55 }
 0x192   : > { %2987 = vmatpush1.bf16.msra.mxu1 %v6797_v56  ;;  %2947 = vmatprep.subr.bf16.mxu0 %v6802_v57  ;;  %v6872_v57 = vld [vmem:[%s7731_s8 + $0x260] ss:$48 sps:$4 sm:$0xff]  }
 0x193   : > { %2988 = vmatprep.subr.bf16.mxu1 %v6805_v58  ;;  %v6875_v58 = vld [vmem:[%s7731_s8 + $0x860] ss:$48 sps:$4 sm:$0xff]  }
 0x195   : > { %2948 = vmatpush1.bf16.msra.mxu0 %v6800_v59 }
 0x196   : > { %2989 = vmatpush1.bf16.msra.mxu1 %v6803_v60  ;;  %2949 = vmatprep.subr.bf16.mxu0 %v6808_v61 }
 0x197   : > { %2990 = vmatprep.subr.bf16.mxu1 %v6811_v62  ;;  %v6880_v62 = vld [vmem:[%s7731_s8 + $0x2c4] ss:$48 sps:$4 sm:$0xff]  }
 0x199   : > { %2950 = vmatpush1.bf16.msra.mxu0 %v6806_v63  ;;  %v6883_v63 = vld [vmem:[%s7731_s8 + $0x8c4] ss:$48 sps:$4 sm:$0xff]  }
 0x19a   : > { %2991 = vmatpush1.bf16.msra.mxu1 %v6809_v0  ;;  %2951 = vmatprep.subr.bf16.mxu0 %v6814_v1  ;;  %v6878_v1 = vld [vmem:[%s7731_s8 + $0x2c0] ss:$48 sps:$4 sm:$0xff]  }
 0x19b   : > { %2992 = vmatprep.subr.bf16.mxu1 %v6817_v2  ;;  %v6881_v2 = vld [vmem:[%s7731_s8 + $0x8c0] ss:$48 sps:$4 sm:$0xff]  }
 0x19d   : > { %2952 = vmatpush1.bf16.msra.mxu0 %v6812_v3  ;;  %v6886_v3 = vld [vmem:[%s7731_s8 + $0x324] ss:$48 sps:$4 sm:$0xff]  }
 0x19e   : > { %2993 = vmatpush1.bf16.msra.mxu1 %v6815_v4  ;;  %2953 = vmatprep.subr.bf16.mxu0 %v6820_v5  ;;  %v6889_v4 = vld [vmem:[%s7731_s8 + $0x924] ss:$48 sps:$4 sm:$0xff]   ;;  %v6884_v5 = vld [vmem:[%s7731_s8 + $0x320] ss:$48 sps:$4 sm:$0xff]  }
 0x19f   : > { %2994 = vmatprep.subr.bf16.mxu1 %v6823_v6  ;;  %v6887_v6 = vld [vmem:[%s7731_s8 + $0x920] ss:$48 sps:$4 sm:$0xff]  }
 0x1a1   : > { %2954 = vmatpush1.bf16.msra.mxu0 %v6818_v9  ;;  %v6892_v9 = vld [vmem:[%s7731_s8 + $0x384] ss:$48 sps:$4 sm:$0xff]  }
 0x1a2   : > { %2995 = vmatpush1.bf16.msra.mxu1 %v6821_v10  ;;  %2955 = vmatprep.subr.bf16.mxu0 %v6826_v11  ;;  %v6895_v10 = vld [vmem:[%s7731_s8 + $0x984] ss:$48 sps:$4 sm:$0xff]   ;;  %v6890_v11 = vld [vmem:[%s7731_s8 + $0x380] ss:$48 sps:$4 sm:$0xff]  }
 0x1a3   : > { %2996 = vmatprep.subr.bf16.mxu1 %v6829_v12  ;;  %v6893_v12 = vld [vmem:[%s7731_s8 + $0x980] ss:$48 sps:$4 sm:$0xff]  }
 0x1a5   : > { %2956 = vmatpush1.bf16.msra.mxu0 %v6824_v13  ;;  %v6898_v13 = vld [vmem:[%s7731_s8 + $0x3e4] ss:$48 sps:$4 sm:$0xff]  }
 0x1a6   : > { %2997 = vmatpush1.bf16.msra.mxu1 %v6827_v14  ;;  %2957 = vmatprep.subr.bf16.mxu0 %v6832_v15  ;;  %v6901_v14 = vld [vmem:[%s7731_s8 + $0x9e4] ss:$48 sps:$4 sm:$0xff]   ;;  %v6896_v15 = vld [vmem:[%s7731_s8 + $0x3e0] ss:$48 sps:$4 sm:$0xff]  }
 0x1a7   : > { %2998 = vmatprep.subr.bf16.mxu1 %v6835_v16  ;;  %v6899_v16 = vld [vmem:[%s7731_s8 + $0x9e0] ss:$48 sps:$4 sm:$0xff]  }
 0x1a9   : > { %2958 = vmatpush1.bf16.msra.mxu0 %v6830_v17  ;;  %v6904_v17 = vld [vmem:[%s7731_s8 + $0x444] ss:$48 sps:$4 sm:$0xff]  }
 0x1aa   : > { %2999 = vmatpush1.bf16.msra.mxu1 %v6833_v18  ;;  %3009 = vmatprep.subr.bf16.mxu0 %v6838_v19  ;;  %v6907_v18 = vld [vmem:[%s7731_s8 + $0xa44] ss:$48 sps:$4 sm:$0xff]   ;;  %v6902_v19 = vld [vmem:[%s7731_s8 + $0x440] ss:$48 sps:$4 sm:$0xff]  }
 0x1ab   : > { %3050 = vmatprep.subr.bf16.mxu1 %v6841_v20  ;;  %v6905_v20 = vld [vmem:[%s7731_s8 + $0xa40] ss:$48 sps:$4 sm:$0xff]  }
 0x1ac   : > { %2960 = vmatmul.mubr.bf16.vlgmr.msra.gmra.mrb[12].mxu0 %v7820_v7 }
 0x1ad   : > { %3001 = vmatmul.mubr.bf16.vlgmr.msra.gmra.mrb[12].mxu1 %v7822_v8  ;;  %3010 = vmatpush1.bf16.msra.mxu0 %v6836_v21  ;;  %v6910_v21 = vld [vmem:[%s7731_s8 + $0x4a4] ss:$48 sps:$4 sm:$0xff]  }
 0x1ae   : > { %3051 = vmatpush1.bf16.msra.mxu1 %v6839_v22  ;;  %3011 = vmatprep.subr.bf16.mxu0 %v6844_v23  ;;  %v6913_v22 = vld [vmem:[%s7731_s8 + $0xaa4] ss:$48 sps:$4 sm:$0xff]   ;;  %v6908_v23 = vld [vmem:[%s7731_s8 + $0x4a0] ss:$48 sps:$4 sm:$0xff]  }
 0x1af   : > { %3052 = vmatprep.subr.bf16.mxu1 %v6847_v24  ;;  %3041 = vmatprep.mubr.bf16.mxu0 %v7793_v48  ;;  %v6911_v24 = vld [vmem:[%s7731_s8 + $0xaa0] ss:$48 sps:$4 sm:$0xff]  }
 0x1b0   : > { %3082 = vmatprep.mubr.bf16.mxu1 %v7798_v52 }
 0x1b1   : > { %3012 = vmatpush1.bf16.msra.mxu0 %v6842_v25  ;;  %v6916_v25 = vld [vmem:[%s7731_s8 + $0x504] ss:$48 sps:$4 sm:$0xff]  }
 0x1b2   : > { %3053 = vmatpush1.bf16.msra.mxu1 %v6845_v26  ;;  %3013 = vmatprep.subr.bf16.mxu0 %v6850_v27  ;;  %v6919_v26 = vld [vmem:[%s7731_s8 + $0xb04] ss:$48 sps:$4 sm:$0xff]   ;;  %v6914_v27 = vld [vmem:[%s7731_s8 + $0x500] ss:$48 sps:$4 sm:$0xff]  }
 0x1b3   : > { %3054 = vmatprep.subr.bf16.mxu1 %v6853_v28  ;;  %v6917_v28 = vld [vmem:[%s7731_s8 + $0xb00] ss:$48 sps:$4 sm:$0xff]  }
 0x1b5   : > { %3014 = vmatpush1.bf16.msra.mxu0 %v6848_v29  ;;  %v6922_v29 = vld [vmem:[%s7731_s8 + $0x564] ss:$48 sps:$4 sm:$0xff]  }
 0x1b6   : > { %3055 = vmatpush1.bf16.msra.mxu1 %v6851_v30  ;;  %3015 = vmatprep.subr.bf16.mxu0 %v6856_v31  ;;  %v6925_v30 = vld [vmem:[%s7731_s8 + $0xb64] ss:$48 sps:$4 sm:$0xff]   ;;  %v6920_v31 = vld [vmem:[%s7731_s8 + $0x560] ss:$48 sps:$4 sm:$0xff]  }
 0x1b7   : > { %3056 = vmatprep.subr.bf16.mxu1 %v6859_v32  ;;  %v6923_v32 = vld [vmem:[%s7731_s8 + $0xb60] ss:$48 sps:$4 sm:$0xff]  }
 0x1b9   : > { %3016 = vmatpush1.bf16.msra.mxu0 %v6854_v33  ;;  %v6928_v33 = vld [vmem:[%s7731_s8 + $0x5c4] ss:$48 sps:$4 sm:$0xff]  }
 0x1ba   : > { %3057 = vmatpush1.bf16.msra.mxu1 %v6857_v34  ;;  %3017 = vmatprep.subr.bf16.mxu0 %v6862_v35  ;;  %v6931_v34 = vld [vmem:[%s7731_s8 + $0xbc4] ss:$48 sps:$4 sm:$0xff]   ;;  %v6926_v35 = vld [vmem:[%s7731_s8 + $0x5c0] ss:$48 sps:$4 sm:$0xff]  }
 0x1bb   : > { %3058 = vmatprep.subr.bf16.mxu1 %v6865_v36  ;;  %v6929_v36 = vld [vmem:[%s7731_s8 + $0xbc0] ss:$48 sps:$4 sm:$0xff]  }
 0x1bd   : > { %3018 = vmatpush1.bf16.msra.mxu0 %v6860_v37  ;;  %v6934_v37 = vld [vmem:[%s7731_s8 + $0x2c] ss:$48 sps:$4 sm:$0xff]  }
 0x1be   : > { %3059 = vmatpush1.bf16.msra.mxu1 %v6863_v38  ;;  %3019 = vmatprep.subr.bf16.mxu0 %v6868_v39  ;;  %v6937_v38 = vld [vmem:[%s7731_s8 + $0x62c] ss:$48 sps:$4 sm:$0xff]   ;;  %v6932_v39 = vld [vmem:[%s7731_s8 + $0x28] ss:$48 sps:$4 sm:$0xff]  }
 0x1bf   : > { %3060 = vmatprep.subr.bf16.mxu1 %v6871_v40  ;;  %v2715_v45 = vpop.f32.mrb[0].mxu0  ;;  %v6935_v40 = vld [vmem:[%s7731_s8 + $0x628] ss:$48 sps:$4 sm:$0xff]  }
 0x1c0   : > { %v2756_v47 = vpop.f32.mrb[0].mxu1  ;;  %v2717_v50 = vpop.f32.mrb[1].mxu0 }
 0x1c1   : > { %v2757_v49 = vadd.f32 %v2756_v47, %v2715_v45  ;;  %v2758_v53 = vpop.f32.mrb[1].mxu1  ;;  %v2719_v55 = vpop.f32.mrb[2].mxu0  ;;  %3020 = vmatpush1.bf16.msra.mxu0 %v6866_v41  ;;  %v6940_v41 = vld [vmem:[%s7731_s8 + $0x8c] ss:$48 sps:$4 sm:$0xff]   ;;  %v6944_v47 = vld [vmem:[%s7731_s8 + $0xe8] ss:$48 sps:$4 sm:$0xff]  }
 0x1c2   : > { %v2759_v54 = vadd.f32 %v2758_v53, %v2717_v50  ;;  %v2760_v56 = vpop.f32.mrb[2].mxu1  ;;  %3061 = vmatpush1.bf16.msra.mxu1 %v6869_v42  ;;  %v2720_v60 = vpop.f32.mrb[3].mxu0  ;;  %3021 = vmatprep.subr.bf16.mxu0 %v6874_v43  ;;  %v6943_v42 = vld [vmem:[%s7731_s8 + $0x68c] ss:$48 sps:$4 sm:$0xff]   ;;  %v6938_v43 = vld [vmem:[%s7731_s8 + $0x88] ss:$48 sps:$4 sm:$0xff]  }
 0x1c3   : > { %v3173_v59 = vadd.f32 %v2757_v49, %v349_v46  ;;  %v2761_v61 = vpop.f32.mrb[3].mxu1  ;;  %3062 = vmatprep.subr.bf16.mxu1 %v6877_v44  ;;  %v6941_v44 = vld [vmem:[%s7731_s8 + $0x688] ss:$48 sps:$4 sm:$0xff]   ;;  %v6946_v45 = vld [vmem:[%s7731_s8 + $0xec] ss:$48 sps:$4 sm:$0xff]  }
 0x1c4   : > { %v3174_v0 = vadd.f32 %v2759_v54, %v350_v51  ;;  %v6949_v46 = vld [vmem:[%s7731_s8 + $0x6ec] ss:$48 sps:$4 sm:$0xff]   ;;  %v6947_v49 = vld [vmem:[%s7731_s8 + $0x6e8] ss:$48 sps:$4 sm:$0xff]  }
 0x1c5   : > { %3185 = vst [vmem:[#allocation2] sm:$0xff] %v3173_v59  ;;  %3022 = vmatpush1.bf16.msra.mxu0 %v6872_v57  ;;  %v6952_v50 = vld [vmem:[%s7731_s8 + $0x14c] ss:$48 sps:$4 sm:$0xff]   ;;  %v6950_v53 = vld [vmem:[%s7731_s8 + $0x148] ss:$48 sps:$4 sm:$0xff]  }
 0x1c6   : > { %3186 = vst [vmem:[#allocation2 + $0x8] sm:$0xff] %v3174_v0  ;;  %3063 = vmatpush1.bf16.msra.mxu1 %v6875_v58  ;;  %3023 = vmatprep.subr.bf16.mxu0 %v6880_v62  ;;  %v6955_v51 = vld [vmem:[%s7731_s8 + $0x74c] ss:$48 sps:$4 sm:$0xff]   ;;  %v6956_v55 = vld [vmem:[%s7731_s8 + $0x1a8] ss:$48 sps:$4 sm:$0xff]   ;;  %v351_v0 = vld [vmem:[#allocation2 + $0x10] sm:$0xff] }
 0x1c7   : > { %3064 = vmatprep.subr.bf16.mxu1 %v6883_v63  ;;  %v6961_v54 = vld [vmem:[%s7731_s8 + $0x7ac] ss:$48 sps:$4 sm:$0xff]   ;;  %v6959_v56 = vld [vmem:[%s7731_s8 + $0x7a8] ss:$48 sps:$4 sm:$0xff]  }
 0x1c8   : > { %v6964_v57 = vld [vmem:[%s7731_s8 + $0x20c] ss:$48 sps:$4 sm:$0xff]   ;;  %v6962_v59 = vld [vmem:[%s7731_s8 + $0x208] ss:$48 sps:$4 sm:$0xff]  }
 0x1c9   : > { %3024 = vmatpush1.bf16.msra.mxu0 %v6878_v1  ;;  %v6967_v58 = vld [vmem:[%s7731_s8 + $0x80c] ss:$48 sps:$4 sm:$0xff]   ;;  %v6965_v60 = vld [vmem:[%s7731_s8 + $0x808] ss:$48 sps:$4 sm:$0xff]  }
 0x1ca   : > { %3065 = vmatpush1.bf16.msra.mxu1 %v6881_v2  ;;  %3025 = vmatprep.subr.bf16.mxu0 %v6886_v3  ;;  %v6970_v61 = vld [vmem:[%s7731_s8 + $0x26c] ss:$48 sps:$4 sm:$0xff]  }
 0x1cb   : > { %3066 = vmatprep.subr.bf16.mxu1 %v6889_v4  ;;  %v6973_v62 = vld [vmem:[%s7731_s8 + $0x86c] ss:$48 sps:$4 sm:$0xff]  }
 0x1cc   : > { %v352_v4 = vld [vmem:[#allocation2 + $0x18] sm:$0xff] }
 0x1cd   : > { %3026 = vmatpush1.bf16.msra.mxu0 %v6884_v5 }
 0x1ce   : > { %3067 = vmatpush1.bf16.msra.mxu1 %v6887_v6  ;;  %3027 = vmatprep.subr.bf16.mxu0 %v6892_v9 }
 0x1cf   : > { %3068 = vmatprep.subr.bf16.mxu1 %v6895_v10 }
 0x1d1   : > { %3028 = vmatpush1.bf16.msra.mxu0 %v6890_v11  ;;  %v6968_v11 = vld [vmem:[%s7731_s8 + $0x268] ss:$48 sps:$4 sm:$0xff]  }
 0x1d2   : > { %3069 = vmatpush1.bf16.msra.mxu1 %v6893_v12  ;;  %3029 = vmatprep.subr.bf16.mxu0 %v6898_v13  ;;  %v6971_v12 = vld [vmem:[%s7731_s8 + $0x868] ss:$48 sps:$4 sm:$0xff]  }
 0x1d3   : > { %3070 = vmatprep.subr.bf16.mxu1 %v6901_v14 }
 0x1d5   : > { %3030 = vmatpush1.bf16.msra.mxu0 %v6896_v15 }
 0x1d6   : > { %3071 = vmatpush1.bf16.msra.mxu1 %v6899_v16  ;;  %3031 = vmatprep.subr.bf16.mxu0 %v6904_v17  ;;  %v6976_v16 = vld [vmem:[%s7731_s8 + $0x2cc] ss:$48 sps:$4 sm:$0xff]  }
 0x1d7   : > { %3072 = vmatprep.subr.bf16.mxu1 %v6907_v18  ;;  %v6979_v17 = vld [vmem:[%s7731_s8 + $0x8cc] ss:$48 sps:$4 sm:$0xff]  }
 0x1d9   : > { %3032 = vmatpush1.bf16.msra.mxu0 %v6902_v19  ;;  %v6974_v19 = vld [vmem:[%s7731_s8 + $0x2c8] ss:$48 sps:$4 sm:$0xff]  }
 0x1da   : > { %3073 = vmatpush1.bf16.msra.mxu1 %v6905_v20  ;;  %3033 = vmatprep.subr.bf16.mxu0 %v6910_v21  ;;  %v6977_v20 = vld [vmem:[%s7731_s8 + $0x8c8] ss:$48 sps:$4 sm:$0xff]   ;;  %v6982_v21 = vld [vmem:[%s7731_s8 + $0x32c] ss:$48 sps:$4 sm:$0xff]  }
 0x1db   : > { %3074 = vmatprep.subr.bf16.mxu1 %v6913_v22  ;;  %v6985_v22 = vld [vmem:[%s7731_s8 + $0x92c] ss:$48 sps:$4 sm:$0xff]  }
 0x1dd   : > { %3034 = vmatpush1.bf16.msra.mxu0 %v6908_v23  ;;  %v6980_v23 = vld [vmem:[%s7731_s8 + $0x328] ss:$48 sps:$4 sm:$0xff]  }
 0x1de   : > { %3075 = vmatpush1.bf16.msra.mxu1 %v6911_v24  ;;  %3035 = vmatprep.subr.bf16.mxu0 %v6916_v25  ;;  %v6983_v24 = vld [vmem:[%s7731_s8 + $0x928] ss:$48 sps:$4 sm:$0xff]   ;;  %v6988_v25 = vld [vmem:[%s7731_s8 + $0x38c] ss:$48 sps:$4 sm:$0xff]  }
 0x1df   : > { %3076 = vmatprep.subr.bf16.mxu1 %v6919_v26  ;;  %v6991_v26 = vld [vmem:[%s7731_s8 + $0x98c] ss:$48 sps:$4 sm:$0xff]  }
 0x1e1   : > { %3036 = vmatpush1.bf16.msra.mxu0 %v6914_v27  ;;  %v6986_v27 = vld [vmem:[%s7731_s8 + $0x388] ss:$48 sps:$4 sm:$0xff]  }
 0x1e2   : > { %3077 = vmatpush1.bf16.msra.mxu1 %v6917_v28  ;;  %3037 = vmatprep.subr.bf16.mxu0 %v6922_v29  ;;  %v6989_v28 = vld [vmem:[%s7731_s8 + $0x988] ss:$48 sps:$4 sm:$0xff]   ;;  %v6994_v29 = vld [vmem:[%s7731_s8 + $0x3ec] ss:$48 sps:$4 sm:$0xff]  }
 0x1e3   : > { %3078 = vmatprep.subr.bf16.mxu1 %v6925_v30  ;;  %v6997_v30 = vld [vmem:[%s7731_s8 + $0x9ec] ss:$48 sps:$4 sm:$0xff]  }
 0x1e5   : > { %3038 = vmatpush1.bf16.msra.mxu0 %v6920_v31  ;;  %v6992_v31 = vld [vmem:[%s7731_s8 + $0x3e8] ss:$48 sps:$4 sm:$0xff]  }
 0x1e6   : > { %3079 = vmatpush1.bf16.msra.mxu1 %v6923_v32  ;;  %3039 = vmatprep.subr.bf16.mxu0 %v6928_v33  ;;  %v6995_v32 = vld [vmem:[%s7731_s8 + $0x9e8] ss:$48 sps:$4 sm:$0xff]   ;;  %v7000_v33 = vld [vmem:[%s7731_s8 + $0x44c] ss:$48 sps:$4 sm:$0xff]  }
 0x1e7   : > { %3080 = vmatprep.subr.bf16.mxu1 %v6931_v34  ;;  %v7003_v34 = vld [vmem:[%s7731_s8 + $0xa4c] ss:$48 sps:$4 sm:$0xff]  }
 0x1e9   : > { %3040 = vmatpush1.bf16.msra.mxu0 %v6926_v35  ;;  %v6998_v35 = vld [vmem:[%s7731_s8 + $0x448] ss:$48 sps:$4 sm:$0xff]  }
 0x1ea   : > { %3081 = vmatpush1.bf16.msra.mxu1 %v6929_v36  ;;  %3091 = vmatprep.subr.bf16.mxu0 %v6934_v37  ;;  %v7001_v36 = vld [vmem:[%s7731_s8 + $0xa48] ss:$48 sps:$4 sm:$0xff]   ;;  %v7006_v37 = vld [vmem:[%s7731_s8 + $0x4ac] ss:$48 sps:$4 sm:$0xff]  }
 0x1eb   : > { %3132 = vmatprep.subr.bf16.mxu1 %v6937_v38  ;;  %v7009_v38 = vld [vmem:[%s7731_s8 + $0xaac] ss:$48 sps:$4 sm:$0xff]  }
 0x1ec   : > { %3042 = vmatmul.mubr.bf16.vlgmr.msra.gmra.mrb[16].mxu0 %v7820_v7 }
 0x1ed   : > { %3083 = vmatmul.mubr.bf16.vlgmr.msra.gmra.mrb[16].mxu1 %v7822_v8  ;;  %3092 = vmatpush1.bf16.msra.mxu0 %v6932_v39  ;;  %v7004_v39 = vld [vmem:[%s7731_s8 + $0x4a8] ss:$48 sps:$4 sm:$0xff]  }
 0x1ee   : > { %3133 = vmatpush1.bf16.msra.mxu1 %v6935_v40  ;;  %3093 = vmatprep.subr.bf16.mxu0 %v6940_v41  ;;  %v7007_v40 = vld [vmem:[%s7731_s8 + $0xaa8] ss:$48 sps:$4 sm:$0xff]   ;;  %v7012_v41 = vld [vmem:[%s7731_s8 + $0x50c] ss:$48 sps:$4 sm:$0xff]  }
 0x1ef   : > { %3134 = vmatprep.subr.bf16.mxu1 %v6943_v42  ;;  %3123 = vmatprep.mubr.bf16.mxu0 %v7793_v48  ;;  %v6953_v48 = vld [vmem:[%s7731_s8 + $0x748] ss:$48 sps:$4 sm:$0xff]   ;;  %v7015_v42 = vld [vmem:[%s7731_s8 + $0xb0c] ss:$48 sps:$4 sm:$0xff]  }
 0x1f0   : > { %3164 = vmatprep.mubr.bf16.mxu1 %v7798_v52  ;;  %v6958_v52 = vld [vmem:[%s7731_s8 + $0x1ac] ss:$48 sps:$4 sm:$0xff]  }
 0x1f1   : > { %3094 = vmatpush1.bf16.msra.mxu0 %v6938_v43  ;;  %v7010_v43 = vld [vmem:[%s7731_s8 + $0x508] ss:$48 sps:$4 sm:$0xff]  }
 0x1f2   : > { %3135 = vmatpush1.bf16.msra.mxu1 %v6941_v44  ;;  %3095 = vmatprep.subr.bf16.mxu0 %v6946_v45  ;;  %v7013_v44 = vld [vmem:[%s7731_s8 + $0xb08] ss:$48 sps:$4 sm:$0xff]   ;;  %v7018_v45 = vld [vmem:[%s7731_s8 + $0x56c] ss:$48 sps:$4 sm:$0xff]  }
 0x1f3   : > { %3136 = vmatprep.subr.bf16.mxu1 %v6949_v46  ;;  %v7021_v46 = vld [vmem:[%s7731_s8 + $0xb6c] ss:$48 sps:$4 sm:$0xff]  }
 0x1f5   : > { %3096 = vmatpush1.bf16.msra.mxu0 %v6944_v47  ;;  %v7016_v47 = vld [vmem:[%s7731_s8 + $0x568] ss:$48 sps:$4 sm:$0xff]  }
 0x1f6   : > { %3137 = vmatpush1.bf16.msra.mxu1 %v6947_v49  ;;  %3097 = vmatprep.subr.bf16.mxu0 %v6952_v50  ;;  %v7019_v49 = vld [vmem:[%s7731_s8 + $0xb68] ss:$48 sps:$4 sm:$0xff]   ;;  %v7024_v50 = vld [vmem:[%s7731_s8 + $0x5cc] ss:$48 sps:$4 sm:$0xff]  }
 0x1f7   : > { %3138 = vmatprep.subr.bf16.mxu1 %v6955_v51  ;;  %v7027_v51 = vld [vmem:[%s7731_s8 + $0xbcc] ss:$48 sps:$4 sm:$0xff]  }
 0x1f9   : > { %3098 = vmatpush1.bf16.msra.mxu0 %v6950_v53  ;;  %v7022_v53 = vld [vmem:[%s7731_s8 + $0x5c8] ss:$48 sps:$4 sm:$0xff]  }
 0x1fa   : > { %3139 = vmatpush1.bf16.msra.mxu1 %v6953_v48  ;;  %3099 = vmatprep.subr.bf16.mxu0 %v6958_v52  ;;  %v7025_v48 = vld [vmem:[%s7731_s8 + $0xbc8] ss:$48 sps:$4 sm:$0xff]  }
 0x1fb   : > { %3140 = vmatprep.subr.bf16.mxu1 %v6961_v54  ;;  %v353_v54 = vld [vmem:[#allocation2 + $0x20] sm:$0xff] }
 0x1fd   : > { %3100 = vmatpush1.bf16.msra.mxu0 %v6956_v55 }
 0x1fe   : > { %3141 = vmatpush1.bf16.msra.mxu1 %v6959_v56  ;;  %3101 = vmatprep.subr.bf16.mxu0 %v6964_v57 }
 0x1ff   : > { %3142 = vmatprep.subr.bf16.mxu1 %v6967_v58  ;;  %v2797_v63 = vpop.f32.mrb[4].mxu0  ;;  %v354_v58 = vld [vmem:[#allocation2 + $0x28] sm:$0xff] }
 0x200   : > { %v2838_v1 = vpop.f32.mrb[4].mxu1  ;;  %v2799_v3 = vpop.f32.mrb[5].mxu0 }
 0x201   : > { %v2839_v2 = vadd.f32 %v2838_v1, %v2797_v63  ;;  %v2840_v5 = vpop.f32.mrb[5].mxu1  ;;  %v2801_v9 = vpop.f32.mrb[6].mxu0  ;;  %3102 = vmatpush1.bf16.msra.mxu0 %v6962_v59 }
 0x202   : > { %v2841_v6 = vadd.f32 %v2840_v5, %v2799_v3  ;;  %v2842_v10 = vpop.f32.mrb[6].mxu1  ;;  %3143 = vmatpush1.bf16.msra.mxu1 %v6965_v60  ;;  %v2802_v14 = vpop.f32.mrb[7].mxu0  ;;  %3103 = vmatprep.subr.bf16.mxu0 %v6970_v61 }
 0x203   : > { %v3175_v13 = vadd.f32 %v2839_v2, %v351_v0  ;;  %v2843_v15 = vpop.f32.mrb[7].mxu1  ;;  %3144 = vmatprep.subr.bf16.mxu1 %v6973_v62 }
 0x204   : > { %v3176_v18 = vadd.f32 %v2841_v6, %v352_v4  ;;  %v356_v6 = vld [vmem:[#allocation2 + $0x38] sm:$0xff] }
 0x205   : > { %3187 = vst [vmem:[#allocation2 + $0x10] sm:$0xff] %v3175_v13  ;;  %3104 = vmatpush1.bf16.msra.mxu0 %v6968_v11 }
 0x206   : > { %3188 = vst [vmem:[#allocation2 + $0x18] sm:$0xff] %v3176_v18  ;;  %3145 = vmatpush1.bf16.msra.mxu1 %v6971_v12  ;;  %3105 = vmatprep.subr.bf16.mxu0 %v6976_v16  ;;  %v357_v18 = vld [vmem:[#allocation2 + $0x40] sm:$0xff] }
 0x207   : > { %3146 = vmatprep.subr.bf16.mxu1 %v6979_v17 }
 0x209   : > { %3106 = vmatpush1.bf16.msra.mxu0 %v6974_v19 }
 0x20a   : > { %3147 = vmatpush1.bf16.msra.mxu1 %v6977_v20  ;;  %3107 = vmatprep.subr.bf16.mxu0 %v6982_v21 }
 0x20b   : > { %3148 = vmatprep.subr.bf16.mxu1 %v6985_v22  ;;  %v358_v22 = vld [vmem:[#allocation2 + $0x48] sm:$0xff] }
 0x20d   : > { %3108 = vmatpush1.bf16.msra.mxu0 %v6980_v23 }
 0x20e   : > { %3149 = vmatpush1.bf16.msra.mxu1 %v6983_v24  ;;  %3109 = vmatprep.subr.bf16.mxu0 %v6988_v25 }
 0x20f   : > { %3150 = vmatprep.subr.bf16.mxu1 %v6991_v26 }
 0x211   : > { %3110 = vmatpush1.bf16.msra.mxu0 %v6986_v27 }
 0x212   : > { %3151 = vmatpush1.bf16.msra.mxu1 %v6989_v28  ;;  %3111 = vmatprep.subr.bf16.mxu0 %v6994_v29 }
 0x213   : > { %3152 = vmatprep.subr.bf16.mxu1 %v6997_v30 }
 0x215   : > { %3112 = vmatpush1.bf16.msra.mxu0 %v6992_v31 }
 0x216   : > { %3153 = vmatpush1.bf16.msra.mxu1 %v6995_v32  ;;  %3113 = vmatprep.subr.bf16.mxu0 %v7000_v33  ;;  %v359_v32 = vld [vmem:[#allocation2 + $0x50] sm:$0xff] }
 0x217   : > { %3154 = vmatprep.subr.bf16.mxu1 %v7003_v34 }
 0x219   : > { %3114 = vmatpush1.bf16.msra.mxu0 %v6998_v35 }
 0x21a   : > { %3155 = vmatpush1.bf16.msra.mxu1 %v7001_v36  ;;  %3115 = vmatprep.subr.bf16.mxu0 %v7006_v37  ;;  %v360_v36 = vld [vmem:[#allocation2 + $0x58] sm:$0xff] }
 0x21b   : > { %3156 = vmatprep.subr.bf16.mxu1 %v7009_v38 }
 0x21d   : > { %3116 = vmatpush1.bf16.msra.mxu0 %v7004_v39 }
 0x21e   : > { %3157 = vmatpush1.bf16.msra.mxu1 %v7007_v40  ;;  %3117 = vmatprep.subr.bf16.mxu0 %v7012_v41 }
 0x21f   : > { %3158 = vmatprep.subr.bf16.mxu1 %v7015_v42 }
 0x221   : > { %3118 = vmatpush1.bf16.msra.mxu0 %v7010_v43 }
 0x222   : > { %3159 = vmatpush1.bf16.msra.mxu1 %v7013_v44  ;;  %3119 = vmatprep.subr.bf16.mxu0 %v7018_v45  ;;  %v7028_v45 = vld [vmem:[#allocation9 + $0x40] sm:$0xff] (!%p5879_p13)  }
 0x223   : > { %3160 = vmatprep.subr.bf16.mxu1 %v7021_v46  ;;  %v7029_v46 = vld [vmem:[#allocation9 + $0xc0] sm:$0xff] (!%p5879_p13)  }
 0x225   : > { %3120 = vmatpush1.bf16.msra.mxu0 %v7016_v47  ;;  %v7030_v47 = vld [vmem:[#allocation9] sm:$0xff] (!%p5879_p13)  }
 0x226   : > { %3161 = vmatpush1.bf16.msra.mxu1 %v7019_v49  ;;  %3121 = vmatprep.subr.bf16.mxu0 %v7024_v50  ;;  %v7031_v49 = vld [vmem:[#allocation9 + $0x80] sm:$0xff] (!%p5879_p13)   ;;  %v7032_v50 = vld [vmem:[#allocation9 + $0x48] sm:$0xff] (!%p5879_p13)  }
 0x227   : > { %3162 = vmatprep.subr.bf16.mxu1 %v7027_v51  ;;  %v7033_v51 = vld [vmem:[#allocation9 + $0xc8] sm:$0xff] (!%p5879_p13)  }
 0x229   : > { %3122 = vmatpush1.bf16.msra.mxu0 %v7022_v53  ;;  %v7034_v53 = vld [vmem:[#allocation9 + $0x8] sm:$0xff] (!%p5879_p13)  }
 0x22a   : > { %3163 = vmatpush1.bf16.msra.mxu1 %v7025_v48  ;;  %6078 = vmatprep.subr.bf16.mxu0 (!%p5879_p13), %v7028_v45  ;;  %v7035_v48 = vld [vmem:[#allocation9 + $0x88] sm:$0xff] (!%p5879_p13)   ;;  %v7069_v45 = vld [vmem:[#allocation9 + $0x1d0] sm:$0xff] (!%p5879_p13)  }
 0x22b   : > { %6100 = vmatprep.subr.bf16.mxu1 (!%p5879_p13), %v7029_v46  ;;  %v7070_v46 = vld [vmem:[#allocation9 + $0x110] sm:$0xff] (!%p5879_p13)  }
 0x22c   : > { %3124 = vmatmul.mubr.bf16.vlgmr.msra.gmra.mrb[20].mxu0 %v7820_v7  ;;  %v355_v7 = vld [vmem:[#allocation2 + $0x30] sm:$0xff] }
 0x22d   : > { %3165 = vmatmul.mubr.bf16.vlgmr.msra.gmra.mrb[20].mxu1 %v7822_v8  ;;  %6079 = vmatpush3.bf16.msra.mxu0 (!%p5879_p13), %v7030_v47  ;;  %v7071_v47 = vld [vmem:[#allocation9 + $0x190] sm:$0xff] (!%p5879_p13)  }
 0x22e   : > { %6101 = vmatpush3.bf16.msra.mxu1 (!%p5879_p13), %v7031_v49  ;;  %6080 = vmatprep.subr.bf16.mxu0 (!%p5879_p13), %v7032_v50  ;;  %v7072_v49 = vld [vmem:[#allocation9 + $0x158] sm:$0xff] (!%p5879_p13)  }
 0x22f   : > { %6102 = vmatprep.subr.bf16.mxu1 (!%p5879_p13), %v7033_v51  ;;  %v7073_v50 = vld [vmem:[#allocation9 + $0x1d8] sm:$0xff] (!%p5879_p13)  }
 0x230   : > { %v7074_v51 = vld [vmem:[#allocation9 + $0x118] sm:$0xff] (!%p5879_p13)  }
 0x231   : > { %6081 = vmatpush3.bf16.msra.mxu0 (!%p5879_p13), %v7034_v53  ;;  %v7075_v53 = vld [vmem:[#allocation9 + $0x198] sm:$0xff] (!%p5879_p13)  }
 0x232   : > { %6103 = vmatpush3.bf16.msra.mxu1 (!%p5879_p13), %v7035_v48  ;;  %v7076_v48 = vld [vmem:[#allocation9 + $0x160] sm:$0xff] (!%p5879_p13)  }
 0x23f   : > { %v2879_v52 = vpop.f32.mrb[8].mxu0 }
 0x240   : > { %v2920_v55 = vpop.f32.mrb[8].mxu1  ;;  %v2881_v57 = vpop.f32.mrb[9].mxu0 }
 0x241   : > { %v2921_v56 = vadd.f32 %v2920_v55, %v2879_v52  ;;  %v2922_v59 = vpop.f32.mrb[9].mxu1  ;;  %v2883_v61 = vpop.f32.mrb[10].mxu0  ;;  %v7036_v52 = vld [vmem:[#allocation9 + $0x50] sm:$0xff] (!%p5879_p13)  }
 0x242   : > { %v2923_v60 = vadd.f32 %v2922_v59, %v2881_v57  ;;  %v2924_v62 = vpop.f32.mrb[10].mxu1  ;;  %v2884_v0 = vpop.f32.mrb[11].mxu0  ;;  %6082 = vmatprep.subr.bf16.mxu0 (!%p5879_p13), %v7036_v52  ;;  %v7038_v55 = vld [vmem:[#allocation9 + $0x10] sm:$0xff] (!%p5879_p13)   ;;  %v7040_v57 = vld [vmem:[#allocation9 + $0x58] sm:$0xff] (!%p5879_p13)   ;;  %v7044_v61 = vld [vmem:[#allocation9 + $0x60] sm:$0xff] (!%p5879_p13)  }
 0x243   : > { %v3177_v63 = vadd.f32 %v2921_v56, %v353_v54  ;;  %v2925_v1 = vpop.f32.mrb[11].mxu1  ;;  %v7037_v54 = vld [vmem:[#allocation9 + $0xd0] sm:$0xff] (!%p5879_p13)   ;;  %6083 = vmatpush3.bf16.msra.mxu0 (!%p5879_p13), %v7038_v55  ;;  %v7042_v59 = vld [vmem:[#allocation9 + $0x18] sm:$0xff] (!%p5879_p13)   ;;  %v7045_v62 = vld [vmem:[#allocation9 + $0xe0] sm:$0xff] (!%p5879_p13)   ;;  %v3217_v0 = vlaneseq (!%p5879_p13) }
 0x244   : > { %v3178_v2 = vadd.f32 %v2923_v60, %v354_v58  ;;  %6104 = vmatprep.subr.bf16.mxu1 (!%p5879_p13), %v7037_v54  ;;  %v7039_v56 = vld [vmem:[#allocation9 + $0x90] sm:$0xff] (!%p5879_p13)   ;;  %v7041_v58 = vld [vmem:[#allocation9 + $0xd8] sm:$0xff] (!%p5879_p13)   ;;  %6084 = vmatprep.subr.bf16.mxu0 (!%p5879_p13), %v7040_v57  ;;  %v7047_v1 = vld [vmem:[#allocation9 + $0xa0] sm:$0xff] (!%p5879_p13)  }
 0x245   : > { %3189 = vst [vmem:[#allocation2 + $0x20] sm:$0xff] %v3177_v63  ;;  %6105 = vmatpush3.bf16.msra.mxu1 (!%p5879_p13), %v7039_v56  ;;  %v7043_v60 = vld [vmem:[#allocation9 + $0x98] sm:$0xff] (!%p5879_p13)   ;;  %v7046_v63 = vld [vmem:[#allocation9 + $0x20] sm:$0xff] (!%p5879_p13)   ;;  %v7080_v56 = vld [vmem:[#allocation9 + $0x168] sm:$0xff] (!%p5879_p13)  }
 0x246   : > { %3190 = vst [vmem:[#allocation2 + $0x28] sm:$0xff] %v3178_v2  ;;  %6106 = vmatprep.subr.bf16.mxu1 (!%p5879_p13), %v7041_v58  ;;  %v7048_v2 = vld [vmem:[#allocation9 + $0x68] sm:$0xff] (!%p5879_p13)   ;;  %v7077_v52 = vld [vmem:[#allocation9 + $0x1e0] sm:$0xff] (!%p5879_p13)  }
 0x247   : > { %6085 = vmatpush3.bf16.msra.mxu0 (!%p5879_p13), %v7042_v59  ;;  %v7078_v54 = vld [vmem:[#allocation9 + $0x120] sm:$0xff] (!%p5879_p13)   ;;  %v7081_v57 = vld [vmem:[#allocation9 + $0x1e8] sm:$0xff] (!%p5879_p13)  }
 0x248   : > { %6086 = vmatprep.subr.bf16.mxu0 (!%p5879_p13), %v7044_v61  ;;  %v7079_v55 = vld [vmem:[#allocation9 + $0x1a0] sm:$0xff] (!%p5879_p13)   ;;  %v7082_v58 = vld [vmem:[#allocation9 + $0x128] sm:$0xff] (!%p5879_p13)  }
 0x249   : > { %6107 = vmatpush3.bf16.msra.mxu1 (!%p5879_p13), %v7043_v60  ;;  %v7083_v60 = vld [vmem:[#allocation9 + $0x1a8] sm:$0xff] (!%p5879_p13)  }
 0x24a   : > { %6108 = vmatprep.subr.bf16.mxu1 (!%p5879_p13), %v7045_v62  ;;  %v7084_v62 = vld [vmem:[#allocation9 + $0x170] sm:$0xff] (!%p5879_p13)  }
 0x24b   : > { %6087 = vmatpush3.bf16.msra.mxu0 (!%p5879_p13), %v7046_v63 }
 0x24c   : > { %6088 = vmatprep.subr.bf16.mxu0 (!%p5879_p13), %v7048_v2  ;;  %v7086_v2 = vld [vmem:[#allocation9 + $0x130] sm:$0xff] (!%p5879_p13)  }
 0x24d   : > { %6109 = vmatpush3.bf16.msra.mxu1 (!%p5879_p13), %v7047_v1 }
 0x27f   : > { %v2961_v3 = vpop.f32.mrb[12].mxu0 }
 0x280   : > { %v3002_v4 = vpop.f32.mrb[12].mxu1  ;;  %v2963_v5 = vpop.f32.mrb[13].mxu0 }
 0x281   : > { %v3003_v8 = vadd.f32 %v3002_v4, %v2961_v3  ;;  %v3004_v9 = vpop.f32.mrb[13].mxu1  ;;  %v2965_v11 = vpop.f32.mrb[14].mxu0  ;;  %v7049_v3 = vld [vmem:[#allocation9 + $0xe8] sm:$0xff] (!%p5879_p13)   ;;  %v8165_v4 = vshrl.u32 (!%p5879_p13), %v3217_v0, 7  ;;  %v7085_v0 = vld [vmem:[#allocation9 + $0x1f0] sm:$0xff] (!%p5879_p13)  }
 0x282   : > { %v3005_v10 = vadd.f32 %v3004_v9, %v2963_v5  ;;  %v3006_v12 = vpop.f32.mrb[14].mxu1  ;;  %v2966_v14 = vpop.f32.mrb[15].mxu0  ;;  %6110 = vmatprep.subr.bf16.mxu1 (!%p5879_p13), %v7049_v3  ;;  %v7052_v5 = vld [vmem:[#allocation9 + $0x70] sm:$0xff] (!%p5879_p13)  }
 0x283   : > { %v3179_v13 = vadd.f32 %v3003_v8, %v355_v7  ;;  %v3007_v15 = vpop.f32.mrb[15].mxu1  ;;  %v7050_v7 = vld [vmem:[#allocation9 + $0x28] sm:$0xff] (!%p5879_p13)   ;;  %v7054_v9 = vld [vmem:[#allocation9 + $0x30] sm:$0xff] (!%p5879_p13)   ;;  %v3231_v12 = vsub.s32 (!%p5879_p13), 3, %v8165_v4  ;;  %v3219_v14 = vsub.s32 (!%p5879_p13), 0, %v8165_v4  ;;  %v3239_v59 = vsub.s32 (!%p5879_p13), 5, %v8165_v4 }
 0x284   : > { %v3180_v16 = vadd.f32 %v3005_v10, %v356_v6  ;;  %v7051_v8 = vld [vmem:[#allocation9 + $0xa8] sm:$0xff] (!%p5879_p13)   ;;  %6089 = vmatpush3.bf16.msra.mxu0 (!%p5879_p13), %v7050_v7  ;;  %v7053_v6 = vld [vmem:[#allocation9 + $0xf0] sm:$0xff] (!%p5879_p13)   ;;  %v3223_v10 = vsub.s32 (!%p5879_p13), 1, %v8165_v4  ;;  %v7057_v15 = vld [vmem:[#allocation9 + $0xf8] sm:$0xff] (!%p5879_p13)   ;;  %v3247_v61 = vsub.s32 (!%p5879_p13), 7, %v8165_v4  ;;  %v3235_v63 = vsub.s32 (!%p5879_p13), 4, %v8165_v4 }
 0x285   : > { %3191 = vst [vmem:[#allocation2 + $0x30] sm:$0xff] %v3179_v13  ;;  %6111 = vmatpush3.bf16.msra.mxu1 (!%p5879_p13), %v7051_v8  ;;  %6090 = vmatprep.subr.bf16.mxu0 (!%p5879_p13), %v7052_v5  ;;  %v7055_v11 = vld [vmem:[#allocation9 + $0xb0] sm:$0xff] (!%p5879_p13)   ;;  %v7056_v13 = vld [vmem:[#allocation9 + $0x78] sm:$0xff] (!%p5879_p13)   ;;  %v3243_v1 = vsub.s32 (!%p5879_p13), 6, %v8165_v4 }
 0x286   : > { %3192 = vst [vmem:[#allocation2 + $0x38] sm:$0xff] %v3180_v16  ;;  %6112 = vmatprep.subr.bf16.mxu1 (!%p5879_p13), %v7053_v6  ;;  %v3227_v16 = vsub.s32 (!%p5879_p13), 2, %v8165_v4  ;;  %v7087_v3 = vld [vmem:[#allocation9 + $0x1b0] sm:$0xff] (!%p5879_p13)   ;;  %v7088_v7 = vld [vmem:[#allocation9 + $0x178] sm:$0xff] (!%p5879_p13)  }
 0x287   : > { %v7089_v5 = vld [vmem:[#allocation9 + $0x1f8] sm:$0xff] (!%p5879_p13)  }
 0x288   : > { %6091 = vmatpush3.bf16.msra.mxu0 (!%p5879_p13), %v7054_v9 }
 0x289   : > { %6113 = vmatpush3.bf16.msra.mxu1 (!%p5879_p13), %v7055_v11  ;;  %6092 = vmatprep.subr.bf16.mxu0 (!%p5879_p13), %v7056_v13  ;;  %v7090_v13 = vld [vmem:[#allocation9 + $0x138] sm:$0xff] (!%p5879_p13)  }
 0x28a   : > { %6114 = vmatprep.subr.bf16.mxu1 (!%p5879_p13), %v7057_v15  ;;  %v7091_v15 = vld [vmem:[#allocation9 + $0x1b8] sm:$0xff] (!%p5879_p13)  }
 0x2bf   : > { %v3043_v17 = vpop.f32.mrb[16].mxu0 }
 0x2c0   : > { %v3084_v19 = vpop.f32.mrb[16].mxu1  ;;  %v3045_v21 = vpop.f32.mrb[17].mxu0 }
 0x2c1   : > { %v3085_v20 = vadd.f32 %v3084_v19, %v3043_v17  ;;  %v3086_v23 = vpop.f32.mrb[17].mxu1  ;;  %v3047_v25 = vpop.f32.mrb[18].mxu0  ;;  %v7058_v17 = vld [vmem:[#allocation9 + $0x38] sm:$0xff] (!%p5879_p13)  }
 0x2c2   : > { %v3087_v24 = vadd.f32 %v3086_v23, %v3045_v21  ;;  %v3088_v26 = vpop.f32.mrb[18].mxu1  ;;  %v3048_v28 = vpop.f32.mrb[19].mxu0  ;;  %6093 = vmatpush3.bf16.msra.mxu0 (!%p5879_p13), %v7058_v17  ;;  %v3202_v19 = vld [vmem:[#allocation2 + $0x8] sm:$0xff] (!%p5879_p13)  ;;  %v3204_v21 = vld [vmem:[#allocation2 + $0x18] sm:$0xff] (!%p5879_p13) }
 0x2c3   : > { %v3181_v27 = vadd.f32 %v3085_v20, %v357_v18  ;;  %v3089_v29 = vpop.f32.mrb[19].mxu1  ;;  %v7059_v18 = vld [vmem:[#allocation9 + $0xb8] sm:$0xff] (!%p5879_p13)   ;;  %v3203_v26 = vld [vmem:[#allocation2 + $0x10] sm:$0xff] (!%p5879_p13) }
 0x2c4   : > { %v3182_v30 = vadd.f32 %v3087_v24, %v358_v22  ;;  %v8171_v20 = vld [vmem:[#allocation8] sm:$0xff] (!%p5879_p13)  ;;  %6115 = vmatpush3.bf16.msra.mxu1 (!%p5879_p13), %v7059_v18  ;;  %v7060_v28 = vld [vmem:[#allocation9 + $0x140] sm:$0xff] (!%p5879_p13)  }
 0x2c5   : > { %3193 = vst [vmem:[#allocation2 + $0x40] sm:$0xff] %v3181_v27  ;;  %v3224_v22 = vrot.slane (!%p5879_p13), %v8171_v20, %v3223_v10  ;;  %v3232_v23 = vrot.slane (!%p5879_p13), %v8171_v20, %v3231_v12  ;;  %v3201_v24 = vld [vmem:[#allocation2] sm:$0xff] (!%p5879_p13)  ;;  %v3220_v25 = vrot.slane (!%p5879_p13), %v8171_v20, %v3219_v14  ;;  %v3228_v27 = vrot.slane (!%p5879_p13), %v8171_v20, %v3227_v16  ;;  %v3206_v17 = vld [vmem:[#allocation2 + $0x28] sm:$0xff] (!%p5879_p13) }
 0x2c6   : > { %3194 = vst [vmem:[#allocation2 + $0x48] sm:$0xff] %v3182_v30  ;;  %6122 = vmatprep.subr.bf16.mxu0 (!%p5879_p13), %v7060_v28  ;;  %v3240_v8 = vrot.slane (!%p5879_p13), %v8171_v20, %v3239_v59  ;;  %v3248_v6 = vrot.slane (!%p5879_p13), %v8171_v20, %v3247_v61  ;;  %v3236_v9 = vrot.slane (!%p5879_p13), %v8171_v20, %v3235_v63  ;;  %v7118_v59 = vld [vmem:[#allocation9 + $0x230] sm:$0xff] (!%p5879_p13)   ;;  %v7120_v61 = vld [vmem:[#allocation9 + $0x278] sm:$0xff] (!%p5879_p13)  }
 0x2c7   : > { %v8185_v29 = vadd.f32 (!%p5879_p13), %v3224_v22, %v3202_v19  ;;  %v8187_v30 = vadd.f32 (!%p5879_p13), %v3232_v23, %v3204_v21  ;;  %v3244_v11 = vrot.slane (!%p5879_p13), %v8171_v20, %v3243_v1  ;;  %v3208_v19 = vld [vmem:[#allocation2 + $0x38] sm:$0xff] (!%p5879_p13)  ;;  %v3205_v21 = vld [vmem:[#allocation2 + $0x20] sm:$0xff] (!%p5879_p13)  ;;  %v3207_v22 = vld [vmem:[#allocation2 + $0x30] sm:$0xff] (!%p5879_p13) }
 0x2c8   : > { %v8209_v18 = vadd.f32 (!%p5879_p13), %v3240_v8, %v3206_v17  ;;  %v8211_v23 = vadd.f32 (!%p5879_p13), %v3248_v6, %v3208_v19  ;;  %v7122_v63 = vld [vmem:[#allocation9 + $0x238] sm:$0xff] (!%p5879_p13)  }
 0x2c9   : > { %v3302_v1 = vmax.f32 (!%p5879_p13), %v8185_v29, 0.0 }
 0x2ca   : > { %v3294_v20 = vpack.c.bf16 (!%p5879_p13), %v8209_v18, %v8209_v18  ;;  %v3296_v28 = vpack.c.bf16 (!%p5879_p13), %v8211_v23, %v8211_v23 }
 0x2cc   : > { %v3209_v6 = vld [vmem:[#allocation2 + $0x40] sm:$0xff] (!%p5879_p13) }
 0x2ff   : > { %v3125_v31 = vpop.f32.mrb[20].mxu0 }
 0x300   : > { %v3166_v33 = vpop.f32.mrb[20].mxu1  ;;  %v3127_v35 = vpop.f32.mrb[21].mxu0  ;;  %3200 = sbr.rel (%p5879_p13) target bundleno = 1153 (0x481), region = 68 }
 0x301   : > { %v3167_v34 = vadd.f32 %v3166_v33, %v3125_v31  ;;  %v3168_v37 = vpop.f32.mrb[21].mxu1  ;;  %v3129_v39 = vpop.f32.mrb[22].mxu0  ;;  %v8189_v31 = vadd.f32 (!%p5879_p13), %v3220_v25, %v3201_v24  ;;  %v7061_v33 = vld [vmem:[#allocation9 + $0x1c0] sm:$0xff] (!%p5879_p13)   ;;  %v8213_v24 = vadd.f32 (!%p5879_p13), %v3236_v9, %v3205_v21  ;;  %v8215_v25 = vadd.f32 (!%p5879_p13), %v3244_v11, %v3207_v22 }
 0x302   : > { %v3169_v38 = vadd.f32 %v3168_v37, %v3127_v35  ;;  %v3170_v40 = vpop.f32.mrb[22].mxu1  ;;  %v3130_v42 = vpop.f32.mrb[23].mxu0  ;;  %v3290_v35 = vpack.c.bf16 (!%p5879_p13), %v8185_v29, %v8185_v29  ;;  %6144 = vmatprep.subr.bf16.mxu1 (!%p5879_p13), %v7061_v33  ;;  %v7063_v37 = vld [vmem:[#allocation9 + $0x180] sm:$0xff] (!%p5879_p13)  }
 0x303   : > { %v3183_v41 = vadd.f32 %v3167_v34, %v359_v32  ;;  %v3171_v43 = vpop.f32.mrb[23].mxu1  ;;  %v8191_v32 = vadd.f32 (!%p5879_p13), %v3228_v27, %v3203_v26  ;;  %v7062_v34 = vld [vmem:[#allocation9 + $0x100] sm:$0xff] (!%p5879_p13)   ;;  %v3289_v39 = vpack.c.bf16 (!%p5879_p13), %v8189_v31, %v8189_v31  ;;  %v7066_v42 = vld [vmem:[#allocation9 + $0x108] sm:$0xff] (!%p5879_p13)   ;;  %v3293_v33 = vpack.c.bf16 (!%p5879_p13), %v8213_v24, %v8213_v24 }
 0x304   : > { %v3184_v44 = vadd.f32 %v3169_v38, %v360_v36  ;;  %v3292_v36 = vpack.c.bf16 (!%p5879_p13), %v8187_v30, %v8187_v30  ;;  %v7064_v38 = vld [vmem:[#allocation9 + $0x148] sm:$0xff] (!%p5879_p13)   ;;  %4900 = vmatprep.mubr.bf16.mxu0 (!%p5879_p13), %v3290_v35  ;;  %v7092_v26 = vld [vmem:[#allocation9 + $0x240] sm:$0xff] (!%p5879_p13)  }
 0x305   : > { %3195 = vst [vmem:[#allocation2 + $0x50] sm:$0xff] %v3183_v41  ;;  %v3291_v40 = vpack.c.bf16 (!%p5879_p13), %v8191_v32, %v8191_v32  ;;  %v7065_v41 = vld [vmem:[#allocation9 + $0x1c8] sm:$0xff] (!%p5879_p13)   ;;  %4901 = vmatmul.mubr.bf16.vlgmr.msra.gmra.mrb[0].mxu0 (!%p5879_p13), %v3289_v39  ;;  %v7093_v27 = vld [vmem:[#allocation9 + $0x2c0] sm:$0xff] (!%p5879_p13)  }
 0x306   : > { %3196 = vst [vmem:[#allocation2 + $0x58] sm:$0xff] %v3184_v44  ;;  %4940 = vmatprep.mubr.bf16.mxu1 (!%p5879_p13), %v3292_v36  ;;  %6123 = vmatpush3.bf16.msra.mxu0 (!%p5879_p13), %v7062_v34  ;;  %v7067_v43 = vld [vmem:[#allocation9 + $0x188] sm:$0xff] (!%p5879_p13)   ;;  %v7068_v44 = vld [vmem:[#allocation9 + $0x150] sm:$0xff] (!%p5879_p13)   ;;  %v3295_v34 = vpack.c.bf16 (!%p5879_p13), %v8215_v25, %v8215_v25  ;;  %v7094_v35 = vld [vmem:[#allocation9 + $0x200] sm:$0xff] (!%p5879_p13)  }
 0x307   : > { %4941 = vmatmul.mubr.bf16.vlgmr.msra.gmra.mrb[0].mxu1 %v3291_v40  ;;  %6124 = vmatprep.subr.bf16.mxu0 %v7064_v38  ;;  %v7095_v36 = vld [vmem:[#allocation9 + $0x280] sm:$0xff]   ;;  %v7097_v38 = vld [vmem:[#allocation9 + $0x2c8] sm:$0xff]  }
 0x308   : > { %6145 = vmatpush3.bf16.msra.mxu1 %v7063_v37  ;;  %4980 = vmatprep.mubr.bf16.mxu0 %v3294_v20  ;;  %v7096_v37 = vld [vmem:[#allocation9 + $0x248] sm:$0xff]   ;;  %v7124_v29 = vld [vmem:[#allocation9 + $0x340] sm:$0xff]  }
 0x309   : > { %6146 = vmatprep.subr.bf16.mxu1 %v7065_v41  ;;  %5020 = vmatprep.mubr.bf16.mxu1 %v3296_v28  ;;  %v7098_v39 = vld [vmem:[#allocation9 + $0x208] sm:$0xff]   ;;  %v7100_v41 = vld [vmem:[#allocation9 + $0x250] sm:$0xff]   ;;  %v7125_v21 = vld [vmem:[#allocation9 + $0x3c0] sm:$0xff]   ;;  %v3314_v28 = vpack.c.bf16 %v3302_v1, %v3302_v1  ;;  %v3308_v1 = vmax.f32 %v8211_v23, 0.0 }
 0x30a   : > { %6125 = vmatpush3.bf16.msra.mxu0 %v7066_v42  ;;  %v7099_v40 = vld [vmem:[#allocation9 + $0x288] sm:$0xff]   ;;  %v7101_v42 = vld [vmem:[#allocation9 + $0x2d0] sm:$0xff]  }
 0x30b   : > { %6126 = vmatprep.subr.bf16.mxu0 %v7068_v44  ;;  %v7103_v44 = vld [vmem:[#allocation9 + $0x290] sm:$0xff]   ;;  %v7128_v20 = vld [vmem:[#allocation9 + $0x348] sm:$0xff]  }
 0x30c   : > { %6147 = vmatpush3.bf16.msra.mxu1 %v7067_v43  ;;  %v7102_v43 = vld [vmem:[#allocation9 + $0x210] sm:$0xff]   ;;  %v3211_v11 = vld [vmem:[#allocation2 + $0x50] sm:$0xff] }
 0x30d   : > { %6148 = vmatprep.subr.bf16.mxu1 %v7069_v45  ;;  %v7104_v45 = vld [vmem:[#allocation9 + $0x258] sm:$0xff]   ;;  %v7164_v23 = vld [vmem:[#allocation9 + $0x450] sm:$0xff]  }
 0x30e   : > { %6127 = vmatpush3.bf16.msra.mxu0 %v7070_v46  ;;  %v7105_v46 = vld [vmem:[#allocation9 + $0x2d8] sm:$0xff]  }
 0x30f   : > { %6128 = vmatprep.subr.bf16.mxu0 %v7072_v49  ;;  %v7107_v49 = vld [vmem:[#allocation9 + $0x298] sm:$0xff]  }
 0x310   : > { %6149 = vmatpush3.bf16.msra.mxu1 %v7071_v47  ;;  %v7106_v47 = vld [vmem:[#allocation9 + $0x218] sm:$0xff]  }
 0x311   : > { %6150 = vmatprep.subr.bf16.mxu1 %v7073_v50  ;;  %v7108_v50 = vld [vmem:[#allocation9 + $0x260] sm:$0xff]  }
 0x312   : > { %6129 = vmatpush3.bf16.msra.mxu0 %v7074_v51  ;;  %v7109_v51 = vld [vmem:[#allocation9 + $0x2e0] sm:$0xff]  }
 0x313   : > { %6130 = vmatprep.subr.bf16.mxu0 %v7076_v48  ;;  %v7111_v48 = vld [vmem:[#allocation9 + $0x2a0] sm:$0xff]  }
 0x314   : > { %6151 = vmatpush3.bf16.msra.mxu1 %v7075_v53  ;;  %v7110_v53 = vld [vmem:[#allocation9 + $0x220] sm:$0xff]  }
 0x315   : > { %6152 = vmatprep.subr.bf16.mxu1 %v7077_v52  ;;  %v7112_v52 = vld [vmem:[#allocation9 + $0x268] sm:$0xff]  }
 0x316   : > { %6131 = vmatpush3.bf16.msra.mxu0 %v7078_v54  ;;  %v7113_v54 = vld [vmem:[#allocation9 + $0x2e8] sm:$0xff]  }
 0x317   : > { %6132 = vmatprep.subr.bf16.mxu0 %v7080_v56  ;;  %v7115_v56 = vld [vmem:[#allocation9 + $0x2a8] sm:$0xff]  }
 0x318   : > { %6153 = vmatpush3.bf16.msra.mxu1 %v7079_v55  ;;  %v7114_v55 = vld [vmem:[#allocation9 + $0x228] sm:$0xff]  }
 0x319   : > { %6154 = vmatprep.subr.bf16.mxu1 %v7081_v57  ;;  %v7116_v57 = vld [vmem:[#allocation9 + $0x270] sm:$0xff]  }
 0x31a   : > { %6133 = vmatpush3.bf16.msra.mxu0 %v7082_v58  ;;  %v7117_v58 = vld [vmem:[#allocation9 + $0x2f0] sm:$0xff]  }
 0x31b   : > { %6134 = vmatprep.subr.bf16.mxu0 %v7084_v62  ;;  %v7121_v62 = vld [vmem:[#allocation9 + $0x2f8] sm:$0xff]  }
 0x31c   : > { %6155 = vmatpush3.bf16.msra.mxu1 %v7083_v60  ;;  %v7119_v60 = vld [vmem:[#allocation9 + $0x2b0] sm:$0xff]  }
 0x31d   : > { %6156 = vmatprep.subr.bf16.mxu1 %v7085_v0  ;;  %v7123_v0 = vld [vmem:[#allocation9 + $0x2b8] sm:$0xff]  }
 0x31e   : > { %6135 = vmatpush3.bf16.msra.mxu0 %v7086_v2  ;;  %v3210_v2 = vld [vmem:[#allocation2 + $0x48] sm:$0xff] }
 0x31f   : > { %6136 = vmatprep.subr.bf16.mxu0 %v7088_v7  ;;  %v3212_v7 = vld [vmem:[#allocation2 + $0x58] sm:$0xff] }
 0x320   : > { %6157 = vmatpush3.bf16.msra.mxu1 %v7087_v3  ;;  %v3214_v3 = vld [vmem:[#allocation8 + $0x8] sm:$0xf] }
 0x321   : > { %6158 = vmatprep.subr.bf16.mxu1 %v7089_v5  ;;  %v3256_v8 = vrot.slane %v3214_v3, %v3223_v10  ;;  %v3264_v5 = vrot.slane %v3214_v3, %v3231_v12  ;;  %v3252_v9 = vrot.slane %v3214_v3, %v3219_v14  ;;  %v7126_v14 = vld [vmem:[#allocation9 + $0x300] sm:$0xff]  }
 0x322   : > { %6137 = vmatpush3.bf16.msra.mxu0 %v7090_v13  ;;  %v3260_v13 = vrot.slane %v3214_v3, %v3227_v16 }
 0x323   : > { %6166 = vmatprep.subr.bf16.mxu0 %v7092_v26  ;;  %v8235_v17 = vadd.f32 %v3256_v8, %v3210_v2  ;;  %v8237_v19 = vadd.f32 %v3264_v5, %v3212_v7  ;;  %v8239_v10 = vadd.f32 %v3252_v9, %v3209_v6  ;;  %v7127_v26 = vld [vmem:[#allocation9 + $0x380] sm:$0xff]   ;;  %v7161_v8 = vld [vmem:[#allocation9 + $0x4c8] sm:$0xff]   ;;  %v3320_v6 = vpack.c.bf16 %v3308_v1, %v3308_v1 }
 0x324   : > { %6159 = vmatpush3.bf16.msra.mxu1 %v7091_v15  ;;  %v3304_v15 = vmax.f32 %v8187_v30, 0.0  ;;  %v8241_v12 = vadd.f32 %v3260_v13, %v3211_v11  ;;  %v7158_v7 = vld [vmem:[#allocation9 + $0x400] sm:$0xff]   ;;  %v7162_v9 = vld [vmem:[#allocation9 + $0x408] sm:$0xff]   ;;  %v7165_v11 = vld [vmem:[#allocation9 + $0x4d0] sm:$0xff]  }
 0x325   : > { %6188 = vmatprep.subr.bf16.mxu1 %v7093_v27  ;;  %4981 = vmatmul.mubr.bf16.vlgmr.msra.gmra.mrb[4].mxu0 %v3293_v33  ;;  %v3298_v4 = vpack.c.bf16 %v8235_v17, %v8235_v17  ;;  %v3300_v16 = vpack.c.bf16 %v8237_v19, %v8237_v19  ;;  %v3297_v30 = vpack.c.bf16 %v8239_v10, %v8239_v10  ;;  %v7129_v27 = vld [vmem:[#allocation9 + $0x3c8] sm:$0xff]   ;;  %v7166_v13 = vld [vmem:[#allocation9 + $0x410] sm:$0xff]   ;;  %v7207_v1 = vld [vmem:[#allocation9 + $0x5a0] sm:$0xff]  }
 0x326   : > { %6167 = vmatpush3.bf16.msra.mxu0 %v7094_v35  ;;  %v3299_v22 = vpack.c.bf16 %v8241_v12, %v8241_v12  ;;  %v3316_v33 = vpack.c.bf16 %v3304_v15, %v3304_v15  ;;  %v7131_v35 = vld [vmem:[#allocation9 + $0x388] sm:$0xff]   ;;  %v7167_v15 = vld [vmem:[#allocation9 + $0x490] sm:$0xff]  }
 0x327   : > { %5021 = vmatmul.mubr.bf16.vlgmr.msra.gmra.mrb[4].mxu1 %v3295_v34  ;;  %6168 = vmatprep.subr.bf16.mxu0 %v7096_v37  ;;  %v7130_v34 = vld [vmem:[#allocation9 + $0x308] sm:$0xff]   ;;  %v7133_v37 = vld [vmem:[#allocation9 + $0x3d0] sm:$0xff]  }
 0x328   : > { %6189 = vmatpush3.bf16.msra.mxu1 %v7095_v36  ;;  %5060 = vmatprep.mubr.bf16.mxu0 %v3298_v4  ;;  %v7132_v36 = vld [vmem:[#allocation9 + $0x350] sm:$0xff]   ;;  %v7171_v4 = vld [vmem:[#allocation9 + $0x498] sm:$0xff]  }
 0x329   : > { %6190 = vmatprep.subr.bf16.mxu1 %v7097_v38  ;;  %5100 = vmatprep.mubr.bf16.mxu1 %v3300_v16  ;;  %v7134_v38 = vld [vmem:[#allocation9 + $0x310] sm:$0xff]   ;;  %v7172_v16 = vld [vmem:[#allocation9 + $0x460] sm:$0xff]  }
 0x32a   : > { %6169 = vmatpush3.bf16.msra.mxu0 %v7098_v39  ;;  %v7135_v39 = vld [vmem:[#allocation9 + $0x390] sm:$0xff]  }
 0x32b   : > { %6170 = vmatprep.subr.bf16.mxu0 %v7100_v41  ;;  %v7137_v41 = vld [vmem:[#allocation9 + $0x3d8] sm:$0xff]  }
 0x32c   : > { %6191 = vmatpush3.bf16.msra.mxu1 %v7099_v40  ;;  %v7136_v40 = vld [vmem:[#allocation9 + $0x358] sm:$0xff]  }
 0x32d   : > { %6192 = vmatprep.subr.bf16.mxu1 %v7101_v42  ;;  %v7138_v42 = vld [vmem:[#allocation9 + $0x318] sm:$0xff]  }
 0x32e   : > { %6171 = vmatpush3.bf16.msra.mxu0 %v7102_v43  ;;  %v7139_v43 = vld [vmem:[#allocation9 + $0x398] sm:$0xff]  }
 0x32f   : > { %6172 = vmatprep.subr.bf16.mxu0 %v7104_v45  ;;  %v7141_v45 = vld [vmem:[#allocation9 + $0x3e0] sm:$0xff]  }
 0x330   : > { %6193 = vmatpush3.bf16.msra.mxu1 %v7103_v44  ;;  %v7140_v44 = vld [vmem:[#allocation9 + $0x360] sm:$0xff]  }
 0x331   : > { %6194 = vmatprep.subr.bf16.mxu1 %v7105_v46  ;;  %v7142_v46 = vld [vmem:[#allocation9 + $0x320] sm:$0xff]  }
 0x332   : > { %6173 = vmatpush3.bf16.msra.mxu0 %v7106_v47  ;;  %v7143_v47 = vld [vmem:[#allocation9 + $0x3a0] sm:$0xff]  }
 0x333   : > { %6174 = vmatprep.subr.bf16.mxu0 %v7108_v50  ;;  %v7145_v50 = vld [vmem:[#allocation9 + $0x3e8] sm:$0xff]  }
 0x334   : > { %6195 = vmatpush3.bf16.msra.mxu1 %v7107_v49  ;;  %v7144_v49 = vld [vmem:[#allocation9 + $0x368] sm:$0xff]  }
 0x335   : > { %6196 = vmatprep.subr.bf16.mxu1 %v7109_v51  ;;  %v7146_v51 = vld [vmem:[#allocation9 + $0x328] sm:$0xff]  }
 0x336   : > { %6175 = vmatpush3.bf16.msra.mxu0 %v7110_v53  ;;  %v7147_v53 = vld [vmem:[#allocation9 + $0x3a8] sm:$0xff]  }
 0x337   : > { %6176 = vmatprep.subr.bf16.mxu0 %v7112_v52  ;;  %v7149_v52 = vld [vmem:[#allocation9 + $0x3f0] sm:$0xff]  }
 0x338   : > { %6197 = vmatpush3.bf16.msra.mxu1 %v7111_v48  ;;  %v7148_v48 = vld [vmem:[#allocation9 + $0x370] sm:$0xff]  }
 0x339   : > { %6198 = vmatprep.subr.bf16.mxu1 %v7113_v54  ;;  %v7150_v54 = vld [vmem:[#allocation9 + $0x330] sm:$0xff]  }
 0x33a   : > { %6177 = vmatpush3.bf16.msra.mxu0 %v7114_v55  ;;  %v7151_v55 = vld [vmem:[#allocation9 + $0x3b0] sm:$0xff]  }
 0x33b   : > { %6178 = vmatprep.subr.bf16.mxu0 %v7116_v57  ;;  %v7153_v57 = vld [vmem:[#allocation9 + $0x3f8] sm:$0xff]  }
 0x33c   : > { %6199 = vmatpush3.bf16.msra.mxu1 %v7115_v56  ;;  %v7152_v56 = vld [vmem:[#allocation9 + $0x378] sm:$0xff]  }
 0x33d   : > { %6200 = vmatprep.subr.bf16.mxu1 %v7117_v58  ;;  %v3301_v58 = vmax.f32 %v8189_v31, 0.0  ;;  %v7159_v31 = vld [vmem:[#allocation9 + $0x480] sm:$0xff]  }
 0x33e   : > { %6179 = vmatpush3.bf16.msra.mxu0 %v7118_v59  ;;  %v7154_v59 = vld [vmem:[#allocation9 + $0x338] sm:$0xff]  }
 0x33f   : > { %6180 = vmatprep.subr.bf16.mxu0 %v7120_v61  ;;  %v7155_v61 = vld [vmem:[#allocation9 + $0x3b8] sm:$0xff]   ;;  %v3313_v2 = vpack.c.bf16 %v3301_v58, %v3301_v58 }
 0x340   : > { %6201 = vmatpush3.bf16.msra.mxu1 %v7119_v60  ;;  %v3303_v60 = vmax.f32 %v8191_v32, 0.0  ;;  %v7160_v32 = vld [vmem:[#allocation9 + $0x448] sm:$0xff]   ;;  %v7200_v58 = vld [vmem:[#allocation9 + $0x558] sm:$0xff]  }
 0x341   : > { %6202 = vmatprep.subr.bf16.mxu1 %v7121_v62  ;;  %v7156_v62 = vld [vmem:[#allocation9 + $0x440] sm:$0xff]  }
 0x342   : > { %6181 = vmatpush3.bf16.msra.mxu0 %v7122_v63  ;;  %v3306_v63 = vmax.f32 %v8209_v18, 0.0  ;;  %v3315_v3 = vpack.c.bf16 %v3303_v60, %v3303_v60  ;;  %v7163_v18 = vld [vmem:[#allocation9 + $0x488] sm:$0xff]   ;;  %v7202_v60 = vld [vmem:[#allocation9 + $0x518] sm:$0xff]  }
 0x343   : > { %6210 = vmatprep.subr.bf16.mxu0 %v7124_v29  ;;  %v7168_v29 = vld [vmem:[#allocation9 + $0x458] sm:$0xff]  }
 0x344   : > { %6203 = vmatpush3.bf16.msra.mxu1 %v7123_v0  ;;  %v7157_v0 = vld [vmem:[#allocation9 + $0x4c0] sm:$0xff]   ;;  %v3318_v5 = vpack.c.bf16 %v3306_v63, %v3306_v63 }
 0x345   : > { %6232 = vmatprep.subr.bf16.mxu1 %v7125_v21  ;;  %5061 = vmatmul.mubr.bf16.vlgmr.msra.gmra.mrb[8].mxu0 %v3297_v30  ;;  %v7169_v21 = vld [vmem:[#allocation9 + $0x4d8] sm:$0xff]   ;;  %v7173_v30 = vld [vmem:[#allocation9 + $0x4e0] sm:$0xff]  }
 0x346   : > { %6211 = vmatpush3.bf16.msra.mxu0 %v7126_v14  ;;  %5140 = vmatprep.mubr.bf16.mxu0 %v3314_v28  ;;  %v7170_v14 = vld [vmem:[#allocation9 + $0x418] sm:$0xff]   ;;  %v7178_v28 = vld [vmem:[#allocation9 + $0x428] sm:$0xff]   ;;  %v7205_v63 = vld [vmem:[#allocation9 + $0x5e0] sm:$0xff]  }
 0x347   : > { %5101 = vmatmul.mubr.bf16.vlgmr.msra.gmra.mrb[8].mxu1 %v3299_v22  ;;  %6212 = vmatprep.subr.bf16.mxu0 %v7128_v20  ;;  %v7174_v22 = vld [vmem:[#allocation9 + $0x420] sm:$0xff]   ;;  %v7176_v20 = vld [vmem:[#allocation9 + $0x468] sm:$0xff]  }
 0x348   : > { %6233 = vmatpush3.bf16.msra.mxu1 %v7127_v26  ;;  %5180 = vmatprep.mubr.bf16.mxu1 %v3316_v33  ;;  %v7175_v26 = vld [vmem:[#allocation9 + $0x4a0] sm:$0xff]   ;;  %v7179_v33 = vld [vmem:[#allocation9 + $0x4a8] sm:$0xff]  }
 0x349   : > { %6234 = vmatprep.subr.bf16.mxu1 %v7129_v27  ;;  %v7177_v27 = vld [vmem:[#allocation9 + $0x4e8] sm:$0xff]  }
 0x34a   : > { %6213 = vmatpush3.bf16.msra.mxu0 %v7130_v34  ;;  %v7180_v34 = vld [vmem:[#allocation9 + $0x470] sm:$0xff]  }
 0x34b   : > { %6214 = vmatprep.subr.bf16.mxu0 %v7132_v36  ;;  %v7182_v36 = vld [vmem:[#allocation9 + $0x430] sm:$0xff]  }
 0x34c   : > { %6235 = vmatpush3.bf16.msra.mxu1 %v7131_v35  ;;  %v7181_v35 = vld [vmem:[#allocation9 + $0x4f0] sm:$0xff]  }
 0x34d   : > { %6236 = vmatprep.subr.bf16.mxu1 %v7133_v37  ;;  %v7183_v37 = vld [vmem:[#allocation9 + $0x4b0] sm:$0xff]  }
 0x34e   : > { %6215 = vmatpush3.bf16.msra.mxu0 %v7134_v38  ;;  %v7184_v38 = vld [vmem:[#allocation9 + $0x478] sm:$0xff]  }
 0x34f   : > { %6216 = vmatprep.subr.bf16.mxu0 %v7136_v40  ;;  %v3305_v40 = vmax.f32 %v8213_v24, 0.0  ;;  %v7191_v24 = vld [vmem:[#allocation9 + $0x580] sm:$0xff]  }
 0x350   : > { %6237 = vmatpush3.bf16.msra.mxu1 %v7135_v39  ;;  %v7185_v39 = vld [vmem:[#allocation9 + $0x4f8] sm:$0xff]  }
 0x351   : > { %6238 = vmatprep.subr.bf16.mxu1 %v7137_v41  ;;  %v7186_v41 = vld [vmem:[#allocation9 + $0x438] sm:$0xff]  }
 0x352   : > { %6217 = vmatpush3.bf16.msra.mxu0 %v7138_v42  ;;  %v3307_v42 = vmax.f32 %v8215_v25, 0.0  ;;  %v7192_v25 = vld [vmem:[#allocation9 + $0x548] sm:$0xff]  }
 0x353   : > { %6218 = vmatprep.subr.bf16.mxu0 %v7140_v44  ;;  %v7188_v44 = vld [vmem:[#allocation9 + $0x540] sm:$0xff]  }
 0x354   : > { %6239 = vmatpush3.bf16.msra.mxu1 %v7139_v43  ;;  %v7187_v43 = vld [vmem:[#allocation9 + $0x4b8] sm:$0xff]  }
 0x355   : > { %6240 = vmatprep.subr.bf16.mxu1 %v7141_v45  ;;  %v3310_v45 = vmax.f32 %v8235_v17, 0.0  ;;  %v7195_v17 = vld [vmem:[#allocation9 + $0x588] sm:$0xff]  }
 0x356   : > { %6219 = vmatpush3.bf16.msra.mxu0 %v7142_v46  ;;  %v7189_v46 = vld [vmem:[#allocation9 + $0x5c0] sm:$0xff]  }
 0x357   : > { %6220 = vmatprep.subr.bf16.mxu0 %v7144_v49  ;;  %v3317_v49 = vpack.c.bf16 %v3305_v40, %v3305_v40 }
 0x358   : > { %6241 = vmatpush3.bf16.msra.mxu1 %v7143_v47  ;;  %v3312_v47 = vmax.f32 %v8237_v19, 0.0  ;;  %v7196_v19 = vld [vmem:[#allocation9 + $0x550] sm:$0xff]  }
 0x359   : > { %6242 = vmatprep.subr.bf16.mxu1 %v7145_v50  ;;  %v3319_v50 = vpack.c.bf16 %v3307_v42, %v3307_v42 }
 0x35a   : > { %6221 = vmatpush3.bf16.msra.mxu0 %v7146_v51  ;;  %v7190_v51 = vld [vmem:[#allocation9 + $0x500] sm:$0xff]  }
 0x35b   : > { %6222 = vmatprep.subr.bf16.mxu0 %v7148_v48  ;;  %v3322_v48 = vpack.c.bf16 %v3310_v45, %v3310_v45 }
 0x35c   : > { %6243 = vmatpush3.bf16.msra.mxu1 %v7147_v53  ;;  %v7193_v53 = vld [vmem:[#allocation9 + $0x5c8] sm:$0xff]  }
 0x35d   : > { %6244 = vmatprep.subr.bf16.mxu1 %v7149_v52  ;;  %v3324_v52 = vpack.c.bf16 %v3312_v47, %v3312_v47 }
 0x35e   : > { %6223 = vmatpush3.bf16.msra.mxu0 %v7150_v54  ;;  %v7194_v54 = vld [vmem:[#allocation9 + $0x508] sm:$0xff]  }
 0x35f   : > { %6224 = vmatprep.subr.bf16.mxu0 %v7152_v56  ;;  %v7198_v56 = vld [vmem:[#allocation9 + $0x510] sm:$0xff]  }
 0x360   : > { %6245 = vmatpush3.bf16.msra.mxu1 %v7151_v55  ;;  %v7197_v55 = vld [vmem:[#allocation9 + $0x5d0] sm:$0xff]  }
 0x361   : > { %6246 = vmatprep.subr.bf16.mxu1 %v7153_v57  ;;  %v7199_v57 = vld [vmem:[#allocation9 + $0x590] sm:$0xff]  }
 0x362   : > { %6225 = vmatpush3.bf16.msra.mxu0 %v7154_v59  ;;  %v7201_v59 = vld [vmem:[#allocation9 + $0x5d8] sm:$0xff]  }
 0x363   : > { %6254 = vmatprep.subr.bf16.mxu0 %v7156_v62  ;;  %v7204_v62 = vld [vmem:[#allocation9 + $0x560] sm:$0xff]  }
 0x364   : > { %6247 = vmatpush3.bf16.msra.mxu1 %v7155_v61  ;;  %v7203_v61 = vld [vmem:[#allocation9 + $0x598] sm:$0xff]  }
 0x365   : > { %6276 = vmatprep.subr.bf16.mxu1 %v7157_v0  ;;  %5141 = vmatmul.mubr.bf16.vlgmr.msra.gmra.mrb[12].mxu0 %v3313_v2  ;;  %v7206_v0 = vld [vmem:[#allocation9 + $0x520] sm:$0xff]   ;;  %v7208_v2 = vld [vmem:[#allocation9 + $0x568] sm:$0xff]  }
 0x366   : > { %6255 = vmatpush3.bf16.msra.mxu0 %v7158_v7  ;;  %5220 = vmatprep.mubr.bf16.mxu0 %v3318_v5  ;;  %v7210_v7 = vld [vmem:[#allocation9 + $0x528] sm:$0xff]   ;;  %v7214_v5 = vld [vmem:[#allocation9 + $0x530] sm:$0xff]  }
 0x367   : > { %5181 = vmatmul.mubr.bf16.vlgmr.msra.gmra.mrb[12].mxu1 %v3315_v3  ;;  %6256 = vmatprep.subr.bf16.mxu0 %v7160_v32  ;;  %v7209_v3 = vld [vmem:[#allocation9 + $0x5e8] sm:$0xff]   ;;  %v7212_v32 = vld [vmem:[#allocation9 + $0x570] sm:$0xff]  }
 0x368   : > { %6277 = vmatpush3.bf16.msra.mxu1 %v7159_v31  ;;  %5260 = vmatprep.mubr.bf16.mxu1 %v3320_v6  ;;  %v7211_v31 = vld [vmem:[#allocation9 + $0x5a8] sm:$0xff]   ;;  %v7215_v6 = vld [vmem:[#allocation9 + $0x5b0] sm:$0xff]  }
 0x369   : > { %6278 = vmatprep.subr.bf16.mxu1 %v7161_v8  ;;  %v7213_v8 = vld [vmem:[#allocation9 + $0x5f0] sm:$0xff]  }
 0x36a   : > { %6257 = vmatpush3.bf16.msra.mxu0 %v7162_v9  ;;  %v7216_v9 = vld [vmem:[#allocation9 + $0x578] sm:$0xff]  }
 0x36b   : > { %6258 = vmatprep.subr.bf16.mxu0 %v7164_v23  ;;  %v3309_v23 = vmax.f32 %v8239_v10, 0.0 }
 0x36c   : > { %6279 = vmatpush3.bf16.msra.mxu1 %v7163_v18  ;;  %v7217_v18 = vld [vmem:[#allocation9 + $0x5f8] sm:$0xff]  }
 0x36d   : > { %6280 = vmatprep.subr.bf16.mxu1 %v7165_v11  ;;  %v3311_v11 = vmax.f32 %v8241_v12, 0.0 }
 0x36e   : > { %6259 = vmatpush3.bf16.msra.mxu0 %v7166_v13  ;;  %v7218_v13 = vld [vmem:[#allocation9 + $0x538] sm:$0xff]  }
 0x36f   : > { %6260 = vmatprep.subr.bf16.mxu0 %v7168_v29  ;;  %v3321_v29 = vpack.c.bf16 %v3309_v23, %v3309_v23 }
 0x370   : > { %6281 = vmatpush3.bf16.msra.mxu1 %v7167_v15  ;;  %v7219_v15 = vld [vmem:[#allocation9 + $0x5b8] sm:$0xff]  }
 0x371   : > { %6282 = vmatprep.subr.bf16.mxu1 %v7169_v21  ;;  %v3323_v21 = vpack.c.bf16 %v3311_v11, %v3311_v11 }
 0x372   : > { %6261 = vmatpush3.bf16.msra.mxu0 %v7170_v14 }
 0x373   : > { %6262 = vmatprep.subr.bf16.mxu0 %v7172_v16  ;;  %v5880_v16 = vld [vmem:[#allocation11] ss:$0 sm:$0xff] }
 0x374   : > { %6283 = vmatpush3.bf16.msra.mxu1 %v7171_v4 }
 0x375   : > { %6284 = vmatprep.subr.bf16.mxu1 %v7173_v30 }
 0x376   : > { %6263 = vmatpush3.bf16.msra.mxu0 %v7174_v22 }
 0x377   : > { %6264 = vmatprep.subr.bf16.mxu0 %v7176_v20 }
 0x378   : > { %6285 = vmatpush3.bf16.msra.mxu1 %v7175_v26 }
 0x379   : > { %6286 = vmatprep.subr.bf16.mxu1 %v7177_v27 }
 0x37a   : > { %6265 = vmatpush3.bf16.msra.mxu0 %v7178_v28 }
 0x37b   : > { %6266 = vmatprep.subr.bf16.mxu0 %v7180_v34 }
 0x37c   : > { %6287 = vmatpush3.bf16.msra.mxu1 %v7179_v33 }
 0x37d   : > { %6288 = vmatprep.subr.bf16.mxu1 %v7181_v35 }
 0x37e   : > { %6267 = vmatpush3.bf16.msra.mxu0 %v7182_v36 }
 0x37f   : > { %6268 = vmatprep.subr.bf16.mxu0 %v7184_v38 }
 0x380   : > { %6289 = vmatpush3.bf16.msra.mxu1 %v7183_v37 }
 0x381   : > { %6290 = vmatprep.subr.bf16.mxu1 %v7185_v39 }
 0x382   : > { %6269 = vmatpush3.bf16.msra.mxu0 %v7186_v41 }
 0x383   : > { %6298 = vmatprep.subr.bf16.mxu0 %v7188_v44 }
 0x384   : > { %6291 = vmatpush3.bf16.msra.mxu1 %v7187_v43 }
 0x385   : > { %6320 = vmatprep.subr.bf16.mxu1 %v7189_v46  ;;  %5221 = vmatmul.mubr.bf16.vlgmr.msra.gmra.mrb[16].mxu0 %v3317_v49 }
 0x386   : > { %6299 = vmatpush3.bf16.msra.mxu0 %v7190_v51  ;;  %5300 = vmatprep.mubr.bf16.mxu0 %v3322_v48 }
 0x387   : > { %5261 = vmatmul.mubr.bf16.vlgmr.msra.gmra.mrb[16].mxu1 %v3319_v50  ;;  %6300 = vmatprep.subr.bf16.mxu0 %v7192_v25 }
 0x388   : > { %6321 = vmatpush3.bf16.msra.mxu1 %v7191_v24  ;;  %5340 = vmatprep.mubr.bf16.mxu1 %v3324_v52 }
 0x389   : > { %6322 = vmatprep.subr.bf16.mxu1 %v7193_v53 }
 0x38a   : > { %6301 = vmatpush3.bf16.msra.mxu0 %v7194_v54 }
 0x38b   : > { %6302 = vmatprep.subr.bf16.mxu0 %v7196_v19 }
 0x38c   : > { %6323 = vmatpush3.bf16.msra.mxu1 %v7195_v17 }
 0x38d   : > { %6324 = vmatprep.subr.bf16.mxu1 %v7197_v55 }
 0x38e   : > { %6303 = vmatpush3.bf16.msra.mxu0 %v7198_v56 }
 0x38f   : > { %6304 = vmatprep.subr.bf16.mxu0 %v7200_v58 }
 0x390   : > { %6325 = vmatpush3.bf16.msra.mxu1 %v7199_v57 }
 0x391   : > { %6326 = vmatprep.subr.bf16.mxu1 %v7201_v59 }
 0x392   : > { %6305 = vmatpush3.bf16.msra.mxu0 %v7202_v60 }
 0x393   : > { %6306 = vmatprep.subr.bf16.mxu0 %v7204_v62 }
 0x394   : > { %6327 = vmatpush3.bf16.msra.mxu1 %v7203_v61 }
 0x395   : > { %6328 = vmatprep.subr.bf16.mxu1 %v7205_v63 }
 0x396   : > { %6307 = vmatpush3.bf16.msra.mxu0 %v7206_v0 }
 0x397   : > { %6308 = vmatprep.subr.bf16.mxu0 %v7208_v2 }
 0x398   : > { %6329 = vmatpush3.bf16.msra.mxu1 %v7207_v1 }
 0x399   : > { %6330 = vmatprep.subr.bf16.mxu1 %v7209_v3 }
 0x39a   : > { %6309 = vmatpush3.bf16.msra.mxu0 %v7210_v7 }
 0x39b   : > { %6310 = vmatprep.subr.bf16.mxu0 %v7212_v32 }
 0x39c   : > { %6331 = vmatpush3.bf16.msra.mxu1 %v7211_v31 }
 0x39d   : > { %6332 = vmatprep.subr.bf16.mxu1 %v7213_v8 }
 0x39e   : > { %6311 = vmatpush3.bf16.msra.mxu0 %v7214_v5 }
 0x39f   : > { %6312 = vmatprep.subr.bf16.mxu0 %v7216_v9 }
 0x3a0   : > { %6333 = vmatpush3.bf16.msra.mxu1 %v7215_v6 }
 0x3a1   : > { %6334 = vmatprep.subr.bf16.mxu1 %v7217_v18 }
 0x3a2   : > { %6313 = vmatpush3.bf16.msra.mxu0 %v7218_v13 }
 0x3a4   : > { %6335 = vmatpush3.bf16.msra.mxu1 %v7219_v15 }
 0x3a5   : > { %5301 = vmatmul.mubr.bf16.vlgmr.msra.gmra.mrb[20].mxu0 %v3321_v29 }
 0x3a7   : > { %5341 = vmatmul.mubr.bf16.vlgmr.msra.gmra.mrb[20].mxu1 %v3323_v21 }
 0x3d8   : > { %v6094_v14 = vpop.f32.mrb[0].mxu0 }
 0x3d9   : > { %v6095_v30 = vpop.f32.mrb[1].mxu0 }
 0x3da   : > { %v6116_v4 = vpop.f32.mrb[0].mxu1  ;;  %v6096_v10 = vadd.f32 %v6095_v30, %v6094_v14  ;;  %v6097_v12 = vpop.f32.mrb[2].mxu0 }
 0x3db   : > { %v6117_v22 = vpop.f32.mrb[1].mxu1  ;;  %v6098_v27 = vpop.f32.mrb[3].mxu0 }
 0x3dc   : > { %v6118_v26 = vadd.f32 %v6117_v22, %v6116_v4  ;;  %v6119_v20 = vpop.f32.mrb[2].mxu1  ;;  %v4903_v33 = vadd.f32 %v6096_v10, %v5880_v16 }
 0x3dd   : > { %v6120_v28 = vpop.f32.mrb[3].mxu1 }
 0x3de   : > { %v4943_v34 = vadd.f32 %v6118_v26, %v4903_v33 }
 0x3f8   : > { %v6138_v35 = vpop.f32.mrb[4].mxu0 }
 0x3f9   : > { %v6139_v37 = vpop.f32.mrb[5].mxu0 }
 0x3fa   : > { %v6160_v36 = vpop.f32.mrb[4].mxu1  ;;  %v6140_v39 = vadd.f32 %v6139_v37, %v6138_v35  ;;  %v6141_v41 = vpop.f32.mrb[6].mxu0 }
 0x3fb   : > { %v6161_v38 = vpop.f32.mrb[5].mxu1  ;;  %v6142_v43 = vpop.f32.mrb[7].mxu0 }
 0x3fc   : > { %v6162_v40 = vadd.f32 %v6161_v38, %v6160_v36  ;;  %v6163_v42 = vpop.f32.mrb[6].mxu1  ;;  %v4983_v45 = vadd.f32 %v6140_v39, %v4943_v34 }
 0x3fd   : > { %v6164_v44 = vpop.f32.mrb[7].mxu1 }
 0x3fe   : > { %v5023_v46 = vadd.f32 %v6162_v40, %v4983_v45 }
 0x418   : > { %v6182_v47 = vpop.f32.mrb[8].mxu0 }
 0x419   : > { %v6183_v50 = vpop.f32.mrb[9].mxu0 }
 0x41a   : > { %v6204_v49 = vpop.f32.mrb[8].mxu1  ;;  %v6184_v24 = vadd.f32 %v6183_v50, %v6182_v47  ;;  %v6185_v53 = vpop.f32.mrb[10].mxu0 }
 0x41b   : > { %v6205_v51 = vpop.f32.mrb[9].mxu1  ;;  %v6186_v52 = vpop.f32.mrb[11].mxu0 }
 0x41c   : > { %v6206_v25 = vadd.f32 %v6205_v51, %v6204_v49  ;;  %v6207_v48 = vpop.f32.mrb[10].mxu1  ;;  %v5063_v17 = vadd.f32 %v6184_v24, %v5023_v46 }
 0x41d   : > { %v6208_v54 = vpop.f32.mrb[11].mxu1 }
 0x41e   : > { %v5103_v19 = vadd.f32 %v6206_v25, %v5063_v17 }
 0x438   : > { %v6226_v55 = vpop.f32.mrb[12].mxu0 }
 0x439   : > { %v6227_v57 = vpop.f32.mrb[13].mxu0 }
 0x43a   : > { %v6248_v56 = vpop.f32.mrb[12].mxu1  ;;  %v6228_v59 = vadd.f32 %v6227_v57, %v6226_v55  ;;  %v6229_v61 = vpop.f32.mrb[14].mxu0 }
 0x43b   : > { %v6249_v58 = vpop.f32.mrb[13].mxu1  ;;  %v6230_v63 = vpop.f32.mrb[15].mxu0 }
 0x43c   : > { %v6250_v60 = vadd.f32 %v6249_v58, %v6248_v56  ;;  %v6251_v62 = vpop.f32.mrb[14].mxu1  ;;  %v5143_v1 = vadd.f32 %v6228_v59, %v5103_v19 }
 0x43d   : > { %v6252_v0 = vpop.f32.mrb[15].mxu1 }
 0x43e   : > { %v5183_v2 = vadd.f32 %v6250_v60, %v5143_v1 }
 0x458   : > { %v6270_v3 = vpop.f32.mrb[16].mxu0 }
 0x459   : > { %v6271_v31 = vpop.f32.mrb[17].mxu0 }
 0x45a   : > { %v6292_v7 = vpop.f32.mrb[16].mxu1  ;;  %v6272_v8 = vadd.f32 %v6271_v31, %v6270_v3  ;;  %v6273_v6 = vpop.f32.mrb[18].mxu0 }
 0x45b   : > { %v6293_v32 = vpop.f32.mrb[17].mxu1  ;;  %v6274_v18 = vpop.f32.mrb[19].mxu0 }
 0x45c   : > { %v6294_v5 = vadd.f32 %v6293_v32, %v6292_v7  ;;  %v6295_v9 = vpop.f32.mrb[18].mxu1  ;;  %v5223_v11 = vadd.f32 %v6272_v8, %v5183_v2 }
 0x45d   : > { %v6296_v23 = vpop.f32.mrb[19].mxu1 }
 0x45e   : > { %v5263_v13 = vadd.f32 %v6294_v5, %v5223_v11 }
 0x478   : > { %v6314_v15 = vpop.f32.mrb[20].mxu0 }
 0x479   : > { %v6315_v21 = vpop.f32.mrb[21].mxu0 }
 0x47a   : > { %v6336_v29 = vpop.f32.mrb[20].mxu1  ;;  %v6316_v4 = vadd.f32 %v6315_v21, %v6314_v15  ;;  %v6317_v30 = vpop.f32.mrb[22].mxu0 }
 0x47b   : > { %v6337_v14 = vpop.f32.mrb[21].mxu1  ;;  %v6318_v10 = vpop.f32.mrb[23].mxu0 }
 0x47c   : > { %v6338_v16 = vadd.f32 %v6337_v14, %v6336_v29  ;;  %v6339_v22 = vpop.f32.mrb[22].mxu1  ;;  %v5303_v12 = vadd.f32 %v6316_v4, %v5263_v13 }
 0x47d   : > { %v6340_v26 = vpop.f32.mrb[23].mxu1 }
 0x47e   : > { %v5343_v20 = vadd.f32 %v6338_v16, %v5303_v12 }
 0x480   : > { %5348 = vst [vmem:[#allocation12] sm:$0xff] %v5343_v20 }
 0x481 PF: > { %p6389_p2 = scmp.eq.s32.totalorder %s7528_s24, 1  ;;  %s7468_s21 = smov [#allocation12]  }
 0x482   : > { %s5358_s25 = sshll.u32 %s7468_s21, 4  ;;  %s5359_s25 = int_to_ptr.vmem [resolvable:$true] %s5358_s25 }
 0x483   : > { %s7364_s26 = scalar_lea.vmem %s5359_s25, 128  ;;  %p7371_p8 = scmp.lt.s32.totalorder %s5359_s25, %s5359_s25 }
 0x484   : > { %p7365_p3 = scmp.ne.s32.totalorder %s5359_s25, %s7364_s26  ;;  %p7372_p10 = scmp.lt.s32.totalorder %s7364_s26, %s7364_s26 }
 0x486   : > { %p7366_p0 = pnand %p7365_p3, %p6389_p2  ;;  %p7373_p12 = por %p7372_p10, %p7371_p8 }
 0x488   : > { %p7367_p6 = pneg %p7366_p0 }
 0x48a   : > { %p7374_p9 = pnand %p7373_p12, %p7367_p6 }
 0x48c   : > { %7377 = shalt.err (!%p7374_p9)
}
 0x48d   : > { %s7378_s15 = scalar_lea.hbm %s8307_s5, 128 }
 0x48e   : > { %p7379_p5 = scmp.ne.s32.totalorder %s8307_s5, %s7378_s15  ;;  %p7384_p7 = scmp.lt.u32.totalorder %s7378_s15, %s8307_s5 }
 0x490   : > { %p7380_p1 = pnand %p7379_p5, %p6389_p2 }
 0x492   : > { %p7381_p4 = pneg %p7380_p1 }
 0x494   : > { %p7386_p11 = pnand %p7384_p7, %p7381_p4 }
 0x496   : > { %7389 = shalt.err (!%p7386_p11)
}
 0x497   : > { %6362 = dma.vmem_to_hbm [thread:$0]  (%p6389_p2), %s5359_s25, 128, %s8307_s5, [#allocation5]  }
 0x498   : > { %7431 = dma.done.wait (%p6389_p2), [#allocation5], 128  }
 0x499   : > { %7433 = vsyncadd (%p6389_p2), [#allocation5], 4294967168 }
 0x49a PF: > { %s23_s23 = sadd.s32 1, %s7456_s23   ;;  %s8322_s18 = smov %s7440_s19 }
 0x49b   : > { %p20_p13 = scmp.ge.s32.totalorder %s23_s23, 4   ;;  %s8323_s19 = smov %s7444_s20 }
 0x49c   : > { %s8324_s20 = smov %s7638_s7  ;;  %s8325_s21 = smov %s7452_s22 }
 0x49d   : > { %s8326_s22 = smov %s8328_s16  ;;  %22 = sbr.rel (!%p20_p13) target bundleno = 8 (0x8), region = 111 }
 0x4a4   :  { %5371 = vsyncpa [#allocation4], 1 }
 0x4a5   :  { %5373 = vsyncpa [#allocation4 + $0x1], 1 }
 0x4a6   :  { %5374 = vsyncpa [#allocation7], 1 }
 0x4a7   :  { %5376 = vsyncpa [#allocation7 + $0x1], 1 }
 0x4a8   :  { %5377 = vsyncpa [#allocation10], 1 }
 0x4a9   :  { %5378 = vsyncpa [#allocation5], 1 }
 0x4aa   :  { %5380 = vsyncpa [#allocation5 + $0x1], 1 }

</bundles_post_ra>
